<compile_context>
chip_gen: v7x
topology: tpu7x:2x2x1
jax: 0.10.0
libtpu: 0.0.40
codegen_flags: <defaults>
</compile_context>

<pallas_src>
import functools
import math

import jax
import jax.numpy as jnp
from jax.experimental import pallas as pl
from jax.experimental.pallas import tpu as pltpu

# ----------------------- config (small synthetic sizes) ----------------------
IMG_C, IMG_H, IMG_W = 4, 16, 16     # input_shape = (C, H, W)
PATCH = 4
LATENT = 32
N_LAYERS = 2
N_HEADS = 2
N_CLASSES = 10
MLP_HIDDEN = 4 * LATENT

N_PATCHES = (IMG_H // PATCH) * (IMG_W // PATCH)      # 16
SEQ_LEN = N_PATCHES + 1                              # 17 (cls token + patches)
PATCH_DIM = PATCH * PATCH * IMG_C                    # 64
PATCH_PAD = 128                                      # lane-dense patch features
HEAD_DIM = LATENT // N_HEADS                         # 16
HEAD_PAD = 128                                       # lane-dense classifier out
LN_EPS = 1e-5
ATTN_SCALE = 1.0 / math.sqrt(HEAD_DIM)

# Set to jnp.bfloat16 on v6e/v7x for ~2x MXU rate (keep elementwise math in
# f32, especially on v5e which has no bf16 VPU/EUP). f32 preserves reference
# numerics for this test.
MATMUL_DTYPE = jnp.float32


# ------------------------------ helpers (in-kernel) ---------------------------
def _mm(a, w):
    return jnp.dot(a.astype(MATMUL_DTYPE), w.astype(MATMUL_DTYPE),
                   preferred_element_type=jnp.float32)


def _layer_norm(x, g, b):
    mu = jnp.mean(x, axis=-1, keepdims=True)
    var = jnp.mean((x - mu) ** 2, axis=-1, keepdims=True)
    return (x - mu) * jax.lax.rsqrt(var + LN_EPS) * g + b


def _gelu(x):
    # TODO(synk): tanh approximation; torch.nn.GELU default is the exact erf form.
    return 0.5 * x * (1.0 + jnp.tanh(0.7978845608028654 * (x + 0.044715 * x * x * x)))


def _to_batch_major(proj, bt):
    # (N_PATCHES, bt, LATENT) -> (bt, N_PATCHES, LATENT)
    if bt == 1:
        # size-1 image axis: summing over it is an exact squeeze that uses the
        # well-supported sublane reduction instead of a middle-dim reshape.
        return jnp.sum(proj, axis=1)[None]
    # TODO(synk): bt > 1 path relies on Mosaic relayout support for this swap.
    return pltpu.einshape("nbd->bnd", proj)


# ----------------------------- fused ViT kernel -------------------------------
def vit_kernel(patches_ref, emb_ref, pos_ref, cls_ref, clsp_ref,
               wqkv_ref, bqkv_ref, wo_ref, bo_ref,
               g1_ref, b1_ref, g2_ref, b2_ref,
               wm1_ref, bm1_ref, wm2_ref, bm2_ref,
               hw_ref, hb_ref, o_ref, *, bt):
    D, S, H, hd = LATENT, SEQ_LEN, N_HEADS, HEAD_DIM
    rows = bt * S

    # ---- embedding: per-position projection as ONE batched MXU contraction ----
    patches = patches_ref[0]                              # (N, bt, Fp)
    proj = jax.lax.dot_general(
        patches, emb_ref[...],
        dimension_numbers=(((2,), (1,)), ((0,), (0,))),   # batch over positions
        preferred_element_type=jnp.float32)               # (N, bt, D)
    tok = _to_batch_major(proj, bt) + pos_ref[...][None]  # (bt, N, D)
    cls_tok = cls_ref[...] + clsp_ref[...]                # (1, D)
    cls_tok = jnp.broadcast_to(cls_tok[None], (bt, 1, D))
    x = jnp.concatenate([cls_tok, tok], axis=1).reshape(rows, D)   # token slab

    # ---- transformer encoder (all layers fused; L tiny -> static unroll) ----
    # TODO(synk): reference TransformerEncoder internals were not provided;
    # standard pre-norm block (x += MHA(LN(x)); x += MLP(LN(x))), dropout = id.
    for l in range(N_LAYERS):
        h = _layer_norm(x, g1_ref[l], b1_ref[l])                    # (rows, D)
        qkv = _mm(h, wqkv_ref[l]) + bqkv_ref[l]                     # fused QKV
        qkv = qkv.reshape(bt, S, 3 * D)
        heads = []
        for hh in range(H):                                         # lane slices
            qh = qkv[:, :, 0 * D + hh * hd:0 * D + (hh + 1) * hd]
            kh = qkv[:, :, 1 * D + hh * hd:1 * D + (hh + 1) * hd]
            vh = qkv[:, :, 2 * D + hh * hd:2 * D + (hh + 1) * hd]
            s = jnp.einsum('bse,bte->bst', qh, kh,
                           preferred_element_type=jnp.float32) * ATTN_SCALE
            s = s - jnp.max(s, axis=-1, keepdims=True)
            p = jnp.exp(s)
            p = p * pl.reciprocal(jnp.sum(p, axis=-1, keepdims=True), approx=True)
            heads.append(jnp.einsum('bst,bte->bse', p, vh,
                                    preferred_element_type=jnp.float32))
        attn = jnp.concatenate(heads, axis=-1).reshape(rows, D)     # concat heads
        x = x + _mm(attn, wo_ref[l]) + bo_ref[l]                    # single Wo

        h2 = _layer_norm(x, g2_ref[l], b2_ref[l])
        m = _gelu(_mm(h2, wm1_ref[l]) + bm1_ref[l])
        x = x + _mm(m, wm2_ref[l]) + bm2_ref[l]

    # ---- classification head on the cls tokens (lane-padded to 128) ----
    cls_rows = x[0:1, :] if bt == 1 else x[::S, :]                  # (bt, D)
    o_ref[0] = _mm(cls_rows, hw_ref[...]) + hb_ref[...]             # dense store


# ----------------------------------- glue -------------------------------------
def patchify(x):
    # x: (B, C, H, W) NCHW -> (B, N_patches, P*P*C); feature order
    # (patch_row, patch_col, channel) matches torch unfold/permute/reshape.
    B, C, Hh, Ww = x.shape
    P = PATCH
    x = x.reshape(B, C, Hh // P, P, Ww // P, P)
    x = x.transpose(0, 2, 4, 3, 5, 1)            # (B, H/P, W/P, P, P, C)
    return x.reshape(B, (Hh // P) * (Ww // P), P * P * C)


def _resident_spec(arr):
    zeros = (0,) * arr.ndim
    return pl.BlockSpec(arr.shape, lambda b, _z=zeros: _z)


def _pick_batch_tile(batch):
    # Fill the MXU M dimension (bt*SEQ_LEN rows, up to ~256) while keeping at
    # least 2 grid steps so both v7x TensorCores get work.
    best = 1
    for cand in range(1, batch + 1):
        if batch % cand:
            continue
        if cand * SEQ_LEN > 256:
            break
        if batch // cand >= 2 or batch == 1:
            best = cand
    return best


def vit_forward(x, params):
    B = x.shape[0]
    bt = _pick_batch_tile(B)
    grid = B // bt

    patches = patchify(x)                                          # (B, N, 64)
    patches = jnp.pad(patches, ((0, 0), (0, 0), (0, PATCH_PAD - PATCH_DIM)))
    # (grid, N, bt, Fp): per-step block is lane-dense and already laid out for
    # the position-batched embedding contraction (no in-kernel transpose).
    patches = patches.reshape(grid, bt, N_PATCHES, PATCH_PAD).transpose(0, 2, 1, 3)

    ep = params["embed"]
    layers = params["layers"]
    stack = lambda name: jnp.stack([lp[name] for lp in layers], axis=0)

    emb_pad = jnp.zeros((N_PATCHES, PATCH_PAD, LATENT), jnp.float32)
    emb_pad = emb_pad.at[:, :PATCH_DIM, :].set(ep["embeddings"])

    wqkv, bqkv = stack("wqkv"), stack("bqkv")          # (L, D, 3D), (L, 1, 3D)
    wo, bo = stack("wo"), stack("bo")                  # (L, D, D),  (L, 1, D)
    g1, b1, g2, b2 = stack("ln1_g"), stack("ln1_b"), stack("ln2_g"), stack("ln2_b")
    wm1, bm1, wm2, bm2 = stack("wm1"), stack("bm1"), stack("wm2"), stack("bm2")

    # lane-pad classifier weights so the kernel's store is 128-lane dense
    hw_pad = jnp.zeros((LATENT, HEAD_PAD), jnp.float32).at[:, :N_CLASSES].set(
        params["head_w"])
    hb_pad = jnp.zeros((1, HEAD_PAD), jnp.float32).at[:, :N_CLASSES].set(
        params["head_b"])

    weights = (emb_pad, ep["embeddings_pos"],
               ep["cls_embeddings"], ep["cls_embeddings_pos"],
               wqkv, bqkv, wo, bo, g1, b1, g2, b2,
               wm1, bm1, wm2, bm2, hw_pad, hb_pad)

    out = pl.pallas_call(
        functools.partial(vit_kernel, bt=bt),
        out_shape=jax.ShapeDtypeStruct((grid, bt, HEAD_PAD), jnp.float32),
        grid=(grid,),
        in_specs=[pl.BlockSpec((1, N_PATCHES, bt, PATCH_PAD),
                               lambda b: (b, 0, 0, 0))]
                 + [_resident_spec(w) for w in weights],
        out_specs=pl.BlockSpec((1, bt, HEAD_PAD), lambda b: (b, 0, 0)),
        compiler_params=pltpu.CompilerParams(
            dimension_semantics=("parallel",)),
    )(patches, *weights)
    return out.reshape(B, HEAD_PAD)[:, :N_CLASSES]


# ------------------------------ parameter init ---------------------------------
def _xavier(key, shape):
    fan_in, fan_out = shape[-2], shape[-1]
    a = math.sqrt(6.0 / (fan_in + fan_out))
    return jax.random.uniform(key, shape, jnp.float32, -a, a)


def init_params(key):
    keys = iter(jax.random.split(key, 64))
    params = {
        "embed": {
            "embeddings": _xavier(next(keys), (N_PATCHES, PATCH_DIM, LATENT)),
            "embeddings_pos": _xavier(next(keys), (N_PATCHES, LATENT)),
            "cls_embeddings": _xavier(next(keys), (1, LATENT)),
            "cls_embeddings_pos": _xavier(next(keys), (1, LATENT)),
        },
        "layers": [],
        "head_w": _xavier(next(keys), (LATENT, N_CLASSES)),
        "head_b": jnp.zeros((1, N_CLASSES), jnp.float32),
    }
    for _ in range(N_LAYERS):
        params["layers"].append({
            "wqkv": _xavier(next(keys), (LATENT, 3 * LATENT)),
            "bqkv": jnp.zeros((1, 3 * LATENT), jnp.float32),
            "wo": _xavier(next(keys), (LATENT, LATENT)),
            "bo": jnp.zeros((1, LATENT), jnp.float32),
            "ln1_g": jnp.ones((1, LATENT), jnp.float32),
            "ln1_b": jnp.zeros((1, LATENT), jnp.float32),
            "ln2_g": jnp.ones((1, LATENT), jnp.float32),
            "ln2_b": jnp.zeros((1, LATENT), jnp.float32),
            "wm1": _xavier(next(keys), (LATENT, MLP_HIDDEN)),
            "bm1": jnp.zeros((1, MLP_HIDDEN), jnp.float32),
            "wm2": _xavier(next(keys), (MLP_HIDDEN, LATENT)),
            "bm2": jnp.zeros((1, LATENT), jnp.float32),
        })
    return params


if __name__ == "__main__":
    key = jax.random.PRNGKey(0)
    k_params, k_x = jax.random.split(key)
    params = init_params(k_params)
    x = jax.random.normal(k_x, (2, IMG_C, IMG_H, IMG_W), jnp.float32)  # NCHW

    vit_fwd = jax.jit(vit_forward)
    logits = jax.block_until_ready(vit_fwd(x, params))
    assert logits.shape == (2, N_CLASSES)
    assert bool(jnp.all(jnp.isfinite(logits)))
    print("KERNEL_OK")
</pallas_src>

<mosaic_0001>
module attributes {stable_mosaic.version = 11 : i64} {
  func.func @vit_kernel(%arg0: i32, %arg1: memref<1x16x1x128xf32, #tpu.memory_space<vmem>>, %arg2: memref<16x128x32xf32, #tpu.memory_space<vmem>>, %arg3: memref<16x32xf32, #tpu.memory_space<vmem>>, %arg4: memref<1x32xf32, #tpu.memory_space<vmem>>, %arg5: memref<1x32xf32, #tpu.memory_space<vmem>>, %arg6: memref<2x32x96xf32, #tpu.memory_space<vmem>>, %arg7: memref<2x1x96xf32, #tpu.memory_space<vmem>>, %arg8: memref<2x32x32xf32, #tpu.memory_space<vmem>>, %arg9: memref<2x1x32xf32, #tpu.memory_space<vmem>>, %arg10: memref<2x1x32xf32, #tpu.memory_space<vmem>>, %arg11: memref<2x1x32xf32, #tpu.memory_space<vmem>>, %arg12: memref<2x1x32xf32, #tpu.memory_space<vmem>>, %arg13: memref<2x1x32xf32, #tpu.memory_space<vmem>>, %arg14: memref<2x32x128xf32, #tpu.memory_space<vmem>>, %arg15: memref<2x1x128xf32, #tpu.memory_space<vmem>>, %arg16: memref<2x128x32xf32, #tpu.memory_space<vmem>>, %arg17: memref<2x1x32xf32, #tpu.memory_space<vmem>>, %arg18: memref<32x128xf32, #tpu.memory_space<vmem>>, %arg19: memref<1x128xf32, #tpu.memory_space<vmem>>, %arg20: memref<1x1x128xf32, #tpu.memory_space<vmem>>) attributes {dimension_semantics = [#tpu.dimension_semantics<parallel>], iteration_bounds = array<i64: 2>, scalar_prefetch = 0 : i64, scratch_operands = 0 : i64, tpu.core_type = #tpu.core_type<tc>, window_params = [{transform_indices = @transform_0, window_bounds = array<i64: 1, 16, 1, 128>}, {pipeline_mode = #tpu.pipeline_mode<synchronous>, transform_indices = @transform_1, window_bounds = array<i64: 16, 128, 32>}, {pipeline_mode = #tpu.pipeline_mode<synchronous>, transform_indices = @transform_2, window_bounds = array<i64: 16, 32>}, {pipeline_mode = #tpu.pipeline_mode<synchronous>, transform_indices = @transform_3, window_bounds = array<i64: 1, 32>}, {pipeline_mode = #tpu.pipeline_mode<synchronous>, transform_indices = @transform_4, window_bounds = array<i64: 1, 32>}, {pipeline_mode = #tpu.pipeline_mode<synchronous>, transform_indices = @transform_5, window_bounds = array<i64: 2, 32, 96>}, {pipeline_mode = #tpu.pipeline_mode<synchronous>, transform_indices = @transform_6, window_bounds = array<i64: 2, 1, 96>}, {pipeline_mode = #tpu.pipeline_mode<synchronous>, transform_indices = @transform_7, window_bounds = array<i64: 2, 32, 32>}, {pipeline_mode = #tpu.pipeline_mode<synchronous>, transform_indices = @transform_8, window_bounds = array<i64: 2, 1, 32>}, {pipeline_mode = #tpu.pipeline_mode<synchronous>, transform_indices = @transform_9, window_bounds = array<i64: 2, 1, 32>}, {pipeline_mode = #tpu.pipeline_mode<synchronous>, transform_indices = @transform_10, window_bounds = array<i64: 2, 1, 32>}, {pipeline_mode = #tpu.pipeline_mode<synchronous>, transform_indices = @transform_11, window_bounds = array<i64: 2, 1, 32>}, {pipeline_mode = #tpu.pipeline_mode<synchronous>, transform_indices = @transform_12, window_bounds = array<i64: 2, 1, 32>}, {pipeline_mode = #tpu.pipeline_mode<synchronous>, transform_indices = @transform_13, window_bounds = array<i64: 2, 32, 128>}, {pipeline_mode = #tpu.pipeline_mode<synchronous>, transform_indices = @transform_14, window_bounds = array<i64: 2, 1, 128>}, {pipeline_mode = #tpu.pipeline_mode<synchronous>, transform_indices = @transform_15, window_bounds = array<i64: 2, 128, 32>}, {pipeline_mode = #tpu.pipeline_mode<synchronous>, transform_indices = @transform_16, window_bounds = array<i64: 2, 1, 32>}, {pipeline_mode = #tpu.pipeline_mode<synchronous>, transform_indices = @transform_17, window_bounds = array<i64: 32, 128>}, {pipeline_mode = #tpu.pipeline_mode<synchronous>, transform_indices = @transform_18, window_bounds = array<i64: 1, 128>}, {transform_indices = @transform_19, window_bounds = array<i64: 1, 1, 128>}]} {
    %c0 = arith.constant 0 : index
    %c0_0 = arith.constant 0 : index
    %c0_1 = arith.constant 0 : index
    %c0_2 = arith.constant 0 : index
    %0 = vector.load %arg1[%c0, %c0_0, %c0_1, %c0_2] : memref<1x16x1x128xf32, #tpu.memory_space<vmem>>, vector<1x16x1x128xf32>
    %1 = vector.shape_cast %0 : vector<1x16x1x128xf32> to vector<16x1x128xf32>
    %c0_3 = arith.constant 0 : index
    %c0_4 = arith.constant 0 : index
    %c0_5 = arith.constant 0 : index
    %2 = vector.load %arg2[%c0_3, %c0_4, %c0_5] : memref<16x128x32xf32, #tpu.memory_space<vmem>>, vector<16x128x32xf32>
    %cst = arith.constant dense<0.000000e+00> : vector<16x1x32xf32>
    %3 = tpu.matmul %1, %2, %cst {dimension_numbers = #tpu.dot_dimension_numbers<[2], [1], [1], [2], [0, 0, 0, 1, 1, 2], [0], [0]>} : vector<16x1x128xf32>, vector<16x128x32xf32>, vector<16x1x32xf32> -> vector<16x1x32xf32>
    %cst_6 = arith.constant dense<0.000000e+00> : vector<16x32xf32>
    %4 = vector.multi_reduction <add>, %3, %cst_6 [1] : vector<16x1x32xf32> to vector<16x32xf32>
    %5 = vector.shape_cast %4 : vector<16x32xf32> to vector<1x16x32xf32>
    %c0_7 = arith.constant 0 : index
    %c0_8 = arith.constant 0 : index
    %6 = vector.load %arg3[%c0_7, %c0_8] : memref<16x32xf32, #tpu.memory_space<vmem>>, vector<16x32xf32>
    %7 = vector.shape_cast %6 : vector<16x32xf32> to vector<1x16x32xf32>
    %8 = arith.addf %5, %7 : vector<1x16x32xf32>
    %c0_9 = arith.constant 0 : index
    %c0_10 = arith.constant 0 : index
    %9 = vector.load %arg4[%c0_9, %c0_10] : memref<1x32xf32, #tpu.memory_space<vmem>>, vector<1x32xf32>
    %c0_11 = arith.constant 0 : index
    %c0_12 = arith.constant 0 : index
    %10 = vector.load %arg5[%c0_11, %c0_12] : memref<1x32xf32, #tpu.memory_space<vmem>>, vector<1x32xf32>
    %11 = arith.addf %9, %10 : vector<1x32xf32>
    %12 = vector.shape_cast %11 : vector<1x32xf32> to vector<1x1x32xf32>
    %13 = tpu.concatenate %12, %8 in 1 : vector<1x1x32xf32>, vector<1x16x32xf32> -> vector<1x17x32xf32>
    %14 = vector.shape_cast %13 : vector<1x17x32xf32> to vector<17x32xf32>
    %c0_13 = arith.constant 0 : index
    %c0_14 = arith.constant 0 : index
    %c0_15 = arith.constant 0 : index
    %15 = vector.load %arg10[%c0_13, %c0_14, %c0_15] : memref<2x1x32xf32, #tpu.memory_space<vmem>>, vector<1x1x32xf32>
    %16 = vector.shape_cast %15 : vector<1x1x32xf32> to vector<1x32xf32>
    %c0_16 = arith.constant 0 : index
    %c0_17 = arith.constant 0 : index
    %c0_18 = arith.constant 0 : index
    %17 = vector.load %arg11[%c0_16, %c0_17, %c0_18] : memref<2x1x32xf32, #tpu.memory_space<vmem>>, vector<1x1x32xf32>
    %18 = vector.shape_cast %17 : vector<1x1x32xf32> to vector<1x32xf32>
    %cst_19 = arith.constant dense<0.000000e+00> : vector<17xf32>
    %19 = vector.multi_reduction <add>, %14, %cst_19 [1] : vector<17x32xf32> to vector<17xf32>
    %20 = vector.shape_cast %19 : vector<17xf32> to vector<17x1xf32>
    %cst_20 = arith.constant 3.200000e+01 : f32
    %21 = vector.broadcast %cst_20 : f32 to vector<17x1xf32>
    %22 = arith.divf %20, %21 : vector<17x1xf32>
    %23 = vector.broadcast %22 : vector<17x1xf32> to vector<17x32xf32>
    %24 = arith.subf %14, %23 : vector<17x32xf32>
    %25 = arith.mulf %24, %24 : vector<17x32xf32>
    %cst_21 = arith.constant dense<0.000000e+00> : vector<17xf32>
    %26 = vector.multi_reduction <add>, %25, %cst_21 [1] : vector<17x32xf32> to vector<17xf32>
    %27 = vector.shape_cast %26 : vector<17xf32> to vector<17x1xf32>
    %cst_22 = arith.constant 3.200000e+01 : f32
    %28 = vector.broadcast %cst_22 : f32 to vector<17x1xf32>
    %29 = arith.divf %27, %28 : vector<17x1xf32>
    %30 = vector.broadcast %22 : vector<17x1xf32> to vector<17x32xf32>
    %31 = arith.subf %14, %30 : vector<17x32xf32>
    %cst_23 = arith.constant 9.99999974E-6 : f32
    %32 = vector.broadcast %cst_23 : f32 to vector<17x1xf32>
    %33 = arith.addf %29, %32 : vector<17x1xf32>
    %34 = math.rsqrt %33 : vector<17x1xf32>
    %35 = vector.broadcast %34 : vector<17x1xf32> to vector<17x32xf32>
    %36 = arith.mulf %31, %35 : vector<17x32xf32>
    %37 = vector.broadcast %16 : vector<1x32xf32> to vector<17x32xf32>
    %38 = arith.mulf %36, %37 : vector<17x32xf32>
    %39 = vector.broadcast %18 : vector<1x32xf32> to vector<17x32xf32>
    %40 = arith.addf %38, %39 : vector<17x32xf32>
    %c0_24 = arith.constant 0 : index
    %c0_25 = arith.constant 0 : index
    %c0_26 = arith.constant 0 : index
    %41 = vector.load %arg6[%c0_24, %c0_25, %c0_26] : memref<2x32x96xf32, #tpu.memory_space<vmem>>, vector<1x32x96xf32>
    %42 = vector.shape_cast %41 : vector<1x32x96xf32> to vector<32x96xf32>
    %cst_27 = arith.constant dense<0.000000e+00> : vector<17x96xf32>
    %43 = tpu.matmul %40, %42, %cst_27 {dimension_numbers = #tpu.dot_dimension_numbers<[1], [0], [0], [1], [0, 0, 1, 1], [], []>} : vector<17x32xf32>, vector<32x96xf32>, vector<17x96xf32> -> vector<17x96xf32>
    %c0_28 = arith.constant 0 : index
    %c0_29 = arith.constant 0 : index
    %c0_30 = arith.constant 0 : index
    %44 = vector.load %arg7[%c0_28, %c0_29, %c0_30] : memref<2x1x96xf32, #tpu.memory_space<vmem>>, vector<1x1x96xf32>
    %45 = vector.shape_cast %44 : vector<1x1x96xf32> to vector<1x96xf32>
    %46 = vector.broadcast %45 : vector<1x96xf32> to vector<17x96xf32>
    %47 = arith.addf %43, %46 : vector<17x96xf32>
    %48 = vector.shape_cast %47 : vector<17x96xf32> to vector<1x17x96xf32>
    %49 = vector.extract_strided_slice %48 {offsets = [0, 0, 0], sizes = [1, 17, 16], strides = [1, 1, 1]} : vector<1x17x96xf32> to vector<1x17x16xf32>
    %50 = vector.extract_strided_slice %48 {offsets = [0, 0, 32], sizes = [1, 17, 16], strides = [1, 1, 1]} : vector<1x17x96xf32> to vector<1x17x16xf32>
    %51 = vector.extract_strided_slice %48 {offsets = [0, 0, 64], sizes = [1, 17, 16], strides = [1, 1, 1]} : vector<1x17x96xf32> to vector<1x17x16xf32>
    "tpu.trace_start"() <{level = 10 : i32, message = "bse,bte->bst"}> : () -> ()
    %cst_31 = arith.constant dense<0.000000e+00> : vector<1x17x17xf32>
    %52 = tpu.matmul %49, %50, %cst_31 {dimension_numbers = #tpu.dot_dimension_numbers<[2], [2], [1], [1], [0, 0, 0, 1, 1, 1], [0], [0]>} : vector<1x17x16xf32>, vector<1x17x16xf32>, vector<1x17x17xf32> -> vector<1x17x17xf32>
    "tpu.trace_stop"() : () -> ()
    %cst_32 = arith.constant 2.500000e-01 : f32
    %53 = vector.broadcast %cst_32 : f32 to vector<1x17x17xf32>
    %54 = arith.mulf %52, %53 : vector<1x17x17xf32>
    %cst_33 = arith.constant dense<0xFF800000> : vector<1x17xf32>
    %55 = vector.multi_reduction <maximumf>, %54, %cst_33 [2] : vector<1x17x17xf32> to vector<1x17xf32>
    %56 = vector.shape_cast %55 : vector<1x17xf32> to vector<1x17x1xf32>
    %57 = vector.broadcast %56 : vector<1x17x1xf32> to vector<1x17x17xf32>
    %58 = arith.subf %54, %57 : vector<1x17x17xf32>
    %59 = math.exp %58 : vector<1x17x17xf32>
    %cst_34 = arith.constant dense<0.000000e+00> : vector<1x17xf32>
    %60 = vector.multi_reduction <add>, %59, %cst_34 [2] : vector<1x17x17xf32> to vector<1x17xf32>
    %61 = vector.shape_cast %60 : vector<1x17xf32> to vector<1x17x1xf32>
    %62 = tpu.reciprocal %61 {approx = true} : vector<1x17x1xf32> -> vector<1x17x1xf32>
    %63 = vector.broadcast %62 : vector<1x17x1xf32> to vector<1x17x17xf32>
    %64 = arith.mulf %59, %63 : vector<1x17x17xf32>
    "tpu.trace_start"() <{level = 10 : i32, message = "bst,bte->bse"}> : () -> ()
    %cst_35 = arith.constant dense<0.000000e+00> : vector<1x17x16xf32>
    %65 = tpu.matmul %64, %51, %cst_35 {dimension_numbers = #tpu.dot_dimension_numbers<[2], [1], [1], [2], [0, 0, 0, 1, 1, 2], [0], [0]>} : vector<1x17x17xf32>, vector<1x17x16xf32>, vector<1x17x16xf32> -> vector<1x17x16xf32>
    "tpu.trace_stop"() : () -> ()
    %66 = vector.extract_strided_slice %48 {offsets = [0, 0, 16], sizes = [1, 17, 16], strides = [1, 1, 1]} : vector<1x17x96xf32> to vector<1x17x16xf32>
    %67 = vector.extract_strided_slice %48 {offsets = [0, 0, 48], sizes = [1, 17, 16], strides = [1, 1, 1]} : vector<1x17x96xf32> to vector<1x17x16xf32>
    %68 = vector.extract_strided_slice %48 {offsets = [0, 0, 80], sizes = [1, 17, 16], strides = [1, 1, 1]} : vector<1x17x96xf32> to vector<1x17x16xf32>
    "tpu.trace_start"() <{level = 10 : i32, message = "bse,bte->bst"}> : () -> ()
    %cst_36 = arith.constant dense<0.000000e+00> : vector<1x17x17xf32>
    %69 = tpu.matmul %66, %67, %cst_36 {dimension_numbers = #tpu.dot_dimension_numbers<[2], [2], [1], [1], [0, 0, 0, 1, 1, 1], [0], [0]>} : vector<1x17x16xf32>, vector<1x17x16xf32>, vector<1x17x17xf32> -> vector<1x17x17xf32>
    "tpu.trace_stop"() : () -> ()
    %cst_37 = arith.constant 2.500000e-01 : f32
    %70 = vector.broadcast %cst_37 : f32 to vector<1x17x17xf32>
    %71 = arith.mulf %69, %70 : vector<1x17x17xf32>
    %cst_38 = arith.constant dense<0xFF800000> : vector<1x17xf32>
    %72 = vector.multi_reduction <maximumf>, %71, %cst_38 [2] : vector<1x17x17xf32> to vector<1x17xf32>
    %73 = vector.shape_cast %72 : vector<1x17xf32> to vector<1x17x1xf32>
    %74 = vector.broadcast %73 : vector<1x17x1xf32> to vector<1x17x17xf32>
    %75 = arith.subf %71, %74 : vector<1x17x17xf32>
    %76 = math.exp %75 : vector<1x17x17xf32>
    %cst_39 = arith.constant dense<0.000000e+00> : vector<1x17xf32>
    %77 = vector.multi_reduction <add>, %76, %cst_39 [2] : vector<1x17x17xf32> to vector<1x17xf32>
    %78 = vector.shape_cast %77 : vector<1x17xf32> to vector<1x17x1xf32>
    %79 = tpu.reciprocal %78 {approx = true} : vector<1x17x1xf32> -> vector<1x17x1xf32>
    %80 = vector.broadcast %79 : vector<1x17x1xf32> to vector<1x17x17xf32>
    %81 = arith.mulf %76, %80 : vector<1x17x17xf32>
    "tpu.trace_start"() <{level = 10 : i32, message = "bst,bte->bse"}> : () -> ()
    %cst_40 = arith.constant dense<0.000000e+00> : vector<1x17x16xf32>
    %82 = tpu.matmul %81, %68, %cst_40 {dimension_numbers = #tpu.dot_dimension_numbers<[2], [1], [1], [2], [0, 0, 0, 1, 1, 2], [0], [0]>} : vector<1x17x17xf32>, vector<1x17x16xf32>, vector<1x17x16xf32> -> vector<1x17x16xf32>
    "tpu.trace_stop"() : () -> ()
    %83 = tpu.concatenate %65, %82 in 2 : vector<1x17x16xf32>, vector<1x17x16xf32> -> vector<1x17x32xf32>
    %84 = vector.shape_cast %83 : vector<1x17x32xf32> to vector<17x32xf32>
    %c0_41 = arith.constant 0 : index
    %c0_42 = arith.constant 0 : index
    %c0_43 = arith.constant 0 : index
    %85 = vector.load %arg8[%c0_41, %c0_42, %c0_43] : memref<2x32x32xf32, #tpu.memory_space<vmem>>, vector<1x32x32xf32>
    %86 = vector.shape_cast %85 : vector<1x32x32xf32> to vector<32x32xf32>
    %cst_44 = arith.constant dense<0.000000e+00> : vector<17x32xf32>
    %87 = tpu.matmul %84, %86, %cst_44 {dimension_numbers = #tpu.dot_dimension_numbers<[1], [0], [0], [1], [0, 0, 1, 1], [], []>} : vector<17x32xf32>, vector<32x32xf32>, vector<17x32xf32> -> vector<17x32xf32>
    %88 = arith.addf %14, %87 : vector<17x32xf32>
    %c0_45 = arith.constant 0 : index
    %c0_46 = arith.constant 0 : index
    %c0_47 = arith.constant 0 : index
    %89 = vector.load %arg9[%c0_45, %c0_46, %c0_47] : memref<2x1x32xf32, #tpu.memory_space<vmem>>, vector<1x1x32xf32>
    %90 = vector.shape_cast %89 : vector<1x1x32xf32> to vector<1x32xf32>
    %91 = vector.broadcast %90 : vector<1x32xf32> to vector<17x32xf32>
    %92 = arith.addf %88, %91 : vector<17x32xf32>
    %c0_48 = arith.constant 0 : index
    %c0_49 = arith.constant 0 : index
    %c0_50 = arith.constant 0 : index
    %93 = vector.load %arg12[%c0_48, %c0_49, %c0_50] : memref<2x1x32xf32, #tpu.memory_space<vmem>>, vector<1x1x32xf32>
    %94 = vector.shape_cast %93 : vector<1x1x32xf32> to vector<1x32xf32>
    %c0_51 = arith.constant 0 : index
    %c0_52 = arith.constant 0 : index
    %c0_53 = arith.constant 0 : index
    %95 = vector.load %arg13[%c0_51, %c0_52, %c0_53] : memref<2x1x32xf32, #tpu.memory_space<vmem>>, vector<1x1x32xf32>
    %96 = vector.shape_cast %95 : vector<1x1x32xf32> to vector<1x32xf32>
    %cst_54 = arith.constant dense<0.000000e+00> : vector<17xf32>
    %97 = vector.multi_reduction <add>, %92, %cst_54 [1] : vector<17x32xf32> to vector<17xf32>
    %98 = vector.shape_cast %97 : vector<17xf32> to vector<17x1xf32>
    %cst_55 = arith.constant 3.200000e+01 : f32
    %99 = vector.broadcast %cst_55 : f32 to vector<17x1xf32>
    %100 = arith.divf %98, %99 : vector<17x1xf32>
    %101 = vector.broadcast %100 : vector<17x1xf32> to vector<17x32xf32>
    %102 = arith.subf %92, %101 : vector<17x32xf32>
    %103 = arith.mulf %102, %102 : vector<17x32xf32>
    %cst_56 = arith.constant dense<0.000000e+00> : vector<17xf32>
    %104 = vector.multi_reduction <add>, %103, %cst_56 [1] : vector<17x32xf32> to vector<17xf32>
    %105 = vector.shape_cast %104 : vector<17xf32> to vector<17x1xf32>
    %cst_57 = arith.constant 3.200000e+01 : f32
    %106 = vector.broadcast %cst_57 : f32 to vector<17x1xf32>
    %107 = arith.divf %105, %106 : vector<17x1xf32>
    %108 = vector.broadcast %100 : vector<17x1xf32> to vector<17x32xf32>
    %109 = arith.subf %92, %108 : vector<17x32xf32>
    %cst_58 = arith.constant 9.99999974E-6 : f32
    %110 = vector.broadcast %cst_58 : f32 to vector<17x1xf32>
    %111 = arith.addf %107, %110 : vector<17x1xf32>
    %112 = math.rsqrt %111 : vector<17x1xf32>
    %113 = vector.broadcast %112 : vector<17x1xf32> to vector<17x32xf32>
    %114 = arith.mulf %109, %113 : vector<17x32xf32>
    %115 = vector.broadcast %94 : vector<1x32xf32> to vector<17x32xf32>
    %116 = arith.mulf %114, %115 : vector<17x32xf32>
    %117 = vector.broadcast %96 : vector<1x32xf32> to vector<17x32xf32>
    %118 = arith.addf %116, %117 : vector<17x32xf32>
    %c0_59 = arith.constant 0 : index
    %c0_60 = arith.constant 0 : index
    %c0_61 = arith.constant 0 : index
    %119 = vector.load %arg14[%c0_59, %c0_60, %c0_61] : memref<2x32x128xf32, #tpu.memory_space<vmem>>, vector<1x32x128xf32>
    %120 = vector.shape_cast %119 : vector<1x32x128xf32> to vector<32x128xf32>
    %cst_62 = arith.constant dense<0.000000e+00> : vector<17x128xf32>
    %121 = tpu.matmul %118, %120, %cst_62 {dimension_numbers = #tpu.dot_dimension_numbers<[1], [0], [0], [1], [0, 0, 1, 1], [], []>} : vector<17x32xf32>, vector<32x128xf32>, vector<17x128xf32> -> vector<17x128xf32>
    %c0_63 = arith.constant 0 : index
    %c0_64 = arith.constant 0 : index
    %c0_65 = arith.constant 0 : index
    %122 = vector.load %arg15[%c0_63, %c0_64, %c0_65] : memref<2x1x128xf32, #tpu.memory_space<vmem>>, vector<1x1x128xf32>
    %123 = vector.shape_cast %122 : vector<1x1x128xf32> to vector<1x128xf32>
    %124 = vector.broadcast %123 : vector<1x128xf32> to vector<17x128xf32>
    %125 = arith.addf %121, %124 : vector<17x128xf32>
    %cst_66 = arith.constant 5.000000e-01 : f32
    %126 = vector.broadcast %cst_66 : f32 to vector<17x128xf32>
    %127 = arith.mulf %126, %125 : vector<17x128xf32>
    %cst_67 = arith.constant 4.471500e-02 : f32
    %128 = vector.broadcast %cst_67 : f32 to vector<17x128xf32>
    %129 = arith.mulf %128, %125 : vector<17x128xf32>
    %130 = arith.mulf %129, %125 : vector<17x128xf32>
    %131 = arith.mulf %130, %125 : vector<17x128xf32>
    %132 = arith.addf %125, %131 : vector<17x128xf32>
    %cst_68 = arith.constant 0.797884583 : f32
    %133 = vector.broadcast %cst_68 : f32 to vector<17x128xf32>
    %134 = arith.mulf %133, %132 : vector<17x128xf32>
    %135 = math.tanh %134 : vector<17x128xf32>
    %cst_69 = arith.constant 1.000000e+00 : f32
    %136 = vector.broadcast %cst_69 : f32 to vector<17x128xf32>
    %137 = arith.addf %136, %135 : vector<17x128xf32>
    %138 = arith.mulf %127, %137 : vector<17x128xf32>
    %c0_70 = arith.constant 0 : index
    %c0_71 = arith.constant 0 : index
    %c0_72 = arith.constant 0 : index
    %139 = vector.load %arg16[%c0_70, %c0_71, %c0_72] : memref<2x128x32xf32, #tpu.memory_space<vmem>>, vector<1x128x32xf32>
    %140 = vector.shape_cast %139 : vector<1x128x32xf32> to vector<128x32xf32>
    %cst_73 = arith.constant dense<0.000000e+00> : vector<17x32xf32>
    %141 = tpu.matmul %138, %140, %cst_73 {dimension_numbers = #tpu.dot_dimension_numbers<[1], [0], [0], [1], [0, 0, 1, 1], [], []>} : vector<17x128xf32>, vector<128x32xf32>, vector<17x32xf32> -> vector<17x32xf32>
    %142 = arith.addf %92, %141 : vector<17x32xf32>
    %c0_74 = arith.constant 0 : index
    %c0_75 = arith.constant 0 : index
    %c0_76 = arith.constant 0 : index
    %143 = vector.load %arg17[%c0_74, %c0_75, %c0_76] : memref<2x1x32xf32, #tpu.memory_space<vmem>>, vector<1x1x32xf32>
    %144 = vector.shape_cast %143 : vector<1x1x32xf32> to vector<1x32xf32>
    %145 = vector.broadcast %144 : vector<1x32xf32> to vector<17x32xf32>
    %146 = arith.addf %142, %145 : vector<17x32xf32>
    %c1 = arith.constant 1 : index
    %c0_77 = arith.constant 0 : index
    %c0_78 = arith.constant 0 : index
    %147 = vector.load %arg10[%c1, %c0_77, %c0_78] : memref<2x1x32xf32, #tpu.memory_space<vmem>>, vector<1x1x32xf32>
    %148 = vector.shape_cast %147 : vector<1x1x32xf32> to vector<1x32xf32>
    %c1_79 = arith.constant 1 : index
    %c0_80 = arith.constant 0 : index
    %c0_81 = arith.constant 0 : index
    %149 = vector.load %arg11[%c1_79, %c0_80, %c0_81] : memref<2x1x32xf32, #tpu.memory_space<vmem>>, vector<1x1x32xf32>
    %150 = vector.shape_cast %149 : vector<1x1x32xf32> to vector<1x32xf32>
    %cst_82 = arith.constant dense<0.000000e+00> : vector<17xf32>
    %151 = vector.multi_reduction <add>, %146, %cst_82 [1] : vector<17x32xf32> to vector<17xf32>
    %152 = vector.shape_cast %151 : vector<17xf32> to vector<17x1xf32>
    %cst_83 = arith.constant 3.200000e+01 : f32
    %153 = vector.broadcast %cst_83 : f32 to vector<17x1xf32>
    %154 = arith.divf %152, %153 : vector<17x1xf32>
    %155 = vector.broadcast %154 : vector<17x1xf32> to vector<17x32xf32>
    %156 = arith.subf %146, %155 : vector<17x32xf32>
    %157 = arith.mulf %156, %156 : vector<17x32xf32>
    %cst_84 = arith.constant dense<0.000000e+00> : vector<17xf32>
    %158 = vector.multi_reduction <add>, %157, %cst_84 [1] : vector<17x32xf32> to vector<17xf32>
    %159 = vector.shape_cast %158 : vector<17xf32> to vector<17x1xf32>
    %cst_85 = arith.constant 3.200000e+01 : f32
    %160 = vector.broadcast %cst_85 : f32 to vector<17x1xf32>
    %161 = arith.divf %159, %160 : vector<17x1xf32>
    %162 = vector.broadcast %154 : vector<17x1xf32> to vector<17x32xf32>
    %163 = arith.subf %146, %162 : vector<17x32xf32>
    %cst_86 = arith.constant 9.99999974E-6 : f32
    %164 = vector.broadcast %cst_86 : f32 to vector<17x1xf32>
    %165 = arith.addf %161, %164 : vector<17x1xf32>
    %166 = math.rsqrt %165 : vector<17x1xf32>
    %167 = vector.broadcast %166 : vector<17x1xf32> to vector<17x32xf32>
    %168 = arith.mulf %163, %167 : vector<17x32xf32>
    %169 = vector.broadcast %148 : vector<1x32xf32> to vector<17x32xf32>
    %170 = arith.mulf %168, %169 : vector<17x32xf32>
    %171 = vector.broadcast %150 : vector<1x32xf32> to vector<17x32xf32>
    %172 = arith.addf %170, %171 : vector<17x32xf32>
    %c1_87 = arith.constant 1 : index
    %c0_88 = arith.constant 0 : index
    %c0_89 = arith.constant 0 : index
    %173 = vector.load %arg6[%c1_87, %c0_88, %c0_89] : memref<2x32x96xf32, #tpu.memory_space<vmem>>, vector<1x32x96xf32>
    %174 = vector.shape_cast %173 : vector<1x32x96xf32> to vector<32x96xf32>
    %cst_90 = arith.constant dense<0.000000e+00> : vector<17x96xf32>
    %175 = tpu.matmul %172, %174, %cst_90 {dimension_numbers = #tpu.dot_dimension_numbers<[1], [0], [0], [1], [0, 0, 1, 1], [], []>} : vector<17x32xf32>, vector<32x96xf32>, vector<17x96xf32> -> vector<17x96xf32>
    %c1_91 = arith.constant 1 : index
    %c0_92 = arith.constant 0 : index
    %c0_93 = arith.constant 0 : index
    %176 = vector.load %arg7[%c1_91, %c0_92, %c0_93] : memref<2x1x96xf32, #tpu.memory_space<vmem>>, vector<1x1x96xf32>
    %177 = vector.shape_cast %176 : vector<1x1x96xf32> to vector<1x96xf32>
    %178 = vector.broadcast %177 : vector<1x96xf32> to vector<17x96xf32>
    %179 = arith.addf %175, %178 : vector<17x96xf32>
    %180 = vector.shape_cast %179 : vector<17x96xf32> to vector<1x17x96xf32>
    %181 = vector.extract_strided_slice %180 {offsets = [0, 0, 0], sizes = [1, 17, 16], strides = [1, 1, 1]} : vector<1x17x96xf32> to vector<1x17x16xf32>
    %182 = vector.extract_strided_slice %180 {offsets = [0, 0, 32], sizes = [1, 17, 16], strides = [1, 1, 1]} : vector<1x17x96xf32> to vector<1x17x16xf32>
    %183 = vector.extract_strided_slice %180 {offsets = [0, 0, 64], sizes = [1, 17, 16], strides = [1, 1, 1]} : vector<1x17x96xf32> to vector<1x17x16xf32>
    "tpu.trace_start"() <{level = 10 : i32, message = "bse,bte->bst"}> : () -> ()
    %cst_94 = arith.constant dense<0.000000e+00> : vector<1x17x17xf32>
    %184 = tpu.matmul %181, %182, %cst_94 {dimension_numbers = #tpu.dot_dimension_numbers<[2], [2], [1], [1], [0, 0, 0, 1, 1, 1], [0], [0]>} : vector<1x17x16xf32>, vector<1x17x16xf32>, vector<1x17x17xf32> -> vector<1x17x17xf32>
    "tpu.trace_stop"() : () -> ()
    %cst_95 = arith.constant 2.500000e-01 : f32
    %185 = vector.broadcast %cst_95 : f32 to vector<1x17x17xf32>
    %186 = arith.mulf %184, %185 : vector<1x17x17xf32>
    %cst_96 = arith.constant dense<0xFF800000> : vector<1x17xf32>
    %187 = vector.multi_reduction <maximumf>, %186, %cst_96 [2] : vector<1x17x17xf32> to vector<1x17xf32>
    %188 = vector.shape_cast %187 : vector<1x17xf32> to vector<1x17x1xf32>
    %189 = vector.broadcast %188 : vector<1x17x1xf32> to vector<1x17x17xf32>
    %190 = arith.subf %186, %189 : vector<1x17x17xf32>
    %191 = math.exp %190 : vector<1x17x17xf32>
    %cst_97 = arith.constant dense<0.000000e+00> : vector<1x17xf32>
    %192 = vector.multi_reduction <add>, %191, %cst_97 [2] : vector<1x17x17xf32> to vector<1x17xf32>
    %193 = vector.shape_cast %192 : vector<1x17xf32> to vector<1x17x1xf32>
    %194 = tpu.reciprocal %193 {approx = true} : vector<1x17x1xf32> -> vector<1x17x1xf32>
    %195 = vector.broadcast %194 : vector<1x17x1xf32> to vector<1x17x17xf32>
    %196 = arith.mulf %191, %195 : vector<1x17x17xf32>
    "tpu.trace_start"() <{level = 10 : i32, message = "bst,bte->bse"}> : () -> ()
    %cst_98 = arith.constant dense<0.000000e+00> : vector<1x17x16xf32>
    %197 = tpu.matmul %196, %183, %cst_98 {dimension_numbers = #tpu.dot_dimension_numbers<[2], [1], [1], [2], [0, 0, 0, 1, 1, 2], [0], [0]>} : vector<1x17x17xf32>, vector<1x17x16xf32>, vector<1x17x16xf32> -> vector<1x17x16xf32>
    "tpu.trace_stop"() : () -> ()
    %198 = vector.extract_strided_slice %180 {offsets = [0, 0, 16], sizes = [1, 17, 16], strides = [1, 1, 1]} : vector<1x17x96xf32> to vector<1x17x16xf32>
    %199 = vector.extract_strided_slice %180 {offsets = [0, 0, 48], sizes = [1, 17, 16], strides = [1, 1, 1]} : vector<1x17x96xf32> to vector<1x17x16xf32>
    %200 = vector.extract_strided_slice %180 {offsets = [0, 0, 80], sizes = [1, 17, 16], strides = [1, 1, 1]} : vector<1x17x96xf32> to vector<1x17x16xf32>
    "tpu.trace_start"() <{level = 10 : i32, message = "bse,bte->bst"}> : () -> ()
    %cst_99 = arith.constant dense<0.000000e+00> : vector<1x17x17xf32>
    %201 = tpu.matmul %198, %199, %cst_99 {dimension_numbers = #tpu.dot_dimension_numbers<[2], [2], [1], [1], [0, 0, 0, 1, 1, 1], [0], [0]>} : vector<1x17x16xf32>, vector<1x17x16xf32>, vector<1x17x17xf32> -> vector<1x17x17xf32>
    "tpu.trace_stop"() : () -> ()
    %cst_100 = arith.constant 2.500000e-01 : f32
    %202 = vector.broadcast %cst_100 : f32 to vector<1x17x17xf32>
    %203 = arith.mulf %201, %202 : vector<1x17x17xf32>
    %cst_101 = arith.constant dense<0xFF800000> : vector<1x17xf32>
    %204 = vector.multi_reduction <maximumf>, %203, %cst_101 [2] : vector<1x17x17xf32> to vector<1x17xf32>
    %205 = vector.shape_cast %204 : vector<1x17xf32> to vector<1x17x1xf32>
    %206 = vector.broadcast %205 : vector<1x17x1xf32> to vector<1x17x17xf32>
    %207 = arith.subf %203, %206 : vector<1x17x17xf32>
    %208 = math.exp %207 : vector<1x17x17xf32>
    %cst_102 = arith.constant dense<0.000000e+00> : vector<1x17xf32>
    %209 = vector.multi_reduction <add>, %208, %cst_102 [2] : vector<1x17x17xf32> to vector<1x17xf32>
    %210 = vector.shape_cast %209 : vector<1x17xf32> to vector<1x17x1xf32>
    %211 = tpu.reciprocal %210 {approx = true} : vector<1x17x1xf32> -> vector<1x17x1xf32>
    %212 = vector.broadcast %211 : vector<1x17x1xf32> to vector<1x17x17xf32>
    %213 = arith.mulf %208, %212 : vector<1x17x17xf32>
    "tpu.trace_start"() <{level = 10 : i32, message = "bst,bte->bse"}> : () -> ()
    %cst_103 = arith.constant dense<0.000000e+00> : vector<1x17x16xf32>
    %214 = tpu.matmul %213, %200, %cst_103 {dimension_numbers = #tpu.dot_dimension_numbers<[2], [1], [1], [2], [0, 0, 0, 1, 1, 2], [0], [0]>} : vector<1x17x17xf32>, vector<1x17x16xf32>, vector<1x17x16xf32> -> vector<1x17x16xf32>
    "tpu.trace_stop"() : () -> ()
    %215 = tpu.concatenate %197, %214 in 2 : vector<1x17x16xf32>, vector<1x17x16xf32> -> vector<1x17x32xf32>
    %216 = vector.shape_cast %215 : vector<1x17x32xf32> to vector<17x32xf32>
    %c1_104 = arith.constant 1 : index
    %c0_105 = arith.constant 0 : index
    %c0_106 = arith.constant 0 : index
    %217 = vector.load %arg8[%c1_104, %c0_105, %c0_106] : memref<2x32x32xf32, #tpu.memory_space<vmem>>, vector<1x32x32xf32>
    %218 = vector.shape_cast %217 : vector<1x32x32xf32> to vector<32x32xf32>
    %cst_107 = arith.constant dense<0.000000e+00> : vector<17x32xf32>
    %219 = tpu.matmul %216, %218, %cst_107 {dimension_numbers = #tpu.dot_dimension_numbers<[1], [0], [0], [1], [0, 0, 1, 1], [], []>} : vector<17x32xf32>, vector<32x32xf32>, vector<17x32xf32> -> vector<17x32xf32>
    %220 = arith.addf %146, %219 : vector<17x32xf32>
    %c1_108 = arith.constant 1 : index
    %c0_109 = arith.constant 0 : index
    %c0_110 = arith.constant 0 : index
    %221 = vector.load %arg9[%c1_108, %c0_109, %c0_110] : memref<2x1x32xf32, #tpu.memory_space<vmem>>, vector<1x1x32xf32>
    %222 = vector.shape_cast %221 : vector<1x1x32xf32> to vector<1x32xf32>
    %223 = vector.broadcast %222 : vector<1x32xf32> to vector<17x32xf32>
    %224 = arith.addf %220, %223 : vector<17x32xf32>
    %c1_111 = arith.constant 1 : index
    %c0_112 = arith.constant 0 : index
    %c0_113 = arith.constant 0 : index
    %225 = vector.load %arg12[%c1_111, %c0_112, %c0_113] : memref<2x1x32xf32, #tpu.memory_space<vmem>>, vector<1x1x32xf32>
    %226 = vector.shape_cast %225 : vector<1x1x32xf32> to vector<1x32xf32>
    %c1_114 = arith.constant 1 : index
    %c0_115 = arith.constant 0 : index
    %c0_116 = arith.constant 0 : index
    %227 = vector.load %arg13[%c1_114, %c0_115, %c0_116] : memref<2x1x32xf32, #tpu.memory_space<vmem>>, vector<1x1x32xf32>
    %228 = vector.shape_cast %227 : vector<1x1x32xf32> to vector<1x32xf32>
    %cst_117 = arith.constant dense<0.000000e+00> : vector<17xf32>
    %229 = vector.multi_reduction <add>, %224, %cst_117 [1] : vector<17x32xf32> to vector<17xf32>
    %230 = vector.shape_cast %229 : vector<17xf32> to vector<17x1xf32>
    %cst_118 = arith.constant 3.200000e+01 : f32
    %231 = vector.broadcast %cst_118 : f32 to vector<17x1xf32>
    %232 = arith.divf %230, %231 : vector<17x1xf32>
    %233 = vector.broadcast %232 : vector<17x1xf32> to vector<17x32xf32>
    %234 = arith.subf %224, %233 : vector<17x32xf32>
    %235 = arith.mulf %234, %234 : vector<17x32xf32>
    %cst_119 = arith.constant dense<0.000000e+00> : vector<17xf32>
    %236 = vector.multi_reduction <add>, %235, %cst_119 [1] : vector<17x32xf32> to vector<17xf32>
    %237 = vector.shape_cast %236 : vector<17xf32> to vector<17x1xf32>
    %cst_120 = arith.constant 3.200000e+01 : f32
    %238 = vector.broadcast %cst_120 : f32 to vector<17x1xf32>
    %239 = arith.divf %237, %238 : vector<17x1xf32>
    %240 = vector.broadcast %232 : vector<17x1xf32> to vector<17x32xf32>
    %241 = arith.subf %224, %240 : vector<17x32xf32>
    %cst_121 = arith.constant 9.99999974E-6 : f32
    %242 = vector.broadcast %cst_121 : f32 to vector<17x1xf32>
    %243 = arith.addf %239, %242 : vector<17x1xf32>
    %244 = math.rsqrt %243 : vector<17x1xf32>
    %245 = vector.broadcast %244 : vector<17x1xf32> to vector<17x32xf32>
    %246 = arith.mulf %241, %245 : vector<17x32xf32>
    %247 = vector.broadcast %226 : vector<1x32xf32> to vector<17x32xf32>
    %248 = arith.mulf %246, %247 : vector<17x32xf32>
    %249 = vector.broadcast %228 : vector<1x32xf32> to vector<17x32xf32>
    %250 = arith.addf %248, %249 : vector<17x32xf32>
    %c1_122 = arith.constant 1 : index
    %c0_123 = arith.constant 0 : index
    %c0_124 = arith.constant 0 : index
    %251 = vector.load %arg14[%c1_122, %c0_123, %c0_124] : memref<2x32x128xf32, #tpu.memory_space<vmem>>, vector<1x32x128xf32>
    %252 = vector.shape_cast %251 : vector<1x32x128xf32> to vector<32x128xf32>
    %cst_125 = arith.constant dense<0.000000e+00> : vector<17x128xf32>
    %253 = tpu.matmul %250, %252, %cst_125 {dimension_numbers = #tpu.dot_dimension_numbers<[1], [0], [0], [1], [0, 0, 1, 1], [], []>} : vector<17x32xf32>, vector<32x128xf32>, vector<17x128xf32> -> vector<17x128xf32>
    %c1_126 = arith.constant 1 : index
    %c0_127 = arith.constant 0 : index
    %c0_128 = arith.constant 0 : index
    %254 = vector.load %arg15[%c1_126, %c0_127, %c0_128] : memref<2x1x128xf32, #tpu.memory_space<vmem>>, vector<1x1x128xf32>
    %255 = vector.shape_cast %254 : vector<1x1x128xf32> to vector<1x128xf32>
    %256 = vector.broadcast %255 : vector<1x128xf32> to vector<17x128xf32>
    %257 = arith.addf %253, %256 : vector<17x128xf32>
    %cst_129 = arith.constant 5.000000e-01 : f32
    %258 = vector.broadcast %cst_129 : f32 to vector<17x128xf32>
    %259 = arith.mulf %258, %257 : vector<17x128xf32>
    %cst_130 = arith.constant 4.471500e-02 : f32
    %260 = vector.broadcast %cst_130 : f32 to vector<17x128xf32>
    %261 = arith.mulf %260, %257 : vector<17x128xf32>
    %262 = arith.mulf %261, %257 : vector<17x128xf32>
    %263 = arith.mulf %262, %257 : vector<17x128xf32>
    %264 = arith.addf %257, %263 : vector<17x128xf32>
    %cst_131 = arith.constant 0.797884583 : f32
    %265 = vector.broadcast %cst_131 : f32 to vector<17x128xf32>
    %266 = arith.mulf %265, %264 : vector<17x128xf32>
    %267 = math.tanh %266 : vector<17x128xf32>
    %cst_132 = arith.constant 1.000000e+00 : f32
    %268 = vector.broadcast %cst_132 : f32 to vector<17x128xf32>
    %269 = arith.addf %268, %267 : vector<17x128xf32>
    %270 = arith.mulf %259, %269 : vector<17x128xf32>
    %c1_133 = arith.constant 1 : index
    %c0_134 = arith.constant 0 : index
    %c0_135 = arith.constant 0 : index
    %271 = vector.load %arg16[%c1_133, %c0_134, %c0_135] : memref<2x128x32xf32, #tpu.memory_space<vmem>>, vector<1x128x32xf32>
    %272 = vector.shape_cast %271 : vector<1x128x32xf32> to vector<128x32xf32>
    %cst_136 = arith.constant dense<0.000000e+00> : vector<17x32xf32>
    %273 = tpu.matmul %270, %272, %cst_136 {dimension_numbers = #tpu.dot_dimension_numbers<[1], [0], [0], [1], [0, 0, 1, 1], [], []>} : vector<17x128xf32>, vector<128x32xf32>, vector<17x32xf32> -> vector<17x32xf32>
    %274 = arith.addf %224, %273 : vector<17x32xf32>
    %c1_137 = arith.constant 1 : index
    %c0_138 = arith.constant 0 : index
    %c0_139 = arith.constant 0 : index
    %275 = vector.load %arg17[%c1_137, %c0_138, %c0_139] : memref<2x1x32xf32, #tpu.memory_space<vmem>>, vector<1x1x32xf32>
    %276 = vector.shape_cast %275 : vector<1x1x32xf32> to vector<1x32xf32>
    %277 = vector.broadcast %276 : vector<1x32xf32> to vector<17x32xf32>
    %278 = arith.addf %274, %277 : vector<17x32xf32>
    %279 = vector.extract_strided_slice %278 {offsets = [0, 0], sizes = [1, 32], strides = [1, 1]} : vector<17x32xf32> to vector<1x32xf32>
    %c0_140 = arith.constant 0 : index
    %c0_141 = arith.constant 0 : index
    %280 = vector.load %arg18[%c0_140, %c0_141] : memref<32x128xf32, #tpu.memory_space<vmem>>, vector<32x128xf32>
    %cst_142 = arith.constant dense<0.000000e+00> : vector<1x128xf32>
    %281 = tpu.matmul %279, %280, %cst_142 {dimension_numbers = #tpu.dot_dimension_numbers<[1], [0], [0], [1], [0, 0, 1, 1], [], []>} : vector<1x32xf32>, vector<32x128xf32>, vector<1x128xf32> -> vector<1x128xf32>
    %c0_143 = arith.constant 0 : index
    %c0_144 = arith.constant 0 : index
    %282 = vector.load %arg19[%c0_143, %c0_144] : memref<1x128xf32, #tpu.memory_space<vmem>>, vector<1x128xf32>
    %283 = arith.addf %281, %282 : vector<1x128xf32>
    %c0_145 = arith.constant 0 : index
    %c0_146 = arith.constant 0 : index
    %c0_147 = arith.constant 0 : index
    %284 = vector.load %arg20[%c0_145, %c0_146, %c0_147] : memref<1x1x128xf32, #tpu.memory_space<vmem>>, vector<1x1x128xf32>
    %285 = vector.shape_cast %284 : vector<1x1x128xf32> to vector<1x128xf32>
    %286 = vector.shape_cast %283 : vector<1x128xf32> to vector<1x1x128xf32>
    tpu.vector_store %arg20[%c0_145, %c0_146, %c0_147], %286 {strides = array<i32>} : memref<1x1x128xf32, #tpu.memory_space<vmem>>, vector<1x1x128xf32>,
    return
  }
  func.func @transform_0(%arg0: i32) -> (i32, i32, i32, i32) {
    %c0_i32 = arith.constant 0 : i32
    %c0_i32_0 = arith.constant 0 : i32
    %c0_i32_1 = arith.constant 0 : i32
    %c0_i32_2 = arith.constant 0 : i32
    return %arg0, %c0_i32, %c0_i32_0, %c0_i32_1 : i32, i32, i32, i32
  }
  func.func @transform_1(%arg0: i32) -> (i32, i32, i32) {
    %c0_i32 = arith.constant 0 : i32
    %c0_i32_0 = arith.constant 0 : i32
    %c0_i32_1 = arith.constant 0 : i32
    %c0_i32_2 = arith.constant 0 : i32
    return %c0_i32, %c0_i32_0, %c0_i32_1 : i32, i32, i32
  }
  func.func @transform_2(%arg0: i32) -> (i32, i32) {
    %c0_i32 = arith.constant 0 : i32
    %c0_i32_0 = arith.constant 0 : i32
    %c0_i32_1 = arith.constant 0 : i32
    return %c0_i32, %c0_i32_0 : i32, i32
  }
  func.func @transform_3(%arg0: i32) -> (i32, i32) {
    %c0_i32 = arith.constant 0 : i32
    %c0_i32_0 = arith.constant 0 : i32
    %c0_i32_1 = arith.constant 0 : i32
    return %c0_i32, %c0_i32_0 : i32, i32
  }
  func.func @transform_4(%arg0: i32) -> (i32, i32) {
    %c0_i32 = arith.constant 0 : i32
    %c0_i32_0 = arith.constant 0 : i32
    %c0_i32_1 = arith.constant 0 : i32
    return %c0_i32, %c0_i32_0 : i32, i32
  }
  func.func @transform_5(%arg0: i32) -> (i32, i32, i32) {
    %c0_i32 = arith.constant 0 : i32
    %c0_i32_0 = arith.constant 0 : i32
    %c0_i32_1 = arith.constant 0 : i32
    %c0_i32_2 = arith.constant 0 : i32
    return %c0_i32, %c0_i32_0, %c0_i32_1 : i32, i32, i32
  }
  func.func @transform_6(%arg0: i32) -> (i32, i32, i32) {
    %c0_i32 = arith.constant 0 : i32
    %c0_i32_0 = arith.constant 0 : i32
    %c0_i32_1 = arith.constant 0 : i32
    %c0_i32_2 = arith.constant 0 : i32
    return %c0_i32, %c0_i32_0, %c0_i32_1 : i32, i32, i32
  }
  func.func @transform_7(%arg0: i32) -> (i32, i32, i32) {
    %c0_i32 = arith.constant 0 : i32
    %c0_i32_0 = arith.constant 0 : i32
    %c0_i32_1 = arith.constant 0 : i32
    %c0_i32_2 = arith.constant 0 : i32
    return %c0_i32, %c0_i32_0, %c0_i32_1 : i32, i32, i32
  }
  func.func @transform_8(%arg0: i32) -> (i32, i32, i32) {
    %c0_i32 = arith.constant 0 : i32
    %c0_i32_0 = arith.constant 0 : i32
    %c0_i32_1 = arith.constant 0 : i32
    %c0_i32_2 = arith.constant 0 : i32
    return %c0_i32, %c0_i32_0, %c0_i32_1 : i32, i32, i32
  }
  func.func @transform_9(%arg0: i32) -> (i32, i32, i32) {
    %c0_i32 = arith.constant 0 : i32
    %c0_i32_0 = arith.constant 0 : i32
    %c0_i32_1 = arith.constant 0 : i32
    %c0_i32_2 = arith.constant 0 : i32
    return %c0_i32, %c0_i32_0, %c0_i32_1 : i32, i32, i32
  }
  func.func @transform_10(%arg0: i32) -> (i32, i32, i32) {
    %c0_i32 = arith.constant 0 : i32
    %c0_i32_0 = arith.constant 0 : i32
    %c0_i32_1 = arith.constant 0 : i32
    %c0_i32_2 = arith.constant 0 : i32
    return %c0_i32, %c0_i32_0, %c0_i32_1 : i32, i32, i32
  }
  func.func @transform_11(%arg0: i32) -> (i32, i32, i32) {
    %c0_i32 = arith.constant 0 : i32
    %c0_i32_0 = arith.constant 0 : i32
    %c0_i32_1 = arith.constant 0 : i32
    %c0_i32_2 = arith.constant 0 : i32
    return %c0_i32, %c0_i32_0, %c0_i32_1 : i32, i32, i32
  }
  func.func @transform_12(%arg0: i32) -> (i32, i32, i32) {
    %c0_i32 = arith.constant 0 : i32
    %c0_i32_0 = arith.constant 0 : i32
    %c0_i32_1 = arith.constant 0 : i32
    %c0_i32_2 = arith.constant 0 : i32
    return %c0_i32, %c0_i32_0, %c0_i32_1 : i32, i32, i32
  }
  func.func @transform_13(%arg0: i32) -> (i32, i32, i32) {
    %c0_i32 = arith.constant 0 : i32
    %c0_i32_0 = arith.constant 0 : i32
    %c0_i32_1 = arith.constant 0 : i32
    %c0_i32_2 = arith.constant 0 : i32
    return %c0_i32, %c0_i32_0, %c0_i32_1 : i32, i32, i32
  }
  func.func @transform_14(%arg0: i32) -> (i32, i32, i32) {
    %c0_i32 = arith.constant 0 : i32
    %c0_i32_0 = arith.constant 0 : i32
    %c0_i32_1 = arith.constant 0 : i32
    %c0_i32_2 = arith.constant 0 : i32
    return %c0_i32, %c0_i32_0, %c0_i32_1 : i32, i32, i32
  }
  func.func @transform_15(%arg0: i32) -> (i32, i32, i32) {
    %c0_i32 = arith.constant 0 : i32
    %c0_i32_0 = arith.constant 0 : i32
    %c0_i32_1 = arith.constant 0 : i32
    %c0_i32_2 = arith.constant 0 : i32
    return %c0_i32, %c0_i32_0, %c0_i32_1 : i32, i32, i32
  }
  func.func @transform_16(%arg0: i32) -> (i32, i32, i32) {
    %c0_i32 = arith.constant 0 : i32
    %c0_i32_0 = arith.constant 0 : i32
    %c0_i32_1 = arith.constant 0 : i32
    %c0_i32_2 = arith.constant 0 : i32
    return %c0_i32, %c0_i32_0, %c0_i32_1 : i32, i32, i32
  }
  func.func @transform_17(%arg0: i32) -> (i32, i32) {
    %c0_i32 = arith.constant 0 : i32
    %c0_i32_0 = arith.constant 0 : i32
    %c0_i32_1 = arith.constant 0 : i32
    return %c0_i32, %c0_i32_0 : i32, i32
  }
  func.func @transform_18(%arg0: i32) -> (i32, i32) {
    %c0_i32 = arith.constant 0 : i32
    %c0_i32_0 = arith.constant 0 : i32
    %c0_i32_1 = arith.constant 0 : i32
    return %c0_i32, %c0_i32_0 : i32, i32
  }
  func.func @transform_19(%arg0: i32) -> (i32, i32, i32) {
    %c0_i32 = arith.constant 0 : i32
    %c0_i32_0 = arith.constant 0 : i32
    %c0_i32_1 = arith.constant 0 : i32
    return %arg0, %c0_i32, %c0_i32_0 : i32, i32, i32
  }
}

</mosaic_0001>

<bundles_post_ra>
// kernel: vit_forward.1
= control target key start
LH: loop header
LB: loop body
LE: loop exit
PB: predicated region body
PF: predicated region fallthrough
CT: control target
= control target key end

     0   :  { %s8314_s0 = inlined_call_operand.vmem [shape: f32[2,16,1,128], index: 0, kind: input, shape index: {}]   ;;  %s8315_s1 = inlined_call_operand.vmem [shape: f32[16,128,32], index: 1, kind: input, shape index: {}]   ;;  %s8316_s2 = inlined_call_operand.vmem [shape: f32[16,32], index: 2, kind: input, shape index: {}]   ;;  %s8317_s3 = inlined_call_operand.vmem [shape: f32[1,32], index: 3, kind: input, shape index: {}]   ;;  %s8318_s4 = inlined_call_operand.vmem [shape: f32[1,32], index: 4, kind: input, shape index: {}]   ;;  %s8319_s5 = inlined_call_operand.vmem [shape: f32[2,32,96], index: 5, kind: input, shape index: {}]   ;;  %s8320_s6 = inlined_call_operand.vmem [shape: f32[2,1,96], index: 6, kind: input, shape index: {}]   ;;  %s8321_s7 = inlined_call_operand.vmem [shape: f32[2,32,32], index: 7, kind: input, shape index: {}]   ;;  %s8322_s8 = inlined_call_operand.vmem [shape: f32[2,1,32], index: 8, kind: input, shape index: {}]   ;;  %s8323_s9 = inlined_call_operand.vmem [shape: f32[2,1,32], index: 9, kind: input, shape index: {}]   ;;  %s8324_s10 = inlined_call_operand.vmem [shape: f32[2,1,32], index: 10, kind: input, shape index: {}]   ;;  %s8325_s11 = inlined_call_operand.vmem [shape: f32[2,1,32], index: 11, kind: input, shape index: {}]   ;;  %s8326_s12 = inlined_call_operand.vmem [shape: f32[2,1,32], index: 12, kind: input, shape index: {}]   ;;  %s8327_s13 = inlined_call_operand.vmem [shape: f32[2,32,128], index: 13, kind: input, shape index: {}]   ;;  %s8328_s14 = inlined_call_operand.vmem [shape: f32[2,1,128], index: 14, kind: input, shape index: {}]   ;;  %s8329_s15 = inlined_call_operand.vmem [shape: f32[2,128,32], index: 15, kind: input, shape index: {}]   ;;  %s8330_s16 = inlined_call_operand.vmem [shape: f32[2,1,32], index: 16, kind: input, shape index: {}]   ;;  %s8331_s17 = inlined_call_operand.vmem [shape: f32[32,128], index: 17, kind: input, shape index: {}]   ;;  %s8332_s18 = inlined_call_operand.vmem [shape: f32[1,128], index: 18, kind: input, shape index: {}]   ;;  %s8333_s19 = inlined_call_operand.hbm [shape: f32[2,1,128], index: 19, kind: output, shape index: {}]  }
   0x1   :  { %8351 = sst [smem:[#allocation11_spill]] %s8314_s0 }
   0x2   :  { %8352 = sst [smem:[#allocation12_spill]] %s8315_s1 }
   0x3   :  { %8353 = sst [smem:[#allocation13_spill]] %s8316_s2 }
   0x4   :  { %8354 = sst [smem:[#allocation14_spill]] %s8317_s3 }
   0x5   :  { %8355 = sst [smem:[#allocation15_spill]] %s8318_s4 }
   0x6   :  { %8356 = sst [smem:[#allocation16_spill]] %s8333_s19 }
   0x7   :  { %24 = vsyncpa [#allocation3], 0 }
   0x8   :  { %26 = vsyncpa [#allocation3 + $0x1], 0  ;;  %s6619_s0 = smov 0   ;;  %s6621_s30 = smov 0  }
   0x9   :  { %s6623_s20 = smov 0   ;;  %s6625_s21 = smov 0  }
   0xa LB: > { %8357 = sst [smem:[#allocation5_spill]] %s6495_s0  ;;  %s6640_s1 = sadd.s32 4294967295, %s6507_s21   ;;  %s6507_s21 = sphi %s6625_s21, %s8380_s21   ;;  %s6503_s20 = sphi %s6623_s20, %s8382_s20   ;;  %s6499_s30 = sphi %s6621_s30, %s8384_s30   ;;  %s6495_s0 = sphi %s6619_s0, %s8383_s0  }
   0xb   : > { %8358 = sst [smem:[#allocation6_spill]] %s6503_s20  ;;  %s4372_s22 = sadd.s32 4294967294, %s6507_s21  }
   0xc   : > { %8359 = sst [smem:[#allocation7_spill]] %s6507_s21  ;;  %s6644_s2 = sadd.s32 1, %s6507_s21  }
   0xd   : > { %8360 = sst [smem:[#allocation8_spill]] %s6644_s2  ;;  %s443_s23 = sadd.s32 1, %s6503_s20 }
   0xe   : > { %s440_s24 = ssub.s32 %s6507_s21, %s6644_s2  ;;  %p453_p0 = scmp.ne.s32.totalorder %s6503_s20, %s6499_s30 }
   0xf   : > { %p441_p1 = scmp.eq.s32.totalorder %s440_s24, 0  ;;  %p454_p2 = scmp.eq.s32.totalorder %s6640_s1, 1 }
  0x10   : > { %p459_p3 = scmp.ne.s32.totalorder %s6499_s30, %s6495_s0  ;;  %p460_p4 = scmp.eq.s32.totalorder %s4372_s22, 1 }
  0x11   : > { %s6655_s25 = scalar_select %p441_p1, %s6503_s20, %s443_s23  }
  0x12   : > { %p6657_p5 = por %p454_p2, %p453_p0  ;;  %p6661_p6 = por %p460_p4, %p459_p3 }
  0x13   : > { %8361 = sst [smem:[#allocation9_spill]] %s6655_s25  ;;  %p4375_p7 = scmp.ge.s32.totalorder %s6507_s21, 1 }
  0x14   : > { %s8363_s26 = scalar_select %p6661_p6, 1, 0 }
  0x15   : > { %p539_p8 = scmp.lt.s32.totalorder %s6507_s21, 3 }
  0x16   : > { %8364 = sst [smem:[#allocation10_spill]] %s8363_s26 }
  0x17   : > { %p540_p9 = pnand %p4375_p7, %p539_p8 }
  0x18   : > { %s8365_s29 = sld [smem:[#allocation12_spill]] (!%p540_p9)  ;;  %v6509_v3 = vmov (!%p540_p9), 0.0|0.0   ;;  %vm6510_vm0 = vmmov (!%p540_p9), 0   ;;  %v6511_v11 = vmov (!%p540_p9), 0.0   ;;  %p593_p10 = scmp.lt.s32.totalorder (!%p540_p9), %s6640_s1, 1  ;;  %vm2076_vm1 = vcmask (!%p540_p9), 1042434  }
  0x19   : > { %543 = sbr.rel (%p540_p9) target bundleno = 5841 (0x16d1), region = 96  ;;  %5771 = vmatprep.subr.bf16.mxu0 (!%p540_p9), %v6509_v3  ;;  %5795 = vmatprep.subr.bf16.mxu1 (!%p540_p9), %v6509_v3  ;;  %s8366_s26 = sld [smem:[#allocation11_spill]] (!%p540_p9)  ;;  %vm2079_vm2 = vcmask (!%p540_p9), 1043459   ;;  %vm2082_vm3 = vcmask (!%p540_p9), 1044484   ;;  %vm2085_vm4 = vcmask (!%p540_p9), 1045509   ;;  %vm2088_vm5 = vcmask (!%p540_p9), 1046534  }
  0x1a   : > { %4928 = vmatprep.mubr.msk.f32.mxu0 (!%p540_p9), %vm6510_vm0, %v6511_v11  ;;  %4963 = vmatprep.mubr.msk.f32.mxu1 (!%p540_p9), %vm6510_vm0, %v6511_v11  ;;  %s8367_s19 = sld [smem:[#allocation13_spill]] (!%p540_p9)  ;;  %s8368_s24 = sld [smem:[#allocation14_spill]] (!%p540_p9)  ;;  %vm2091_vm6 = vcmask (!%p540_p9), 1047559   ;;  %vm2111_vm7 = vcmask (!%p540_p9), 1040384   ;;  %vm2115_vm8 = vcmask (!%p540_p9), 261120   ;;  %vm2094_vm9 = vcmask (!%p540_p9), 1041409  }
  0x1b   : > { %s8369_s4 = sld [smem:[#allocation15_spill]] (!%p540_p9)  ;;  %vm2122_vm10 = vcmask (!%p540_p9), 253952   ;;  %s8349_s28 = smov (!%p540_p9), 80   ;;  %vm2284_vm11 = vcmask (!%p540_p9), 130048   ;;  %vm2380_vm13 = vcmask (!%p540_p9), 138240   ;;  %vm2387_vm14 = vcmask (!%p540_p9), 131072  }
  0x1c   : > { %vm7727_vm12 = vmpackc.low (!%p540_p9), %vm2284_vm11, %vm2284_vm11  ;;  %s8347_s22 = smov (!%p540_p9), 16   ;;  %s8372_s21 = smov (!%p540_p9), 80  }
  0x1e   : > { %v613_v0 = vld [vmem:[%s8365_s29] sm:$0xff] (!%p540_p9)  ;;  %v614_v1 = vld [vmem:[%s8365_s29 + $0x8] sm:$0xff] (!%p540_p9)  ;;  %v615_v6 = vld [vmem:[%s8365_s29 + $0x10] sm:$0xff] (!%p540_p9) }
  0x1f   : > { %v629_v2 = vld [vmem:[%s8365_s29 + $0x80] sm:$0xff] (!%p540_p9)  ;;  %v5772_v4 = vpack.c.bf16 (!%p540_p9), %v614_v1, %v613_v0  ;;  %v630_v5 = vld [vmem:[%s8365_s29 + $0x88] sm:$0xff] (!%p540_p9)  ;;  %v616_v7 = vld [vmem:[%s8365_s29 + $0x18] sm:$0xff] (!%p540_p9) }
  0x20   : > { %v5796_v8 = vpack.c.bf16 %v630_v5, %v629_v2  ;;  %v631_v9 = vld [vmem:[%s8365_s29 + $0x90] sm:$0xff]  ;;  %v632_v10 = vld [vmem:[%s8365_s29 + $0x98] sm:$0xff]  ;;  %v5775_v12 = vpack.c.bf16 %v616_v7, %v615_v6  ;;  %v617_v14 = vld [vmem:[%s8365_s29 + $0x20] sm:$0xff]  ;;  %s594_s20 = scalar_select %p593_p10, %s6640_s1, 1 }
  0x21   : > { %5773 = vmatpush3.bf16.msra.mxu0 %v5772_v4  ;;  %v5799_v13 = vpack.c.bf16 %v632_v10, %v631_v9  ;;  %v618_v15 = vld [vmem:[%s8365_s29 + $0x28] sm:$0xff]  ;;  %v633_v16 = vld [vmem:[%s8365_s29 + $0xa0] sm:$0xff]  ;;  %v619_v20 = vld [vmem:[%s8365_s29 + $0x30] sm:$0xff] }
  0x22   : > { %5797 = vmatpush3.bf16.msra.mxu1 %v5796_v8  ;;  %5774 = vmatprep.subr.bf16.mxu0 %v6509_v3  ;;  %v634_v17 = vld [vmem:[%s8365_s29 + $0xa8] sm:$0xff]  ;;  %v5778_v18 = vpack.c.bf16 %v618_v15, %v617_v14  ;;  %v620_v21 = vld [vmem:[%s8365_s29 + $0x38] sm:$0xff]  ;;  %v635_v22 = vld [vmem:[%s8365_s29 + $0xb0] sm:$0xff]  ;;  %s4376_s23 = sshll.u32 %s594_s20, 4  ;;  %s8343_s20 = smov 48  }
  0x23   : > { %5798 = vmatprep.subr.bf16.mxu1 %v6509_v3  ;;  %v5802_v19 = vpack.c.bf16 %v634_v17, %v633_v16  ;;  %v636_v23 = vld [vmem:[%s8365_s29 + $0xb8] sm:$0xff]  ;;  %v5781_v24 = vpack.c.bf16 %v620_v21, %v619_v20  ;;  %v621_v26 = vld [vmem:[%s8365_s29 + $0x40] sm:$0xff]  ;;  %v622_v27 = vld [vmem:[%s8365_s29 + $0x48] sm:$0xff]  ;;  %s6787_s27 = scalar_lea.vmem %s8366_s26, %s4376_s23  ;;  %s6512_s26 = smov 96  }
  0x24   : > { %v5805_v25 = vpack.c.bf16 %v636_v23, %v635_v22  ;;  %v637_v28 = vld [vmem:[%s8365_s29 + $0xc0] sm:$0xff]  ;;  %v638_v29 = vld [vmem:[%s8365_s29 + $0xc8] sm:$0xff]  ;;  %v5784_v30 = vpack.c.bf16 %v622_v27, %v621_v26  ;;  %v623_v32 = vld [vmem:[%s8365_s29 + $0x50] sm:$0xff] }
  0x25   : > { %5776 = vmatpush3.bf16.msra.mxu0 %v5775_v12  ;;  %v5808_v31 = vpack.c.bf16 %v638_v29, %v637_v28  ;;  %v624_v33 = vld [vmem:[%s8365_s29 + $0x58] sm:$0xff]  ;;  %v639_v34 = vld [vmem:[%s8365_s29 + $0xd0] sm:$0xff]  ;;  %v625_v38 = vld [vmem:[%s8365_s29 + $0x60] sm:$0xff] }
  0x26   : > { %5800 = vmatpush3.bf16.msra.mxu1 %v5799_v13  ;;  %5777 = vmatprep.subr.bf16.mxu0 %v6509_v3  ;;  %v640_v35 = vld [vmem:[%s8365_s29 + $0xd8] sm:$0xff]  ;;  %v5787_v36 = vpack.c.bf16 %v624_v33, %v623_v32  ;;  %v626_v39 = vld [vmem:[%s8365_s29 + $0x68] sm:$0xff]  ;;  %v641_v40 = vld [vmem:[%s8365_s29 + $0xe0] sm:$0xff] }
  0x27   : > { %5801 = vmatprep.subr.bf16.mxu1 %v6509_v3  ;;  %v5811_v37 = vpack.c.bf16 %v640_v35, %v639_v34  ;;  %v642_v41 = vld [vmem:[%s8365_s29 + $0xe8] sm:$0xff]  ;;  %v5790_v42 = vpack.c.bf16 %v626_v39, %v625_v38  ;;  %v627_v44 = vld [vmem:[%s8365_s29 + $0x70] sm:$0xff]  ;;  %v628_v45 = vld [vmem:[%s8365_s29 + $0x78] sm:$0xff] }
  0x28   : > { %v5814_v43 = vpack.c.bf16 %v642_v41, %v641_v40  ;;  %v643_v46 = vld [vmem:[%s8365_s29 + $0xf0] sm:$0xff]  ;;  %v644_v47 = vld [vmem:[%s8365_s29 + $0xf8] sm:$0xff]  ;;  %v5793_v48 = vpack.c.bf16 %v628_v45, %v627_v44  ;;  %v645_v50 = vld [vmem:[%s8365_s29 + $0x100] sm:$0xff] }
  0x29   : > { %5779 = vmatpush3.bf16.msra.mxu0 %v5778_v18  ;;  %v5817_v49 = vpack.c.bf16 %v644_v47, %v643_v46  ;;  %v646_v51 = vld [vmem:[%s8365_s29 + $0x108] sm:$0xff]  ;;  %v661_v52 = vld [vmem:[%s8365_s29 + $0x180] sm:$0xff]  ;;  %v647_v58 = vld [vmem:[%s8365_s29 + $0x110] sm:$0xff] }
  0x2a   : > { %5803 = vmatpush3.bf16.msra.mxu1 %v5802_v19  ;;  %5780 = vmatprep.subr.bf16.mxu0 %v6509_v3  ;;  %v662_v53 = vld [vmem:[%s8365_s29 + $0x188] sm:$0xff]  ;;  %v597_v54 = vld [vmem:[%s6787_s27] sm:$0x1]  ;;  %v5820_v55 = vpack.c.bf16 %v646_v51, %v645_v50  ;;  %v598_v56 = vld [vmem:[%s6787_s27 + $0x1] sm:$0x1] }
  0x2b   : > { %5804 = vmatprep.subr.bf16.mxu1 %v6509_v3  ;;  %v5844_v57 = vpack.c.bf16 %v662_v53, %v661_v52  ;;  %v648_v59 = vld [vmem:[%s8365_s29 + $0x118] sm:$0xff]  ;;  %v663_v60 = vld [vmem:[%s8365_s29 + $0x190] sm:$0xff]  ;;  %v649_v0 = vld [vmem:[%s8365_s29 + $0x120] sm:$0xff] }
  0x2c   : > { %v664_v61 = vld [vmem:[%s8365_s29 + $0x198] sm:$0xff]  ;;  %v5823_v62 = vpack.c.bf16 %v648_v59, %v647_v58  ;;  %v650_v1 = vld [vmem:[%s8365_s29 + $0x128] sm:$0xff]  ;;  %v665_v2 = vld [vmem:[%s8365_s29 + $0x1a0] sm:$0xff] }
  0x2d   : > { %5782 = vmatpush3.bf16.msra.mxu0 %v5781_v24  ;;  %v5847_v63 = vpack.c.bf16 %v664_v61, %v663_v60  ;;  %v666_v4 = vld [vmem:[%s8365_s29 + $0x1a8] sm:$0xff]  ;;  %v5826_v5 = vpack.c.bf16 %v650_v1, %v649_v0  ;;  %v651_v7 = vld [vmem:[%s8365_s29 + $0x130] sm:$0xff]  ;;  %v652_v8 = vld [vmem:[%s8365_s29 + $0x138] sm:$0xff] }
  0x2e   : > { %5806 = vmatpush3.bf16.msra.mxu1 %v5805_v25  ;;  %5783 = vmatprep.subr.bf16.mxu0 %v6509_v3  ;;  %v5850_v6 = vpack.c.bf16 %v666_v4, %v665_v2  ;;  %v667_v9 = vld [vmem:[%s8365_s29 + $0x1b0] sm:$0xff]  ;;  %v668_v10 = vld [vmem:[%s8365_s29 + $0x1b8] sm:$0xff]  ;;  %v5829_v12 = vpack.c.bf16 %v652_v8, %v651_v7  ;;  %v653_v14 = vld [vmem:[%s8365_s29 + $0x140] sm:$0xff] }
  0x2f   : > { %5807 = vmatprep.subr.bf16.mxu1 %v6509_v3  ;;  %v5853_v13 = vpack.c.bf16 %v668_v10, %v667_v9  ;;  %v654_v15 = vld [vmem:[%s8365_s29 + $0x148] sm:$0xff]  ;;  %v669_v16 = vld [vmem:[%s8365_s29 + $0x1c0] sm:$0xff]  ;;  %v655_v20 = vld [vmem:[%s8365_s29 + $0x150] sm:$0xff] }
  0x30   : > { %v670_v17 = vld [vmem:[%s8365_s29 + $0x1c8] sm:$0xff]  ;;  %v5832_v18 = vpack.c.bf16 %v654_v15, %v653_v14  ;;  %v656_v21 = vld [vmem:[%s8365_s29 + $0x158] sm:$0xff]  ;;  %v671_v22 = vld [vmem:[%s8365_s29 + $0x1d0] sm:$0xff] }
  0x31   : > { %5785 = vmatpush3.bf16.msra.mxu0 %v5784_v30  ;;  %v5856_v19 = vpack.c.bf16 %v670_v17, %v669_v16  ;;  %v672_v23 = vld [vmem:[%s8365_s29 + $0x1d8] sm:$0xff]  ;;  %v5835_v24 = vpack.c.bf16 %v656_v21, %v655_v20  ;;  %v657_v26 = vld [vmem:[%s8365_s29 + $0x160] sm:$0xff]  ;;  %v658_v27 = vld [vmem:[%s8365_s29 + $0x168] sm:$0xff] }
  0x32   : > { %5809 = vmatpush3.bf16.msra.mxu1 %v5808_v31  ;;  %5786 = vmatprep.subr.bf16.mxu0 %v6509_v3  ;;  %v5859_v25 = vpack.c.bf16 %v672_v23, %v671_v22  ;;  %v673_v28 = vld [vmem:[%s8365_s29 + $0x1e0] sm:$0xff]  ;;  %v674_v29 = vld [vmem:[%s8365_s29 + $0x1e8] sm:$0xff]  ;;  %v5838_v30 = vpack.c.bf16 %v658_v27, %v657_v26  ;;  %v659_v32 = vld [vmem:[%s8365_s29 + $0x170] sm:$0xff] }
  0x33   : > { %5810 = vmatprep.subr.bf16.mxu1 %v6509_v3  ;;  %v5862_v31 = vpack.c.bf16 %v674_v29, %v673_v28  ;;  %v660_v33 = vld [vmem:[%s8365_s29 + $0x178] sm:$0xff]  ;;  %v675_v34 = vld [vmem:[%s8365_s29 + $0x1f0] sm:$0xff]  ;;  %v677_v38 = vld [vmem:[%s8365_s29 + $0x200] sm:$0xff] }
  0x34   : > { %v676_v35 = vld [vmem:[%s8365_s29 + $0x1f8] sm:$0xff]  ;;  %v678_v39 = vld [vmem:[%s8365_s29 + $0x208] sm:$0xff]  ;;  %v693_v40 = vld [vmem:[%s8365_s29 + $0x280] sm:$0xff] }
  0x35   : > { %5788 = vmatpush3.bf16.msra.mxu0 %v5787_v36  ;;  %v5841_v36 = vpack.c.bf16 %v660_v33, %v659_v32  ;;  %v694_v41 = vld [vmem:[%s8365_s29 + $0x288] sm:$0xff]  ;;  %v600_v44 = vld [vmem:[%s6787_s27 + $0x3] sm:$0x1]  ;;  %v679_v46 = vld [vmem:[%s8365_s29 + $0x210] sm:$0xff] }
  0x36   : > { %5812 = vmatpush3.bf16.msra.mxu1 %v5811_v37  ;;  %5789 = vmatprep.subr.bf16.mxu0 %v6509_v3  ;;  %v5865_v37 = vpack.c.bf16 %v676_v35, %v675_v34  ;;  %v5892_v45 = vpack.c.bf16 %v694_v41, %v693_v40  ;;  %v680_v47 = vld [vmem:[%s8365_s29 + $0x218] sm:$0xff]  ;;  %v681_v52 = vld [vmem:[%s8365_s29 + $0x220] sm:$0xff]  ;;  %v682_v53 = vld [vmem:[%s8365_s29 + $0x228] sm:$0xff] }
  0x37   : > { %5813 = vmatprep.subr.bf16.mxu1 %v6509_v3  ;;  %v5871_v50 = vpack.c.bf16 %v680_v47, %v679_v46  ;;  %v683_v58 = vld [vmem:[%s8365_s29 + $0x230] sm:$0xff]  ;;  %v684_v59 = vld [vmem:[%s8365_s29 + $0x238] sm:$0xff]  ;;  %v685_v0 = vld [vmem:[%s8365_s29 + $0x240] sm:$0xff] }
  0x38   : > { %v699_v60 = vld [vmem:[%s8365_s29 + $0x2b0] sm:$0xff]  ;;  %v700_v61 = vld [vmem:[%s8365_s29 + $0x2b8] sm:$0xff]  ;;  %v686_v1 = vld [vmem:[%s8365_s29 + $0x248] sm:$0xff] }
  0x39   : > { %5791 = vmatpush3.bf16.msra.mxu0 %v5790_v42  ;;  %v599_v42 = vld [vmem:[%s6787_s27 + $0x2] sm:$0x1]  ;;  %v702_v4 = vld [vmem:[%s8365_s29 + $0x2c8] sm:$0xff]  ;;  %v687_v7 = vld [vmem:[%s8365_s29 + $0x250] sm:$0xff] }
  0x3a   : > { %5815 = vmatpush3.bf16.msra.mxu1 %v5814_v43  ;;  %5792 = vmatprep.subr.bf16.mxu0 %v6509_v3  ;;  %v5868_v43 = vpack.c.bf16 %v678_v39, %v677_v38  ;;  %v701_v2 = vld [vmem:[%s8365_s29 + $0x2c0] sm:$0xff]  ;;  %v688_v8 = vld [vmem:[%s8365_s29 + $0x258] sm:$0xff]  ;;  %v703_v9 = vld [vmem:[%s8365_s29 + $0x2d0] sm:$0xff] }
  0x3b   : > { %5816 = vmatprep.subr.bf16.mxu1 %v6509_v3  ;;  %v704_v10 = vld [vmem:[%s8365_s29 + $0x2d8] sm:$0xff]  ;;  %v689_v14 = vld [vmem:[%s8365_s29 + $0x260] sm:$0xff]  ;;  %v690_v15 = vld [vmem:[%s8365_s29 + $0x268] sm:$0xff] }
  0x3c   : > { %v705_v16 = vld [vmem:[%s8365_s29 + $0x2e0] sm:$0xff]  ;;  %v706_v17 = vld [vmem:[%s8365_s29 + $0x2e8] sm:$0xff]  ;;  %v691_v20 = vld [vmem:[%s8365_s29 + $0x270] sm:$0xff] }
  0x3d   : > { %5794 = vmatpush3.bf16.msra.mxu0 %v5793_v48  ;;  %v695_v48 = vld [vmem:[%s8365_s29 + $0x290] sm:$0xff]  ;;  %v692_v21 = vld [vmem:[%s8365_s29 + $0x278] sm:$0xff]  ;;  %v709_v26 = vld [vmem:[%s8365_s29 + $0x300] sm:$0xff] }
  0x3e   : > { %5818 = vmatpush3.bf16.msra.mxu1 %v5817_v49  ;;  %5819 = vmatprep.subr.bf16.mxu0 %v6509_v3  ;;  %v696_v49 = vld [vmem:[%s8365_s29 + $0x298] sm:$0xff]  ;;  %v707_v22 = vld [vmem:[%s8365_s29 + $0x2f0] sm:$0xff]  ;;  %v710_v27 = vld [vmem:[%s8365_s29 + $0x308] sm:$0xff] }
  0x3f   : > { %5843 = vmatprep.subr.bf16.mxu1 %v6509_v3  ;;  %v5895_v51 = vpack.c.bf16 %v696_v49, %v695_v48  ;;  %v708_v23 = vld [vmem:[%s8365_s29 + $0x2f8] sm:$0xff]  ;;  %v725_v28 = vld [vmem:[%s8365_s29 + $0x380] sm:$0xff]  ;;  %v726_v29 = vld [vmem:[%s8365_s29 + $0x388] sm:$0xff] }
  0x40   : > { %4929 = vmatmul.mubr.f32.vlgmr.msra.gmra.mrb[0].mxu0 %v597_v54  ;;  %v697_v54 = vld [vmem:[%s8365_s29 + $0x2a0] sm:$0xff]  ;;  %v5940_v33 = vpack.c.bf16 %v726_v29, %v725_v28  ;;  %v711_v34 = vld [vmem:[%s8365_s29 + $0x310] sm:$0xff]  ;;  %v712_v35 = vld [vmem:[%s8365_s29 + $0x318] sm:$0xff] }
  0x41   : > { %4964 = vmatmul.mubr.f32.vlgmr.msra.gmra.mrb[0].mxu1 %v598_v56  ;;  %5821 = vmatpush3.bf16.msra.mxu0 %v5820_v55  ;;  %v698_v55 = vld [vmem:[%s8365_s29 + $0x2a8] sm:$0xff]  ;;  %v5874_v56 = vpack.c.bf16 %v682_v53, %v681_v52  ;;  %v602_v32 = vld [vmem:[%s6787_s27 + $0x5] sm:$0x1]  ;;  %v5919_v38 = vpack.c.bf16 %v712_v35, %v711_v34  ;;  %v715_v46 = vld [vmem:[%s8365_s29 + $0x330] sm:$0xff] }
  0x42   : > { %5845 = vmatpush3.bf16.msra.mxu1 %v5844_v57  ;;  %5822 = vmatprep.subr.bf16.mxu0 %v6509_v3  ;;  %v5898_v57 = vpack.c.bf16 %v698_v55, %v697_v54  ;;  %v713_v40 = vld [vmem:[%s8365_s29 + $0x320] sm:$0xff]  ;;  %v714_v41 = vld [vmem:[%s8365_s29 + $0x328] sm:$0xff]  ;;  %v716_v47 = vld [vmem:[%s8365_s29 + $0x338] sm:$0xff] }
  0x43   : > { %5846 = vmatprep.subr.bf16.mxu1 %v6509_v3  ;;  %4998 = vmatprep.mubr.msk.f32.mxu0 %vm6510_vm0, %v6511_v11  ;;  %v731_v48 = vld [vmem:[%s8365_s29 + $0x3b0] sm:$0xff]  ;;  %v732_v49 = vld [vmem:[%s8365_s29 + $0x3b8] sm:$0xff]  ;;  %v717_v52 = vld [vmem:[%s8365_s29 + $0x340] sm:$0xff] }
  0x44   : > { %5033 = vmatprep.mubr.msk.f32.mxu1 %vm6510_vm0, %v6511_v11  ;;  %v718_v53 = vld [vmem:[%s8365_s29 + $0x348] sm:$0xff]  ;;  %v733_v54 = vld [vmem:[%s8365_s29 + $0x3c0] sm:$0xff]  ;;  %v747_v34 = vld [vmem:[%s8365_s29 + $0x430] sm:$0xff] }
  0x45   : > { %5824 = vmatpush3.bf16.msra.mxu0 %v5823_v62  ;;  %v5877_v62 = vpack.c.bf16 %v684_v59, %v683_v58  ;;  %v734_v55 = vld [vmem:[%s8365_s29 + $0x3c8] sm:$0xff]  ;;  %v719_v58 = vld [vmem:[%s8365_s29 + $0x350] sm:$0xff]  ;;  %v720_v59 = vld [vmem:[%s8365_s29 + $0x358] sm:$0xff] }
  0x46   : > { %5848 = vmatpush3.bf16.msra.mxu1 %v5847_v63  ;;  %5825 = vmatprep.subr.bf16.mxu0 %v6509_v3  ;;  %v5901_v63 = vpack.c.bf16 %v700_v61, %v699_v60  ;;  %v735_v60 = vld [vmem:[%s8365_s29 + $0x3d0] sm:$0xff]  ;;  %v736_v61 = vld [vmem:[%s8365_s29 + $0x3d8] sm:$0xff]  ;;  %v745_v28 = vld [vmem:[%s8365_s29 + $0x420] sm:$0xff] }
  0x47   : > { %5849 = vmatprep.subr.bf16.mxu1 %v6509_v3  ;;  %v746_v29 = vld [vmem:[%s8365_s29 + $0x428] sm:$0xff]  ;;  %v748_v35 = vld [vmem:[%s8365_s29 + $0x438] sm:$0xff] }
  0x49   : > { %5827 = vmatpush3.bf16.msra.mxu0 %v5826_v5  ;;  %v5880_v5 = vpack.c.bf16 %v686_v1, %v685_v0  ;;  %v721_v0 = vld [vmem:[%s8365_s29 + $0x360] sm:$0xff]  ;;  %v722_v1 = vld [vmem:[%s8365_s29 + $0x368] sm:$0xff] }
  0x4a   : > { %5851 = vmatpush3.bf16.msra.mxu1 %v5850_v6  ;;  %5828 = vmatprep.subr.bf16.mxu0 %v6509_v3  ;;  %v5904_v6 = vpack.c.bf16 %v702_v4, %v701_v2  ;;  %v737_v2 = vld [vmem:[%s8365_s29 + $0x3e0] sm:$0xff]  ;;  %v738_v4 = vld [vmem:[%s8365_s29 + $0x3e8] sm:$0xff] }
  0x4b   : > { %5852 = vmatprep.subr.bf16.mxu1 %v6509_v3 }
  0x4d   : > { %5830 = vmatpush3.bf16.msra.mxu0 %v5829_v12  ;;  %v5883_v12 = vpack.c.bf16 %v688_v8, %v687_v7  ;;  %v723_v7 = vld [vmem:[%s8365_s29 + $0x370] sm:$0xff]  ;;  %v724_v8 = vld [vmem:[%s8365_s29 + $0x378] sm:$0xff] }
  0x4e   : > { %5854 = vmatpush3.bf16.msra.mxu1 %v5853_v13  ;;  %5831 = vmatprep.subr.bf16.mxu0 %v6509_v3  ;;  %v5907_v13 = vpack.c.bf16 %v704_v10, %v703_v9  ;;  %v739_v9 = vld [vmem:[%s8365_s29 + $0x3f0] sm:$0xff]  ;;  %v740_v10 = vld [vmem:[%s8365_s29 + $0x3f8] sm:$0xff] }
  0x4f   : > { %5855 = vmatprep.subr.bf16.mxu1 %v6509_v3 }
  0x51   : > { %5833 = vmatpush3.bf16.msra.mxu0 %v5832_v18  ;;  %v5886_v18 = vpack.c.bf16 %v690_v15, %v689_v14  ;;  %v741_v14 = vld [vmem:[%s8365_s29 + $0x400] sm:$0xff]  ;;  %v742_v15 = vld [vmem:[%s8365_s29 + $0x408] sm:$0xff] }
  0x52   : > { %5857 = vmatpush3.bf16.msra.mxu1 %v5856_v19  ;;  %5834 = vmatprep.subr.bf16.mxu0 %v6509_v3  ;;  %v5910_v19 = vpack.c.bf16 %v706_v17, %v705_v16  ;;  %v757_v16 = vld [vmem:[%s8365_s29 + $0x480] sm:$0xff]  ;;  %v758_v17 = vld [vmem:[%s8365_s29 + $0x488] sm:$0xff] }
  0x53   : > { %5858 = vmatprep.subr.bf16.mxu1 %v6509_v3 }
  0x55   : > { %5836 = vmatpush3.bf16.msra.mxu0 %v5835_v24  ;;  %v5889_v24 = vpack.c.bf16 %v692_v21, %v691_v20  ;;  %v604_v20 = vld [vmem:[%s6787_s27 + $0x7] sm:$0x1]  ;;  %v5988_v21 = vpack.c.bf16 %v758_v17, %v757_v16  ;;  %v778_v17 = vld [vmem:[%s8365_s29 + $0x528] sm:$0xff] }
  0x56   : > { %5860 = vmatpush3.bf16.msra.mxu1 %v5859_v25  ;;  %5837 = vmatprep.subr.bf16.mxu0 %v6509_v3  ;;  %v5913_v25 = vpack.c.bf16 %v708_v23, %v707_v22  ;;  %v743_v22 = vld [vmem:[%s8365_s29 + $0x410] sm:$0xff]  ;;  %v744_v23 = vld [vmem:[%s8365_s29 + $0x418] sm:$0xff]  ;;  %v777_v16 = vld [vmem:[%s8365_s29 + $0x520] sm:$0xff] }
  0x57   : > { %5861 = vmatprep.subr.bf16.mxu1 %v6509_v3 }
  0x59   : > { %5839 = vmatpush3.bf16.msra.mxu0 %v5838_v30  ;;  %v601_v30 = vld [vmem:[%s6787_s27 + $0x4] sm:$0x1] }
  0x5a   : > { %5863 = vmatpush3.bf16.msra.mxu1 %v5862_v31  ;;  %5840 = vmatprep.subr.bf16.mxu0 %v6509_v3  ;;  %v5916_v31 = vpack.c.bf16 %v710_v27, %v709_v26  ;;  %v5967_v26 = vpack.c.bf16 %v744_v23, %v743_v22  ;;  %v779_v22 = vld [vmem:[%s8365_s29 + $0x530] sm:$0xff]  ;;  %v780_v23 = vld [vmem:[%s8365_s29 + $0x538] sm:$0xff] }
  0x5b   : > { %5864 = vmatprep.subr.bf16.mxu1 %v6509_v3 }
  0x5d   : > { %5842 = vmatpush3.bf16.msra.mxu0 %v5841_v36  ;;  %v727_v36 = vld [vmem:[%s8365_s29 + $0x390] sm:$0xff] }
  0x5e   : > { %5866 = vmatpush3.bf16.msra.mxu1 %v5865_v37  ;;  %5867 = vmatprep.subr.bf16.mxu0 %v6509_v3  ;;  %v728_v37 = vld [vmem:[%s8365_s29 + $0x398] sm:$0xff] }
  0x5f   : > { %5891 = vmatprep.subr.bf16.mxu1 %v6509_v3  ;;  %v5943_v39 = vpack.c.bf16 %v728_v37, %v727_v36  ;;  %v763_v36 = vld [vmem:[%s8365_s29 + $0x4b0] sm:$0xff]  ;;  %v764_v37 = vld [vmem:[%s8365_s29 + $0x4b8] sm:$0xff] }
  0x60   : > { %4999 = vmatmul.mubr.f32.vlgmr.msra.gmra.mrb[2].mxu0 %v599_v42  ;;  %v729_v42 = vld [vmem:[%s8365_s29 + $0x3a0] sm:$0xff] }
  0x61   : > { %5034 = vmatmul.mubr.f32.vlgmr.msra.gmra.mrb[2].mxu1 %v600_v44  ;;  %5869 = vmatpush3.bf16.msra.mxu0 %v5868_v43  ;;  %v730_v43 = vld [vmem:[%s8365_s29 + $0x3a8] sm:$0xff]  ;;  %v5922_v44 = vpack.c.bf16 %v714_v41, %v713_v40  ;;  %v749_v40 = vld [vmem:[%s8365_s29 + $0x440] sm:$0xff] }
  0x62   : > { %5893 = vmatpush3.bf16.msra.mxu1 %v5892_v45  ;;  %5870 = vmatprep.subr.bf16.mxu0 %v6509_v3  ;;  %v5946_v45 = vpack.c.bf16 %v730_v43, %v729_v42  ;;  %v750_v41 = vld [vmem:[%s8365_s29 + $0x448] sm:$0xff]  ;;  %v765_v42 = vld [vmem:[%s8365_s29 + $0x4c0] sm:$0xff] }
  0x63   : > { %5894 = vmatprep.subr.bf16.mxu1 %v6509_v3  ;;  %5068 = vmatprep.mubr.msk.f32.mxu0 %vm6510_vm0, %v6511_v11  ;;  %v766_v43 = vld [vmem:[%s8365_s29 + $0x4c8] sm:$0xff] }
  0x64   : > { %5103 = vmatprep.mubr.msk.f32.mxu1 %vm6510_vm0, %v6511_v11 }
  0x65   : > { %5872 = vmatpush3.bf16.msra.mxu0 %v5871_v50  ;;  %v5925_v50 = vpack.c.bf16 %v716_v47, %v715_v46  ;;  %v751_v46 = vld [vmem:[%s8365_s29 + $0x450] sm:$0xff]  ;;  %v752_v47 = vld [vmem:[%s8365_s29 + $0x458] sm:$0xff] }
  0x66   : > { %5896 = vmatpush3.bf16.msra.mxu1 %v5895_v51  ;;  %5873 = vmatprep.subr.bf16.mxu0 %v6509_v3  ;;  %v5949_v51 = vpack.c.bf16 %v732_v49, %v731_v48  ;;  %v767_v48 = vld [vmem:[%s8365_s29 + $0x4d0] sm:$0xff]  ;;  %v768_v49 = vld [vmem:[%s8365_s29 + $0x4d8] sm:$0xff] }
  0x67   : > { %5897 = vmatprep.subr.bf16.mxu1 %v6509_v3 }
  0x69   : > { %5875 = vmatpush3.bf16.msra.mxu0 %v5874_v56  ;;  %v5928_v56 = vpack.c.bf16 %v718_v53, %v717_v52  ;;  %v753_v52 = vld [vmem:[%s8365_s29 + $0x460] sm:$0xff]  ;;  %v754_v53 = vld [vmem:[%s8365_s29 + $0x468] sm:$0xff] }
  0x6a   : > { %5899 = vmatpush3.bf16.msra.mxu1 %v5898_v57  ;;  %5876 = vmatprep.subr.bf16.mxu0 %v6509_v3  ;;  %v5952_v57 = vpack.c.bf16 %v734_v55, %v733_v54  ;;  %v769_v54 = vld [vmem:[%s8365_s29 + $0x4e0] sm:$0xff]  ;;  %v770_v55 = vld [vmem:[%s8365_s29 + $0x4e8] sm:$0xff] }
  0x6b   : > { %5900 = vmatprep.subr.bf16.mxu1 %v6509_v3 }
  0x6d   : > { %5878 = vmatpush3.bf16.msra.mxu0 %v5877_v62  ;;  %v5931_v62 = vpack.c.bf16 %v720_v59, %v719_v58  ;;  %v755_v58 = vld [vmem:[%s8365_s29 + $0x470] sm:$0xff]  ;;  %v756_v59 = vld [vmem:[%s8365_s29 + $0x478] sm:$0xff] }
  0x6e   : > { %5902 = vmatpush3.bf16.msra.mxu1 %v5901_v63  ;;  %5879 = vmatprep.subr.bf16.mxu0 %v6509_v3  ;;  %v5955_v63 = vpack.c.bf16 %v736_v61, %v735_v60  ;;  %v771_v60 = vld [vmem:[%s8365_s29 + $0x4f0] sm:$0xff]  ;;  %v772_v61 = vld [vmem:[%s8365_s29 + $0x4f8] sm:$0xff] }
  0x6f   : > { %5903 = vmatprep.subr.bf16.mxu1 %v6509_v3 }
  0x71   : > { %5881 = vmatpush3.bf16.msra.mxu0 %v5880_v5  ;;  %v5934_v5 = vpack.c.bf16 %v722_v1, %v721_v0  ;;  %v773_v0 = vld [vmem:[%s8365_s29 + $0x500] sm:$0xff]  ;;  %v774_v1 = vld [vmem:[%s8365_s29 + $0x508] sm:$0xff] }
  0x72   : > { %5905 = vmatpush3.bf16.msra.mxu1 %v5904_v6  ;;  %5882 = vmatprep.subr.bf16.mxu0 %v6509_v3  ;;  %v5958_v6 = vpack.c.bf16 %v738_v4, %v737_v2  ;;  %v789_v2 = vld [vmem:[%s8365_s29 + $0x580] sm:$0xff]  ;;  %v790_v4 = vld [vmem:[%s8365_s29 + $0x588] sm:$0xff] }
  0x73   : > { %5906 = vmatprep.subr.bf16.mxu1 %v6509_v3 }
  0x75   : > { %5884 = vmatpush3.bf16.msra.mxu0 %v5883_v12  ;;  %v5937_v12 = vpack.c.bf16 %v724_v8, %v723_v7  ;;  %v606_v7 = vld [vmem:[%s6787_s27 + $0x9] sm:$0x1]  ;;  %v6036_v8 = vpack.c.bf16 %v790_v4, %v789_v2  ;;  %v809_v2 = vld [vmem:[%s8365_s29 + $0x620] sm:$0xff] }
  0x76   : > { %5908 = vmatpush3.bf16.msra.mxu1 %v5907_v13  ;;  %5885 = vmatprep.subr.bf16.mxu0 %v6509_v3  ;;  %v5961_v13 = vpack.c.bf16 %v740_v10, %v739_v9  ;;  %v775_v9 = vld [vmem:[%s8365_s29 + $0x510] sm:$0xff]  ;;  %v776_v10 = vld [vmem:[%s8365_s29 + $0x518] sm:$0xff]  ;;  %v810_v4 = vld [vmem:[%s8365_s29 + $0x628] sm:$0xff] }
  0x77   : > { %5909 = vmatprep.subr.bf16.mxu1 %v6509_v3 }
  0x79   : > { %5887 = vmatpush3.bf16.msra.mxu0 %v5886_v18  ;;  %v603_v18 = vld [vmem:[%s6787_s27 + $0x6] sm:$0x1] }
  0x7a   : > { %5911 = vmatpush3.bf16.msra.mxu1 %v5910_v19  ;;  %5888 = vmatprep.subr.bf16.mxu0 %v6509_v3  ;;  %v5964_v19 = vpack.c.bf16 %v742_v15, %v741_v14  ;;  %v6015_v14 = vpack.c.bf16 %v776_v10, %v775_v9  ;;  %v811_v9 = vld [vmem:[%s8365_s29 + $0x630] sm:$0xff]  ;;  %v812_v10 = vld [vmem:[%s8365_s29 + $0x638] sm:$0xff] }
  0x7b   : > { %5912 = vmatprep.subr.bf16.mxu1 %v6509_v3 }
  0x7d   : > { %5890 = vmatpush3.bf16.msra.mxu0 %v5889_v24  ;;  %v759_v24 = vld [vmem:[%s8365_s29 + $0x490] sm:$0xff] }
  0x7e   : > { %5914 = vmatpush3.bf16.msra.mxu1 %v5913_v25  ;;  %5915 = vmatprep.subr.bf16.mxu0 %v6509_v3  ;;  %v760_v25 = vld [vmem:[%s8365_s29 + $0x498] sm:$0xff] }
  0x7f   : > { %5939 = vmatprep.subr.bf16.mxu1 %v6509_v3  ;;  %v5991_v27 = vpack.c.bf16 %v760_v25, %v759_v24  ;;  %v795_v24 = vld [vmem:[%s8365_s29 + $0x5b0] sm:$0xff]  ;;  %v796_v25 = vld [vmem:[%s8365_s29 + $0x5b8] sm:$0xff] }
  0x80   : > { %5069 = vmatmul.mubr.f32.vlgmr.msra.gmra.mrb[4].mxu0 %v601_v30  ;;  %v761_v30 = vld [vmem:[%s8365_s29 + $0x4a0] sm:$0xff] }
  0x81   : > { %5104 = vmatmul.mubr.f32.vlgmr.msra.gmra.mrb[4].mxu1 %v602_v32  ;;  %5917 = vmatpush3.bf16.msra.mxu0 %v5916_v31  ;;  %v762_v31 = vld [vmem:[%s8365_s29 + $0x4a8] sm:$0xff]  ;;  %v5970_v32 = vpack.c.bf16 %v746_v29, %v745_v28  ;;  %v781_v28 = vld [vmem:[%s8365_s29 + $0x540] sm:$0xff] }
  0x82   : > { %5941 = vmatpush3.bf16.msra.mxu1 %v5940_v33  ;;  %5918 = vmatprep.subr.bf16.mxu0 %v6509_v3  ;;  %v5994_v33 = vpack.c.bf16 %v762_v31, %v761_v30  ;;  %v782_v29 = vld [vmem:[%s8365_s29 + $0x548] sm:$0xff]  ;;  %v797_v30 = vld [vmem:[%s8365_s29 + $0x5c0] sm:$0xff] }
  0x83   : > { %5942 = vmatprep.subr.bf16.mxu1 %v6509_v3  ;;  %5138 = vmatprep.mubr.msk.f32.mxu0 %vm6510_vm0, %v6511_v11  ;;  %v798_v31 = vld [vmem:[%s8365_s29 + $0x5c8] sm:$0xff] }
  0x84   : > { %5173 = vmatprep.mubr.msk.f32.mxu1 %vm6510_vm0, %v6511_v11 }
  0x85   : > { %5920 = vmatpush3.bf16.msra.mxu0 %v5919_v38  ;;  %v5973_v38 = vpack.c.bf16 %v748_v35, %v747_v34  ;;  %v783_v34 = vld [vmem:[%s8365_s29 + $0x550] sm:$0xff]  ;;  %v784_v35 = vld [vmem:[%s8365_s29 + $0x558] sm:$0xff] }
  0x86   : > { %5944 = vmatpush3.bf16.msra.mxu1 %v5943_v39  ;;  %5921 = vmatprep.subr.bf16.mxu0 %v6509_v3  ;;  %v5997_v39 = vpack.c.bf16 %v764_v37, %v763_v36  ;;  %v799_v36 = vld [vmem:[%s8365_s29 + $0x5d0] sm:$0xff]  ;;  %v800_v37 = vld [vmem:[%s8365_s29 + $0x5d8] sm:$0xff] }
  0x87   : > { %5945 = vmatprep.subr.bf16.mxu1 %v6509_v3 }
  0x89   : > { %5923 = vmatpush3.bf16.msra.mxu0 %v5922_v44  ;;  %v5976_v44 = vpack.c.bf16 %v750_v41, %v749_v40  ;;  %v785_v40 = vld [vmem:[%s8365_s29 + $0x560] sm:$0xff]  ;;  %v786_v41 = vld [vmem:[%s8365_s29 + $0x568] sm:$0xff] }
  0x8a   : > { %5947 = vmatpush3.bf16.msra.mxu1 %v5946_v45  ;;  %5924 = vmatprep.subr.bf16.mxu0 %v6509_v3  ;;  %v6000_v45 = vpack.c.bf16 %v766_v43, %v765_v42  ;;  %v801_v42 = vld [vmem:[%s8365_s29 + $0x5e0] sm:$0xff]  ;;  %v802_v43 = vld [vmem:[%s8365_s29 + $0x5e8] sm:$0xff] }
  0x8b   : > { %5948 = vmatprep.subr.bf16.mxu1 %v6509_v3 }
  0x8d   : > { %5926 = vmatpush3.bf16.msra.mxu0 %v5925_v50  ;;  %v5979_v50 = vpack.c.bf16 %v752_v47, %v751_v46  ;;  %v787_v46 = vld [vmem:[%s8365_s29 + $0x570] sm:$0xff]  ;;  %v788_v47 = vld [vmem:[%s8365_s29 + $0x578] sm:$0xff] }
  0x8e   : > { %5950 = vmatpush3.bf16.msra.mxu1 %v5949_v51  ;;  %5927 = vmatprep.subr.bf16.mxu0 %v6509_v3  ;;  %v6003_v51 = vpack.c.bf16 %v768_v49, %v767_v48  ;;  %v803_v48 = vld [vmem:[%s8365_s29 + $0x5f0] sm:$0xff]  ;;  %v804_v49 = vld [vmem:[%s8365_s29 + $0x5f8] sm:$0xff] }
  0x8f   : > { %5951 = vmatprep.subr.bf16.mxu1 %v6509_v3 }
  0x91   : > { %5929 = vmatpush3.bf16.msra.mxu0 %v5928_v56  ;;  %v5982_v56 = vpack.c.bf16 %v754_v53, %v753_v52  ;;  %v805_v52 = vld [vmem:[%s8365_s29 + $0x600] sm:$0xff]  ;;  %v806_v53 = vld [vmem:[%s8365_s29 + $0x608] sm:$0xff] }
  0x92   : > { %5953 = vmatpush3.bf16.msra.mxu1 %v5952_v57  ;;  %5930 = vmatprep.subr.bf16.mxu0 %v6509_v3  ;;  %v6006_v57 = vpack.c.bf16 %v770_v55, %v769_v54  ;;  %v821_v54 = vld [vmem:[%s8365_s29 + $0x680] sm:$0xff]  ;;  %v822_v55 = vld [vmem:[%s8365_s29 + $0x688] sm:$0xff] }
  0x93   : > { %5954 = vmatprep.subr.bf16.mxu1 %v6509_v3 }
  0x95   : > { %5932 = vmatpush3.bf16.msra.mxu0 %v5931_v62  ;;  %v5985_v62 = vpack.c.bf16 %v756_v59, %v755_v58  ;;  %v608_v58 = vld [vmem:[%s6787_s27 + $0xb] sm:$0x1]  ;;  %v6084_v59 = vpack.c.bf16 %v822_v55, %v821_v54  ;;  %v841_v54 = vld [vmem:[%s8365_s29 + $0x720] sm:$0xff] }
  0x96   : > { %5956 = vmatpush3.bf16.msra.mxu1 %v5955_v63  ;;  %5933 = vmatprep.subr.bf16.mxu0 %v6509_v3  ;;  %v6009_v63 = vpack.c.bf16 %v772_v61, %v771_v60  ;;  %v807_v60 = vld [vmem:[%s8365_s29 + $0x610] sm:$0xff]  ;;  %v808_v61 = vld [vmem:[%s8365_s29 + $0x618] sm:$0xff]  ;;  %v842_v55 = vld [vmem:[%s8365_s29 + $0x728] sm:$0xff] }
  0x97   : > { %5957 = vmatprep.subr.bf16.mxu1 %v6509_v3 }
  0x99   : > { %5935 = vmatpush3.bf16.msra.mxu0 %v5934_v5  ;;  %v605_v5 = vld [vmem:[%s6787_s27 + $0x8] sm:$0x1] }
  0x9a   : > { %5959 = vmatpush3.bf16.msra.mxu1 %v5958_v6  ;;  %5936 = vmatprep.subr.bf16.mxu0 %v6509_v3  ;;  %v6012_v6 = vpack.c.bf16 %v774_v1, %v773_v0  ;;  %v6063_v0 = vpack.c.bf16 %v808_v61, %v807_v60  ;;  %v843_v60 = vld [vmem:[%s8365_s29 + $0x730] sm:$0xff]  ;;  %v844_v61 = vld [vmem:[%s8365_s29 + $0x738] sm:$0xff] }
  0x9b   : > { %5960 = vmatprep.subr.bf16.mxu1 %v6509_v3 }
  0x9d   : > { %5938 = vmatpush3.bf16.msra.mxu0 %v5937_v12  ;;  %v791_v12 = vld [vmem:[%s8365_s29 + $0x590] sm:$0xff] }
  0x9e   : > { %5962 = vmatpush3.bf16.msra.mxu1 %v5961_v13  ;;  %5963 = vmatprep.subr.bf16.mxu0 %v6509_v3  ;;  %v792_v13 = vld [vmem:[%s8365_s29 + $0x598] sm:$0xff] }
  0x9f   : > { %5987 = vmatprep.subr.bf16.mxu1 %v6509_v3  ;;  %v6039_v15 = vpack.c.bf16 %v792_v13, %v791_v12  ;;  %v827_v12 = vld [vmem:[%s8365_s29 + $0x6b0] sm:$0xff]  ;;  %v828_v13 = vld [vmem:[%s8365_s29 + $0x6b8] sm:$0xff] }
  0xa0   : > { %5139 = vmatmul.mubr.f32.vlgmr.msra.gmra.mrb[6].mxu0 %v603_v18  ;;  %v793_v18 = vld [vmem:[%s8365_s29 + $0x5a0] sm:$0xff] }
  0xa1   : > { %5174 = vmatmul.mubr.f32.vlgmr.msra.gmra.mrb[6].mxu1 %v604_v20  ;;  %5965 = vmatpush3.bf16.msra.mxu0 %v5964_v19  ;;  %v794_v19 = vld [vmem:[%s8365_s29 + $0x5a8] sm:$0xff]  ;;  %v6018_v20 = vpack.c.bf16 %v778_v17, %v777_v16  ;;  %v813_v16 = vld [vmem:[%s8365_s29 + $0x640] sm:$0xff] }
  0xa2   : > { %5989 = vmatpush3.bf16.msra.mxu1 %v5988_v21  ;;  %5966 = vmatprep.subr.bf16.mxu0 %v6509_v3  ;;  %v6042_v21 = vpack.c.bf16 %v794_v19, %v793_v18  ;;  %v814_v17 = vld [vmem:[%s8365_s29 + $0x648] sm:$0xff]  ;;  %v829_v18 = vld [vmem:[%s8365_s29 + $0x6c0] sm:$0xff] }
  0xa3   : > { %5990 = vmatprep.subr.bf16.mxu1 %v6509_v3  ;;  %5208 = vmatprep.mubr.msk.f32.mxu0 %vm6510_vm0, %v6511_v11  ;;  %v830_v19 = vld [vmem:[%s8365_s29 + $0x6c8] sm:$0xff] }
  0xa4   : > { %5243 = vmatprep.mubr.msk.f32.mxu1 %vm6510_vm0, %v6511_v11 }
  0xa5   : > { %5968 = vmatpush3.bf16.msra.mxu0 %v5967_v26  ;;  %v6021_v26 = vpack.c.bf16 %v780_v23, %v779_v22  ;;  %v815_v22 = vld [vmem:[%s8365_s29 + $0x650] sm:$0xff]  ;;  %v816_v23 = vld [vmem:[%s8365_s29 + $0x658] sm:$0xff] }
  0xa6   : > { %5992 = vmatpush3.bf16.msra.mxu1 %v5991_v27  ;;  %5969 = vmatprep.subr.bf16.mxu0 %v6509_v3  ;;  %v6045_v27 = vpack.c.bf16 %v796_v25, %v795_v24  ;;  %v831_v24 = vld [vmem:[%s8365_s29 + $0x6d0] sm:$0xff]  ;;  %v832_v25 = vld [vmem:[%s8365_s29 + $0x6d8] sm:$0xff] }
  0xa7   : > { %5993 = vmatprep.subr.bf16.mxu1 %v6509_v3 }
  0xa9   : > { %5971 = vmatpush3.bf16.msra.mxu0 %v5970_v32  ;;  %v6024_v32 = vpack.c.bf16 %v782_v29, %v781_v28  ;;  %v817_v28 = vld [vmem:[%s8365_s29 + $0x660] sm:$0xff]  ;;  %v818_v29 = vld [vmem:[%s8365_s29 + $0x668] sm:$0xff] }
  0xaa   : > { %5995 = vmatpush3.bf16.msra.mxu1 %v5994_v33  ;;  %5972 = vmatprep.subr.bf16.mxu0 %v6509_v3  ;;  %v6048_v33 = vpack.c.bf16 %v798_v31, %v797_v30  ;;  %v833_v30 = vld [vmem:[%s8365_s29 + $0x6e0] sm:$0xff]  ;;  %v834_v31 = vld [vmem:[%s8365_s29 + $0x6e8] sm:$0xff] }
  0xab   : > { %5996 = vmatprep.subr.bf16.mxu1 %v6509_v3 }
  0xad   : > { %5974 = vmatpush3.bf16.msra.mxu0 %v5973_v38  ;;  %v6027_v38 = vpack.c.bf16 %v784_v35, %v783_v34  ;;  %v819_v34 = vld [vmem:[%s8365_s29 + $0x670] sm:$0xff]  ;;  %v820_v35 = vld [vmem:[%s8365_s29 + $0x678] sm:$0xff] }
  0xae   : > { %5998 = vmatpush3.bf16.msra.mxu1 %v5997_v39  ;;  %5975 = vmatprep.subr.bf16.mxu0 %v6509_v3  ;;  %v6051_v39 = vpack.c.bf16 %v800_v37, %v799_v36  ;;  %v835_v36 = vld [vmem:[%s8365_s29 + $0x6f0] sm:$0xff]  ;;  %v836_v37 = vld [vmem:[%s8365_s29 + $0x6f8] sm:$0xff] }
  0xaf   : > { %5999 = vmatprep.subr.bf16.mxu1 %v6509_v3 }
  0xb1   : > { %5977 = vmatpush3.bf16.msra.mxu0 %v5976_v44  ;;  %v6030_v44 = vpack.c.bf16 %v786_v41, %v785_v40  ;;  %v837_v40 = vld [vmem:[%s8365_s29 + $0x700] sm:$0xff]  ;;  %v838_v41 = vld [vmem:[%s8365_s29 + $0x708] sm:$0xff] }
  0xb2   : > { %6001 = vmatpush3.bf16.msra.mxu1 %v6000_v45  ;;  %5978 = vmatprep.subr.bf16.mxu0 %v6509_v3  ;;  %v6054_v45 = vpack.c.bf16 %v802_v43, %v801_v42  ;;  %v853_v42 = vld [vmem:[%s8365_s29 + $0x780] sm:$0xff]  ;;  %v854_v43 = vld [vmem:[%s8365_s29 + $0x788] sm:$0xff] }
  0xb3   : > { %6002 = vmatprep.subr.bf16.mxu1 %v6509_v3 }
  0xb5   : > { %5980 = vmatpush3.bf16.msra.mxu0 %v5979_v50  ;;  %v6033_v50 = vpack.c.bf16 %v788_v47, %v787_v46  ;;  %v610_v46 = vld [vmem:[%s6787_s27 + $0xd] sm:$0x1]  ;;  %v6132_v47 = vpack.c.bf16 %v854_v43, %v853_v42 }
  0xb6   : > { %6004 = vmatpush3.bf16.msra.mxu1 %v6003_v51  ;;  %5981 = vmatprep.subr.bf16.mxu0 %v6509_v3  ;;  %v6057_v51 = vpack.c.bf16 %v804_v49, %v803_v48  ;;  %v839_v48 = vld [vmem:[%s8365_s29 + $0x710] sm:$0xff]  ;;  %v840_v49 = vld [vmem:[%s8365_s29 + $0x718] sm:$0xff] }
  0xb7   : > { %6005 = vmatprep.subr.bf16.mxu1 %v6509_v3 }
  0xb9   : > { %5983 = vmatpush3.bf16.msra.mxu0 %v5982_v56  ;;  %v607_v56 = vld [vmem:[%s6787_s27 + $0xa] sm:$0x1] }
  0xba   : > { %6007 = vmatpush3.bf16.msra.mxu1 %v6006_v57  ;;  %5984 = vmatprep.subr.bf16.mxu0 %v6509_v3  ;;  %v6060_v57 = vpack.c.bf16 %v806_v53, %v805_v52  ;;  %v6111_v52 = vpack.c.bf16 %v840_v49, %v839_v48 }
  0xbb   : > { %6008 = vmatprep.subr.bf16.mxu1 %v6509_v3 }
  0xbd   : > { %5986 = vmatpush3.bf16.msra.mxu0 %v5985_v62  ;;  %v823_v62 = vld [vmem:[%s8365_s29 + $0x690] sm:$0xff] }
  0xbe   : > { %6010 = vmatpush3.bf16.msra.mxu1 %v6009_v63  ;;  %6011 = vmatprep.subr.bf16.mxu0 %v6509_v3  ;;  %v824_v63 = vld [vmem:[%s8365_s29 + $0x698] sm:$0xff] }
  0xbf   : > { %6035 = vmatprep.subr.bf16.mxu1 %v6509_v3  ;;  %v6087_v1 = vpack.c.bf16 %v824_v63, %v823_v62  ;;  %v859_v62 = vld [vmem:[%s8365_s29 + $0x7b0] sm:$0xff]  ;;  %v860_v63 = vld [vmem:[%s8365_s29 + $0x7b8] sm:$0xff] }
  0xc0   : > { %5209 = vmatmul.mubr.f32.vlgmr.msra.gmra.mrb[8].mxu0 %v605_v5  ;;  %v825_v5 = vld [vmem:[%s8365_s29 + $0x6a0] sm:$0xff] }
  0xc1   : > { %5244 = vmatmul.mubr.f32.vlgmr.msra.gmra.mrb[8].mxu1 %v606_v7  ;;  %6013 = vmatpush3.bf16.msra.mxu0 %v6012_v6  ;;  %v826_v6 = vld [vmem:[%s8365_s29 + $0x6a8] sm:$0xff]  ;;  %v6066_v7 = vpack.c.bf16 %v810_v4, %v809_v2  ;;  %v845_v2 = vld [vmem:[%s8365_s29 + $0x740] sm:$0xff] }
  0xc2   : > { %6037 = vmatpush3.bf16.msra.mxu1 %v6036_v8  ;;  %6014 = vmatprep.subr.bf16.mxu0 %v6509_v3  ;;  %v6090_v8 = vpack.c.bf16 %v826_v6, %v825_v5  ;;  %v846_v4 = vld [vmem:[%s8365_s29 + $0x748] sm:$0xff]  ;;  %v861_v5 = vld [vmem:[%s8365_s29 + $0x7c0] sm:$0xff] }
  0xc3   : > { %6038 = vmatprep.subr.bf16.mxu1 %v6509_v3  ;;  %5278 = vmatprep.mubr.msk.f32.mxu0 %vm6510_vm0, %v6511_v11  ;;  %v862_v6 = vld [vmem:[%s8365_s29 + $0x7c8] sm:$0xff] }
  0xc4   : > { %5313 = vmatprep.mubr.msk.f32.mxu1 %vm6510_vm0, %v6511_v11 }
  0xc5   : > { %6016 = vmatpush3.bf16.msra.mxu0 %v6015_v14  ;;  %v6069_v14 = vpack.c.bf16 %v812_v10, %v811_v9  ;;  %v7576_v9 = vld [vmem:[%s8367_s19] sm:$0xff]  ;;  %v847_v10 = vld [vmem:[%s8365_s29 + $0x750] sm:$0xff] }
  0xc6   : > { %6040 = vmatpush3.bf16.msra.mxu1 %v6039_v15  ;;  %6017 = vmatprep.subr.bf16.mxu0 %v6509_v3  ;;  %v6093_v15 = vpack.c.bf16 %v828_v13, %v827_v12  ;;  %v848_v12 = vld [vmem:[%s8365_s29 + $0x758] sm:$0xff]  ;;  %v863_v13 = vld [vmem:[%s8365_s29 + $0x7d0] sm:$0xff]  ;;  %v2011_v42 = vrot.slane %v7576_v9, 3 }
  0xc7   : > { %6041 = vmatprep.subr.bf16.mxu1 %v6509_v3 }
  0xc9   : > { %6019 = vmatpush3.bf16.msra.mxu0 %v6018_v20  ;;  %v6072_v20 = vpack.c.bf16 %v814_v17, %v813_v16  ;;  %v6123_v16 = vpack.c.bf16 %v848_v12, %v847_v10 }
  0xca   : > { %6043 = vmatpush3.bf16.msra.mxu1 %v6042_v21  ;;  %6020 = vmatprep.subr.bf16.mxu0 %v6509_v3  ;;  %v6096_v21 = vpack.c.bf16 %v830_v19, %v829_v18  ;;  %v849_v18 = vld [vmem:[%s8365_s29 + $0x760] sm:$0xff]  ;;  %v850_v19 = vld [vmem:[%s8365_s29 + $0x768] sm:$0xff] }
  0xcb   : > { %6044 = vmatprep.subr.bf16.mxu1 %v6509_v3 }
  0xcd   : > { %6022 = vmatpush3.bf16.msra.mxu0 %v6021_v26  ;;  %v6075_v26 = vpack.c.bf16 %v816_v23, %v815_v22  ;;  %v866_v22 = vld [vmem:[%s8365_s29 + $0x7e8] sm:$0xff] }
  0xce   : > { %6046 = vmatpush3.bf16.msra.mxu1 %v6045_v27  ;;  %6023 = vmatprep.subr.bf16.mxu0 %v6509_v3  ;;  %v6099_v27 = vpack.c.bf16 %v832_v25, %v831_v24 }
  0xcf   : > { %6047 = vmatprep.subr.bf16.mxu1 %v6509_v3 }
  0xd1   : > { %6025 = vmatpush3.bf16.msra.mxu0 %v6024_v32  ;;  %v6078_v32 = vpack.c.bf16 %v818_v29, %v817_v28 }
  0xd2   : > { %6049 = vmatpush3.bf16.msra.mxu1 %v6048_v33  ;;  %6026 = vmatprep.subr.bf16.mxu0 %v6509_v3  ;;  %v6102_v33 = vpack.c.bf16 %v834_v31, %v833_v30  ;;  %v851_v31 = vld [vmem:[%s8365_s29 + $0x770] sm:$0xff] }
  0xd3   : > { %6050 = vmatprep.subr.bf16.mxu1 %v6509_v3 }
  0xd5   : > { %6028 = vmatpush3.bf16.msra.mxu0 %v6027_v38  ;;  %v6081_v38 = vpack.c.bf16 %v820_v35, %v819_v34  ;;  %v867_v34 = vld [vmem:[%s8365_s29 + $0x7f0] sm:$0xff]  ;;  %v868_v35 = vld [vmem:[%s8365_s29 + $0x7f8] sm:$0xff] }
  0xd6   : > { %6052 = vmatpush3.bf16.msra.mxu1 %v6051_v39  ;;  %6029 = vmatprep.subr.bf16.mxu0 %v6509_v3  ;;  %v6105_v39 = vpack.c.bf16 %v836_v37, %v835_v36 }
  0xd7   : > { %6053 = vmatprep.subr.bf16.mxu1 %v6509_v3 }
  0xd9   : > { %6031 = vmatpush3.bf16.msra.mxu0 %v6030_v44  ;;  %v609_v44 = vld [vmem:[%s6787_s27 + $0xc] sm:$0x1] }
  0xda   : > { %6055 = vmatpush3.bf16.msra.mxu1 %v6054_v45  ;;  %6032 = vmatprep.subr.bf16.mxu0 %v6509_v3  ;;  %v6108_v45 = vpack.c.bf16 %v838_v41, %v837_v40  ;;  %v612_v40 = vld [vmem:[%s6787_s27 + $0xf] sm:$0x1]  ;;  %v2010_v41 = vrot.slane %v7576_v9, 2 }
  0xdb   : > { %6056 = vmatprep.subr.bf16.mxu1 %v6509_v3 }
  0xdd   : > { %6034 = vmatpush3.bf16.msra.mxu0 %v6033_v50  ;;  %v855_v50 = vld [vmem:[%s8365_s29 + $0x790] sm:$0xff] }
  0xde   : > { %6058 = vmatpush3.bf16.msra.mxu1 %v6057_v51  ;;  %6059 = vmatprep.subr.bf16.mxu0 %v6509_v3  ;;  %v856_v51 = vld [vmem:[%s8365_s29 + $0x798] sm:$0xff] }
  0xdf   : > { %6083 = vmatprep.subr.bf16.mxu1 %v6509_v3  ;;  %v6135_v53 = vpack.c.bf16 %v856_v51, %v855_v50 }
  0xe0   : > { %5279 = vmatmul.mubr.f32.vlgmr.msra.gmra.mrb[10].mxu0 %v607_v56  ;;  %v857_v56 = vld [vmem:[%s8365_s29 + $0x7a0] sm:$0xff] }
  0xe1   : > { %5314 = vmatmul.mubr.f32.vlgmr.msra.gmra.mrb[10].mxu1 %v608_v58  ;;  %6061 = vmatpush3.bf16.msra.mxu0 %v6060_v57  ;;  %v858_v57 = vld [vmem:[%s8365_s29 + $0x7a8] sm:$0xff]  ;;  %v6114_v58 = vpack.c.bf16 %v842_v55, %v841_v54  ;;  %v2013_v54 = vrot.slane %v7576_v9, 5 }
  0xe2   : > { %6085 = vmatpush3.bf16.msra.mxu1 %v6084_v59  ;;  %6062 = vmatprep.subr.bf16.mxu0 %v6509_v3  ;;  %v6138_v59 = vpack.c.bf16 %v858_v57, %v857_v56 }
  0xe3   : > { %6086 = vmatprep.subr.bf16.mxu1 %v6509_v3  ;;  %5348 = vmatprep.mubr.msk.f32.mxu0 %vm6510_vm0, %v6511_v11 }
  0xe4   : > { %5383 = vmatprep.mubr.msk.f32.mxu1 %vm6510_vm0, %v6511_v11 }
  0xe5   : > { %6064 = vmatpush3.bf16.msra.mxu0 %v6063_v0  ;;  %v6117_v0 = vpack.c.bf16 %v844_v61, %v843_v60 }
  0xe6   : > { %6088 = vmatpush3.bf16.msra.mxu1 %v6087_v1  ;;  %6065 = vmatprep.subr.bf16.mxu0 %v6509_v3  ;;  %v6141_v1 = vpack.c.bf16 %v860_v63, %v859_v62 }
  0xe7   : > { %6089 = vmatprep.subr.bf16.mxu1 %v6509_v3 }
  0xe9   : > { %6067 = vmatpush3.bf16.msra.mxu0 %v6066_v7  ;;  %v6120_v7 = vpack.c.bf16 %v846_v4, %v845_v2  ;;  %v2055_v2 = vld [vmem:[%s8368_s24] sm:$0x1]  ;;  %s8345_s24 = smov 64  }
  0xea   : > { %6091 = vmatpush3.bf16.msra.mxu1 %v6090_v8  ;;  %6068 = vmatprep.subr.bf16.mxu0 %v6509_v3  ;;  %v6144_v8 = vpack.c.bf16 %v862_v6, %v861_v5  ;;  %v2056_v4 = vld [vmem:[%s8369_s4] sm:$0x1] }
  0xeb   : > { %6092 = vmatprep.subr.bf16.mxu1 %v6509_v3  ;;  %v2057_v12 = vadd.f32 %v2056_v4, %v2055_v2 }
  0xed   : > { %6070 = vmatpush3.bf16.msra.mxu0 %v6069_v14  ;;  %v864_v14 = vld [vmem:[%s8365_s29 + $0x7d8] sm:$0xff] }
  0xee   : > { %6094 = vmatpush3.bf16.msra.mxu1 %v6093_v15  ;;  %6071 = vmatprep.subr.bf16.mxu0 %v6509_v3  ;;  %v2009_v15 = vrot.slane %v7576_v9, 1  ;;  %v6147_v17 = vpack.c.bf16 %v864_v14, %v863_v13 }
  0xef   : > { %6095 = vmatprep.subr.bf16.mxu1 %v6509_v3 }
  0xf1   : > { %6073 = vmatpush3.bf16.msra.mxu0 %v6072_v20 }
  0xf2   : > { %6097 = vmatpush3.bf16.msra.mxu1 %v6096_v21  ;;  %6074 = vmatprep.subr.bf16.mxu0 %v6509_v3  ;;  %v865_v21 = vld [vmem:[%s8365_s29 + $0x7e0] sm:$0xff] }
  0xf3   : > { %6098 = vmatprep.subr.bf16.mxu1 %v6509_v3  ;;  %v6150_v30 = vpack.c.bf16 %v866_v22, %v865_v21 }
  0xf5   : > { %6076 = vmatpush3.bf16.msra.mxu0 %v6075_v26 }
  0xf6   : > { %6100 = vmatpush3.bf16.msra.mxu1 %v6099_v27  ;;  %6077 = vmatprep.subr.bf16.mxu0 %v6509_v3  ;;  %v6126_v27 = vpack.c.bf16 %v850_v19, %v849_v18  ;;  %v2015_v19 = vrot.slane %v7576_v9, 7 }
  0xf7   : > { %6101 = vmatprep.subr.bf16.mxu1 %v6509_v3 }
  0xf9   : > { %6079 = vmatpush3.bf16.msra.mxu0 %v6078_v32  ;;  %v852_v32 = vld [vmem:[%s8365_s29 + $0x778] sm:$0xff] }
  0xfa   : > { %6103 = vmatpush3.bf16.msra.mxu1 %v6102_v33  ;;  %6080 = vmatprep.subr.bf16.mxu0 %v6509_v3  ;;  %v6129_v37 = vpack.c.bf16 %v852_v32, %v851_v31 }
  0xfb   : > { %6104 = vmatprep.subr.bf16.mxu1 %v6509_v3 }
  0xfd   : > { %6082 = vmatpush3.bf16.msra.mxu0 %v6081_v38  ;;  %v6153_v38 = vpack.c.bf16 %v868_v35, %v867_v34 }
  0xfe   : > { %6106 = vmatpush3.bf16.msra.mxu1 %v6105_v39  ;;  %6107 = vmatprep.subr.bf16.mxu0 %v6509_v3  ;;  %v611_v39 = vld [vmem:[%s6787_s27 + $0xe] sm:$0x1]  ;;  %s6513_s27 = smov 112  }
  0xff   : > { %6131 = vmatprep.subr.bf16.mxu1 %v6509_v3 }
 0x100   : > { %5349 = vmatmul.mubr.f32.vlgmr.msra.gmra.mrb[12].mxu0 %v609_v44 }
 0x101   : > { %5384 = vmatmul.mubr.f32.vlgmr.msra.gmra.mrb[12].mxu1 %v610_v46  ;;  %6109 = vmatpush3.bf16.msra.mxu0 %v6108_v45 }
 0x102   : > { %6133 = vmatpush3.bf16.msra.mxu1 %v6132_v47  ;;  %6110 = vmatprep.subr.bf16.mxu0 %v6509_v3 }
 0x103   : > { %6134 = vmatprep.subr.bf16.mxu1 %v6509_v3  ;;  %5418 = vmatprep.mubr.msk.f32.mxu0 %vm6510_vm0, %v6511_v11 }
 0x104   : > { %5453 = vmatprep.mubr.msk.f32.mxu1 %vm6510_vm0, %v6511_v11 }
 0x105   : > { %6112 = vmatpush3.bf16.msra.mxu0 %v6111_v52 }
 0x106   : > { %6136 = vmatpush3.bf16.msra.mxu1 %v6135_v53  ;;  %6113 = vmatprep.subr.bf16.mxu0 %v6509_v3  ;;  %v2012_v53 = vrot.slane %v7576_v9, 4 }
 0x107   : > { %6137 = vmatprep.subr.bf16.mxu1 %v6509_v3 }
 0x109   : > { %6115 = vmatpush3.bf16.msra.mxu0 %v6114_v58 }
 0x10a   : > { %6139 = vmatpush3.bf16.msra.mxu1 %v6138_v59  ;;  %6116 = vmatprep.subr.bf16.mxu0 %v6509_v3 }
 0x10b   : > { %6140 = vmatprep.subr.bf16.mxu1 %v6509_v3 }
 0x10d   : > { %6118 = vmatpush3.bf16.msra.mxu0 %v6117_v0 }
 0x10e   : > { %6142 = vmatpush3.bf16.msra.mxu1 %v6141_v1  ;;  %6119 = vmatprep.subr.bf16.mxu0 %v6509_v3  ;;  %v2014_v1 = vrot.slane %v7576_v9, 6 }
 0x10f   : > { %6143 = vmatprep.subr.bf16.mxu1 %v6509_v3 }
 0x111   : > { %6121 = vmatpush3.bf16.msra.mxu0 %v6120_v7 }
 0x112   : > { %6145 = vmatpush3.bf16.msra.mxu1 %v6144_v8  ;;  %6122 = vmatprep.subr.bf16.mxu0 %v6509_v3 }
 0x113   : > { %v935_v20 = vpop.f32.mrb[0].mxu0  ;;  %6146 = vmatprep.subr.bf16.mxu1 %v6509_v3 }
 0x114   : > { %v2039_v23 = vadd.f32 %v7576_v9, %v935_v20  ;;  %v4930_v24 = vpop.f32.mrb[1].mxu0  ;;  %v1005_v25 = vpop.f32.mrb[0].mxu1 }
 0x115   : > { %v2040_v26 = vadd.f32 %v2009_v15, %v1005_v25  ;;  %6124 = vmatpush3.bf16.msra.mxu0 %v6123_v16  ;;  %v4965_v28 = vpop.f32.mrb[1].mxu1 }
 0x116   : > { %v2074_v29 = vrot.slane %v2039_v23, 7  ;;  %6148 = vmatpush3.bf16.msra.mxu1 %v6147_v17  ;;  %6125 = vmatprep.subr.bf16.mxu0 %v6509_v3  ;;  %v2006_v17 = vld [vmem:[%s8367_s19 + $0x8] sm:$0xff] }
 0x117   : > { %v2075_v33 = vrot.slane %v2040_v26, 6  ;;  %6149 = vmatprep.subr.bf16.mxu1 %v6509_v3  ;;  %v2016_v18 = vrot.slane %v2006_v17, 1  ;;  %v2017_v31 = vrot.slane %v2006_v17, 2  ;;  %v2018_v32 = vrot.slane %v2006_v17, 3 }
 0x119   : > { %v2077_v36 = vsel %vm2076_vm1, %v2075_v33, %v2074_v29  ;;  %6127 = vmatpush3.bf16.msra.mxu0 %v6126_v27 }
 0x11a   : > { %6151 = vmatpush3.bf16.msra.mxu1 %v6150_v30  ;;  %6128 = vmatprep.subr.bf16.mxu0 %v6509_v3 }
 0x11b   : > { %6152 = vmatprep.subr.bf16.mxu1 %v6509_v3 }
 0x11d   : > { %6130 = vmatpush3.bf16.msra.mxu0 %v6129_v37 }
 0x11e   : > { %6154 = vmatpush3.bf16.msra.mxu1 %v6153_v38  ;;  %6155 = vmatprep.subr.bf16.mxu0 %v6509_v3 }
 0x11f   : > { %6168 = vmatprep.subr.bf16.mxu1 %v6509_v3 }
 0x120   : > { %5419 = vmatmul.mubr.f32.vlgmr.msra.gmra.mrb[14].mxu0 %v611_v39 }
 0x121   : > { %5454 = vmatmul.mubr.f32.vlgmr.msra.gmra.mrb[14].mxu1 %v612_v40  ;;  %5464 = vmatprep.mubr.msk.f32.mxu0 %vm6510_vm0, %v6511_v11 }
 0x122   : > { %5509 = vmatprep.mubr.msk.f32.mxu1 %vm6510_vm0, %v6511_v11 }
 0x133   : > { %v1075_v43 = vpop.f32.mrb[2].mxu0 }
 0x134   : > { %v2041_v44 = vadd.f32 %v2010_v41, %v1075_v43  ;;  %v5000_v45 = vpop.f32.mrb[3].mxu0  ;;  %v1145_v46 = vpop.f32.mrb[2].mxu1  ;;  %v2020_v43 = vrot.slane %v2006_v17, 5 }
 0x135   : > { %v2042_v47 = vadd.f32 %v2011_v42, %v1145_v46  ;;  %v5035_v48 = vpop.f32.mrb[3].mxu1  ;;  %v2019_v42 = vrot.slane %v2006_v17, 4 }
 0x136   : > { %v2078_v49 = vrot.slane %v2041_v44, 5 }
 0x137   : > { %v2081_v50 = vrot.slane %v2042_v47, 4 }
 0x138   : > { %v2080_v51 = vsel %vm2079_vm2, %v2078_v49, %v2077_v36 }
 0x139   : > { %v2083_v52 = vsel %vm2082_vm3, %v2081_v50, %v2080_v51 }
 0x153   : > { %v1215_v55 = vpop.f32.mrb[4].mxu0 }
 0x154   : > { %v2043_v56 = vadd.f32 %v2012_v53, %v1215_v55  ;;  %v5070_v57 = vpop.f32.mrb[5].mxu0  ;;  %v1285_v58 = vpop.f32.mrb[4].mxu1  ;;  %v2022_v55 = vrot.slane %v2006_v17, 7 }
 0x155   : > { %v2044_v59 = vadd.f32 %v2013_v54, %v1285_v58  ;;  %v5105_v60 = vpop.f32.mrb[5].mxu1  ;;  %v2021_v54 = vrot.slane %v2006_v17, 6 }
 0x156   : > { %v2084_v61 = vrot.slane %v2043_v56, 3 }
 0x157   : > { %v2087_v62 = vrot.slane %v2044_v59, 2 }
 0x158   : > { %v2086_v63 = vsel %vm2085_vm4, %v2084_v61, %v2083_v52 }
 0x159   : > { %v2089_v0 = vsel %vm2088_vm5, %v2087_v62, %v2086_v63 }
 0x173   : > { %v1355_v5 = vpop.f32.mrb[6].mxu0 }
 0x174   : > { %v2045_v6 = vadd.f32 %v2014_v1, %v1355_v5  ;;  %v5140_v7 = vpop.f32.mrb[7].mxu0  ;;  %v1425_v8 = vpop.f32.mrb[6].mxu1 }
 0x175   : > { %v5175_v10 = vpop.f32.mrb[7].mxu1  ;;  %v2046_v26 = vadd.f32 %v2015_v19, %v1425_v8  ;;  %v2175_v8 = vld [vmem:[%s8319_s5] sm:$0xff] }
 0x176   : > { %v2090_v13 = vrot.slane %v2045_v6, 1  ;;  %v2176_v10 = vld [vmem:[%s8319_s5 + $0x8] sm:$0xff] }
 0x178   : > { %v2092_v14 = vsel %vm2091_vm6, %v2090_v13, %v2089_v0  ;;  %v2177_v13 = vld [vmem:[%s8319_s5 + $0x10] sm:$0xff] }
 0x179   : > { %v7649_v15 = vsel %vm2111_vm7, %v2057_v12, %v2092_v14  ;;  %v6156_v12 = vpack.c.bf16 %v2176_v10, %v2175_v8  ;;  %v2178_v14 = vld [vmem:[%s8319_s5 + $0x18] sm:$0xff] }
 0x17a   : > { %v2116_v16 = vsel %vm2115_vm8, %v7649_v15, 0.0 }
 0x17b   : > { %2117 = vadd.xlane.f32.xlu0 %v2116_v16  ;;  %6157 = vmatpush3.bf16.msra.mxu0 %v6156_v12  ;;  %v6159_v16 = vpack.c.bf16 %v2178_v14, %v2177_v13 }
 0x17c   : > { %6158 = vmatprep.subr.bf16.mxu0 %v6509_v3 }
 0x17f   : > { %6160 = vmatpush3.bf16.msra.mxu0 %v6159_v16 }
 0x180   : > { %6161 = vmatprep.subr.bf16.mxu0 %v6509_v3 }
 0x193   : > { %v1495_v20 = vpop.f32.mrb[8].mxu0 }
 0x194   : > { %v2047_v21 = vadd.f32 %v2006_v17, %v1495_v20  ;;  %v5210_v22 = vpop.f32.mrb[9].mxu0  ;;  %v1565_v23 = vpop.f32.mrb[8].mxu1 }
 0x195   : > { %v2048_v24 = vadd.f32 %v2016_v18, %v1565_v23  ;;  %v5245_v25 = vpop.f32.mrb[9].mxu1 }
 0x196   : > { %v2093_v27 = vrot.slane %v2047_v21, 7 }
 0x197   : > { %v2096_v28 = vrot.slane %v2048_v24, 6 }
 0x198   : > { %v2095_v29 = vsel %vm2094_vm9, %v2093_v27, %v2046_v26 }
 0x199   : > { %v2097_v30 = vsel %vm2076_vm1, %v2096_v28, %v2095_v29 }
 0x1b3   : > { %v1635_v33 = vpop.f32.mrb[10].mxu0 }
 0x1b4   : > { %v2049_v34 = vadd.f32 %v2017_v31, %v1635_v33  ;;  %v5280_v35 = vpop.f32.mrb[11].mxu0  ;;  %v1705_v36 = vpop.f32.mrb[10].mxu1  ;;  %v4377_v31 = vld [vmem:[%s8323_s9] ss:$0 sm:$0xff] }
 0x1b5   : > { %v2050_v9 = vadd.f32 %v2018_v32, %v1705_v36  ;;  %v5315_v37 = vpop.f32.mrb[11].mxu1  ;;  %v4378_v33 = vld [vmem:[%s8324_s10] ss:$0 sm:$0xff] }
 0x1b6   : > { %v2098_v38 = vrot.slane %v2049_v34, 5 }
 0x1b7   : > { %v2100_v39 = vrot.slane %v2050_v9, 4 }
 0x1b8   : > { %v2099_v40 = vsel %vm2079_vm2, %v2098_v38, %v2097_v30 }
 0x1b9   : > { %v2101_v41 = vsel %vm2082_vm3, %v2100_v39, %v2099_v40 }
 0x1d3   : > { %v1775_v44 = vpop.f32.mrb[12].mxu0 }
 0x1d4   : > { %v2051_v45 = vadd.f32 %v2019_v42, %v1775_v44  ;;  %v5350_v46 = vpop.f32.mrb[13].mxu0  ;;  %v1845_v47 = vpop.f32.mrb[12].mxu1 }
 0x1d5   : > { %v2052_v48 = vadd.f32 %v2020_v43, %v1845_v47  ;;  %v5385_v49 = vpop.f32.mrb[13].mxu1 }
 0x1d6   : > { %v2102_v50 = vrot.slane %v2051_v45, 3 }
 0x1d7   : > { %v2104_v51 = vrot.slane %v2052_v48, 2 }
 0x1d8   : > { %v2103_v52 = vsel %vm2085_vm4, %v2102_v50, %v2101_v41 }
 0x1d9   : > { %v2105_v53 = vsel %vm2088_vm5, %v2104_v51, %v2103_v52  ;;  %v4379_v51 = vld [vmem:[%s8320_s6] ss:$0 sm:$0xff] }
 0x1f3   : > { %v1915_v56 = vpop.f32.mrb[14].mxu0 }
 0x1f4   : > { %v2053_v57 = vadd.f32 %v2021_v54, %v1915_v56  ;;  %v1985_v58 = vpop.f32.mrb[14].mxu1  ;;  %v5420_v59 = vpop.f32.mrb[15].mxu0 }
 0x1f5   : > { %v7662_v60 = vadd.f32 %v2022_v55, %v1985_v58  ;;  %v5455_v61 = vpop.f32.mrb[15].mxu1 }
 0x1f6   : > { %v2106_v62 = vrot.slane %v2053_v57, 1 }
 0x1f7   : > { %v2123_v63 = vsel %vm2122_vm10, %v7662_v60, 0.0 }
 0x1f8   : > { %2124 = vadd.xlane.f32.xlu1 %v2123_v63  ;;  %v7667_v0 = vsel %vm2091_vm6, %v2106_v62, %v2105_v53 }
 0x1f9   : > { %v2119_v1 = vsel %vm2115_vm8, %v7667_v0, 0.0 }
 0x1fa   : > { %2120 = vadd.xlane.f32.xlu0 %v2119_v1 }
 0x208   : > { %v2118_v2 = vpop.xlane.xlu0 %2117 }
 0x209   : > { %v2127_v4 = vmul.f32 0.03125, %v2118_v2 }
 0x20b   : > { %v2130_v5 = vsub.f32 %v7649_v15, %v2127_v4 }
 0x20d   : > { %v2133_v6 = vmul.f32 %v2130_v5, %v2130_v5 }
 0x20f   : > { %v2136_v7 = vsel %vm2115_vm8, %v2133_v6, 0.0 }
 0x210   : > { %2137 = vadd.xlane.f32.xlu1 %v2136_v7 }
 0x285   : > { %v2125_v17 = vpop.xlane.xlu1 %2124 }
 0x286   : > { %v2129_v18 = vmul.f32 0.03125, %v2125_v17 }
 0x287   : > { %v2121_v19 = vpop.xlane.xlu0 %2120 }
 0x288   : > { %v2132_v20 = vsub.f32 %v7662_v60, %v2129_v18  ;;  %v2128_v21 = vmul.f32 0.03125, %v2121_v19 }
 0x28a   : > { %v2131_v22 = vsub.f32 %v7667_v0, %v2128_v21  ;;  %v2135_v23 = vmul.f32 %v2132_v20, %v2132_v20 }
 0x28c   : > { %v2142_v24 = vsel %vm2122_vm10, %v2135_v23, 0.0  ;;  %v2134_v25 = vmul.f32 %v2131_v22, %v2131_v22 }
 0x28d   : > { %2143 = vadd.xlane.f32.xlu1 %v2142_v24 }
 0x28e   : > { %v2139_v26 = vsel %vm2115_vm8, %v2134_v25, 0.0 }
 0x28f   : > { %2140 = vadd.xlane.f32.xlu0 %v2139_v26 }
 0x29d   : > { %v2138_v27 = vpop.xlane.xlu1 %2137 }
 0x29e   : > { %v2145_v28 = vmul.f32 0.03125, %v2138_v27 }
 0x2a0   : > { %v2148_v29 = vadd.f32 1e-05, %v2145_v28 }
 0x2a2   : > { %6361 = vrsqrt.f32 %v2148_v29 }
 0x2ac   : > { %v6362_v30 = vpop.eup %6361 }
 0x2ad   : > { %v2154_v32 = vmul.f32 %v6362_v30, %v2130_v5 }
 0x2af   : > { %v2163_v34 = vmul.f32 %v4377_v31, %v2154_v32 }
 0x2b1   : > { %v2172_v35 = vadd.f32 %v4378_v33, %v2163_v34 }
 0x2b3   : > { %5465 = vmatmul.mubr.msk.f32.vlgmr.msra.gmra.mrb[16].mxu0 %vm2115_vm8, %v2172_v35 }
 0x2b4   : > { %5467 = vmatprep.mubr.msk.f32.mxu0 %vm6510_vm0, %v6511_v11 }
 0x31a   : > { %v2144_v36 = vpop.xlane.xlu1 %2143 }
 0x31b   : > { %v2147_v9 = vmul.f32 0.03125, %v2144_v36 }
 0x31c   : > { %v2141_v37 = vpop.xlane.xlu0 %2140 }
 0x31d   : > { %v2150_v38 = vadd.f32 1e-05, %v2147_v9  ;;  %v2146_v39 = vmul.f32 0.03125, %v2141_v37 }
 0x31f   : > { %6363 = vrsqrt.f32 %v2150_v38  ;;  %v2149_v40 = vadd.f32 1e-05, %v2146_v39 }
 0x321   : > { %6365 = vrsqrt.f32 %v2149_v40 }
 0x329   : > { %v6364_v41 = vpop.eup %6363 }
 0x32a   : > { %v2156_v44 = vmul.f32 %v6364_v41, %v2132_v20 }
 0x32b   : > { %v6366_v42 = vpop.eup %6365 }
 0x32c   : > { %v2155_v43 = vmul.f32 %v6366_v42, %v2131_v22  ;;  %v2165_v47 = vmul.f32 %v4377_v31, %v2156_v44 }
 0x32e   : > { %v2164_v45 = vmul.f32 %v4377_v31, %v2155_v43  ;;  %v2174_v48 = vadd.f32 %v4378_v33, %v2165_v47 }
 0x330   : > { %v2173_v46 = vadd.f32 %v4378_v33, %v2164_v45 }
 0x332   : > { %5468 = vmatmul.mubr.msk.f32.gmra.mrb[18].mxu0 %vm2115_vm8, %v2173_v46 }
 0x333   : > { %5470 = vmatprep.mubr.msk.f32.mxu0 %vm6510_vm0, %v6511_v11 }
 0x336   : > { %5471 = vmatmul.mubr.msk.f32.gmra.mrb[20].mxu0 %vm2115_vm8, %v2174_v48 }
 0x337   : > { %5479 = vmatprep.mubr.msk.f32.mxu0 %vm6510_vm0, %v6511_v11 }
 0x386   : > { %v2261_v49 = vpop.f32.mrb[16].mxu0 }
 0x387   : > { %v5466_v50 = vpop.f32.mrb[17].mxu0  ;;  %v2262_v53 = vadd.f32 %v4379_v51, %v2261_v49 }
 0x405   : > { %v2266_v52 = vpop.f32.mrb[18].mxu0 }
 0x406   : > { %v2267_v54 = vadd.f32 %v4379_v51, %v2266_v52  ;;  %v5469_v55 = vpop.f32.mrb[19].mxu0 }
 0x408   : > { %v7709_v56 = vpack.i.bf16 %v2267_v54, %v2262_v53 }
 0x409   : > { %v2271_v57 = vpop.f32.mrb[20].mxu0 }
 0x40a   : > { %v7711_v58 = vadd.f32 %v4379_v51, %v2271_v57  ;;  %6322 = vrot.lane.b32.xlu0 %v7709_v56, %s6512_s26  ;;  %v5472_v59 = vpop.f32.mrb[21].mxu0 }
 0x40c   : > { %2282 = vrot.lane.b32.xlu1 %v7711_v58, %s6512_s26 }
 0x40e   : > { %2514 = vrot.lane.b32.xlu0 %v2262_v53, %s6513_s27 }
 0x410   : > { %6327 = vrot.lane.b32.xlu1 %v7709_v56, %s8349_s28 }
 0x412   : > { %2518 = vrot.lane.b32.xlu0 %v7711_v58, %s6513_s27 }
 0x414   : > { %2524 = vrot.lane.b32.xlu1 %v7711_v58, %s8349_s28  ;;  %s4488_s28 = sshll.u32 %s6640_s1, 4  ;;  %s6518_s1 = smov [#allocation2]  }
 0x418   : > { %2516 = vrot.lane.b32.xlu1 %v2267_v54, %s6513_s27 }
 0x47c   : > { %v6323_v61 = vpop.permute.xlu0 %6322 }
 0x47d   : > { %v6325_v62 = vunpack.i.h.bf16 %v6323_v61  ;;  %v6324_v63 = vunpack.i.l.bf16 %v6323_v61 }
 0x47e   : > { %v2283_v1 = vpop.permute.xlu1 %2282 }
 0x47f   : > { %v6162_v4 = vpack.c.bf16 %v6325_v62, %v6324_v63 }
 0x480   : > { %v2515_v12 = vpop.permute.xlu0 %2514 }
 0x481   : > { %6164 = vmatpush3.bf16.xpose.msk.msra.mxu0 %vm7727_vm12, %v6162_v4 }
 0x482   : > { %v6328_v5 = vpop.permute.xlu1 %6327  ;;  %5477 = vmatprep.subr.mxu0 %v6511_v11 }
 0x483   : > { %v6330_v6 = vunpack.i.h.bf16 %v6328_v5  ;;  %v6329_v7 = vunpack.i.l.bf16 %v6328_v5 }
 0x484   : > { %v2519_v14 = vpop.permute.xlu0 %2518 }
 0x485   : > { %v6169_v8 = vpack.c.bf16 %v6330_v6, %v6329_v7 }
 0x486   : > { %v2525_v10 = vpop.permute.xlu1 %2524 }
 0x487   : > { %6171 = vmatpush3.bf16.xpose.msk.msra.mxu1 %vm7727_vm12, %v6169_v8 }
 0x488   : > { %5507 = vmatprep.subr.mxu1 %v6511_v11 }
 0x489   : > { %5478 = vmatpush3.xpose.msk.msra.mxu0 %vm2284_vm11, %v2283_v1 }
 0x48a   : > { %6165 = vmatprep.subr.bf16.mxu0 %v6509_v3  ;;  %v2517_v13 = vpop.permute.xlu1 %2516 }
 0x48c   : > { %5480 = vmatmul.mubr.msk.f32.vlgmr.msra.gmra.mrb[22].mxu0 %vm2284_vm11, %v2262_v53 }
 0x48d   : > { %5482 = vmatprep.mubr.msk.f32.mxu0 %vm6510_vm0, %v6511_v11 }
 0x48f   : > { %5508 = vmatpush3.xpose.msk.msra.mxu1 %vm2284_vm11, %v2525_v10 }
 0x490   : > { %5483 = vmatmul.mubr.msk.f32.gmra.mrb[24].mxu0 %vm2284_vm11, %v2267_v54  ;;  %6175 = vmatprep.subr.bf16.mxu1 %v6509_v3 }
 0x491   : > { %5485 = vmatprep.mubr.msk.f32.mxu0 %vm6510_vm0, %v6511_v11 }
 0x492   : > { %5510 = vmatmul.mubr.msk.f32.vlgmr.msra.gmra.mrb[16].mxu1 %vm2284_vm11, %v2515_v12 }
 0x493   : > { %5512 = vmatprep.mubr.msk.f32.mxu1 %vm6510_vm0, %v6511_v11 }
 0x494   : > { %5486 = vmatmul.mubr.msk.f32.gmra.mrb[26].mxu0 %vm2284_vm11, %v7711_v58 }
 0x495   : > { %5494 = vmatprep.mubr.msk.f32.mxu0 %vm6510_vm0, %v6511_v11 }
 0x496   : > { %5513 = vmatmul.mubr.msk.f32.gmra.mrb[18].mxu1 %vm2284_vm11, %v2517_v13 }
 0x497   : > { %5515 = vmatprep.mubr.msk.f32.mxu1 %vm6510_vm0, %v6511_v11 }
 0x49a   : > { %5516 = vmatmul.mubr.msk.f32.gmra.mrb[20].mxu1 %vm2284_vm11, %v2519_v14 }
 0x49b   : > { %5541 = vmatprep.mubr.msk.f32.mxu1 %vm6510_vm0, %v6511_v11 }
 0x55f   : > { %v2363_v16 = vpop.f32.mrb[22].mxu0 }
 0x560   : > { %v2377_v17 = vmul.f32 0.25, %v2363_v16  ;;  %v5481_v18 = vpop.f32.mrb[23].mxu0 }
 0x562   : > { %v2381_v19 = vsel %vm2380_vm13, %v2377_v17, -inf }
 0x563   : > { %2382 = vmax.xlane.f32.xlu1 %v2381_v19  ;;  %v2368_v20 = vpop.f32.mrb[24].mxu0 }
 0x564   : > { %v2378_v21 = vmul.f32 0.25, %v2368_v20  ;;  %v5484_v22 = vpop.f32.mrb[25].mxu0 }
 0x565   : > { %v2604_v23 = vpop.f32.mrb[16].mxu1 }
 0x566   : > { %v5511_v24 = vpop.f32.mrb[17].mxu1  ;;  %v2384_v25 = vsel %vm2380_vm13, %v2378_v21, -inf  ;;  %v2618_v30 = vmul.f32 0.25, %v2604_v23 }
 0x567   : > { %2385 = vmax.xlane.f32.xlu0 %v2384_v25  ;;  %v2373_v26 = vpop.f32.mrb[26].mxu0 }
 0x568   : > { %v2379_v27 = vmul.f32 0.25, %v2373_v26  ;;  %v5487_v28 = vpop.f32.mrb[27].mxu0  ;;  %v2621_v37 = vsel %vm2380_vm13, %v2618_v30, -inf }
 0x569   : > { %v2609_v29 = vpop.f32.mrb[18].mxu1 }
 0x56a   : > { %v2619_v31 = vmul.f32 0.25, %v2609_v29  ;;  %v5514_v32 = vpop.f32.mrb[19].mxu1  ;;  %v2388_v33 = vsel %vm2387_vm14, %v2379_v27, -inf }
 0x56b   : > { %2389 = vmax.xlane.f32.xlu0 %v2388_v33 }
 0x56c   : > { %v2624_v34 = vsel %vm2380_vm13, %v2619_v31, -inf }
 0x56d   : > { %v2614_v35 = vpop.f32.mrb[20].mxu1  ;;  %2625 = vmax.xlane.f32.xlu1 %v2624_v34 }
 0x56e   : > { %v2620_v36 = vmul.f32 0.25, %v2614_v35  ;;  %v5517_v9 = vpop.f32.mrb[21].mxu1 }
 0x56f   : > { %2622 = vmax.xlane.f32.xlu0 %v2621_v37 }
 0x570   : > { %v2627_v38 = vsel %vm2387_vm14, %v2620_v36, -inf }
 0x573   : > { %2628 = vmax.xlane.f32.xlu0 %v2627_v38 }
 0x589   : > { %6332 = vrot.lane.b32.xlu0 %v7709_v56, %s8345_s24 }
 0x5f0   : > { %v2383_v39 = vpop.xlane.xlu1 %2382 }
 0x5f1   : > { %v2391_v40 = vsub.f32 %v2377_v17, %v2383_v39  ;;  %v2768_v39 = vld [vmem:[%s8321_s7] sm:$0xff] }
 0x5f3   : > { %v2394_v41 = vmul.f32 1.442695, %v2391_v40  ;;  %v2769_v40 = vld [vmem:[%s8321_s7 + $0x8] sm:$0xff] }
 0x5f4   : > { %v2386_v42 = vpop.xlane.xlu0 %2385 }
 0x5f5   : > { %6367 = vpow2.f32 %v2394_v41  ;;  %v2392_v46 = vsub.f32 %v2378_v21, %v2386_v42  ;;  %v2770_v41 = vld [vmem:[%s8321_s7 + $0x10] sm:$0xff]  ;;  %v6176_v42 = vpack.c.bf16 %v2769_v40, %v2768_v39  ;;  %v3060_v39 = vld [vmem:[%s8329_s15] sm:$0xff]  ;;  %v3061_v40 = vld [vmem:[%s8329_s15 + $0x8] sm:$0xff] }
 0x5f7   : > { %v2396_v53 = vmul.f32 1.442695, %v2392_v46  ;;  %6177 = vmatpush3.bf16.msra.mxu1 %v6176_v42 }
 0x5f8   : > { %v2390_v43 = vpop.xlane.xlu0 %2389  ;;  %6178 = vmatprep.subr.bf16.mxu1 %v6509_v3 }
 0x5f9   : > { %v2393_v44 = vsub.f32 %v2379_v27, %v2390_v43  ;;  %v2771_v43 = vld [vmem:[%s8321_s7 + $0x18] sm:$0xff] }
 0x5fa   : > { %v2626_v45 = vpop.xlane.xlu1 %2625 }
 0x5fb   : > { %v2631_v47 = vsub.f32 %v2619_v31, %v2626_v45  ;;  %v2398_v48 = vmul.f32 1.442695, %v2393_v44  ;;  %v6179_v44 = vpack.c.bf16 %v2771_v43, %v2770_v41  ;;  %v6188_v41 = vpack.c.bf16 %v3061_v40, %v3060_v39 }
 0x5fc   : > { %v2623_v49 = vpop.xlane.xlu0 %2622 }
 0x5fd   : > { %v2635_v50 = vmul.f32 1.442695, %v2631_v47  ;;  %v2630_v51 = vsub.f32 %v2618_v30, %v2623_v49  ;;  %6180 = vmatpush3.bf16.msra.mxu1 %v6179_v44 }
 0x5fe   : > { %6187 = vmatprep.subr.bf16.mxu1 %v6509_v3 }
 0x5ff   : > { %v6368_v52 = vpop.eup %6367  ;;  %6369 = vpow2.f32 %v2635_v50  ;;  %v2633_v54 = vmul.f32 1.442695, %v2630_v51 }
 0x600   : > { %6371 = vpow2.f32 %v2398_v48  ;;  %v2629_v55 = vpop.xlane.xlu0 %2628  ;;  %v2400_v57 = vsel %vm2380_vm13, %v6368_v52, 0.0 }
 0x601   : > { %6373 = vpow2.f32 %v2633_v54  ;;  %2401 = vadd.xlane.f32.xlu1 %v2400_v57  ;;  %v2632_v13 = vsub.f32 %v2620_v36, %v2629_v55 }
 0x602   : > { %6375 = vpow2.f32 %v2396_v53 }
 0x603   : > { %v2637_v14 = vmul.f32 1.442695, %v2632_v13 }
 0x604   : > { %v6333_v59 = vpop.permute.xlu0 %6332 }
 0x605   : > { %v6335_v61 = vunpack.i.h.bf16 %v6333_v59  ;;  %v6334_v62 = vunpack.i.l.bf16 %v6333_v59  ;;  %6377 = vpow2.f32 %v2637_v14 }
 0x607   : > { %v6166_v63 = vpack.c.bf16 %v6335_v61, %v6334_v62 }
 0x609   : > { %v7769_v1 = vpop.eup %6369  ;;  %6167 = vmatpush3.bf16.msra.mxu0 %v6166_v63 }
 0x60a   : > { %v6372_v4 = vpop.eup %6371  ;;  %v2642_v5 = vsel %vm2380_vm13, %v7769_v1, 0.0  ;;  %5492 = vmatprep.subr.mxu0 %v6511_v11 }
 0x60b   : > { %v6374_v6 = vpop.eup %6373  ;;  %2643 = vadd.xlane.f32.xlu1 %v2642_v5  ;;  %v2406_v10 = vsel %vm2387_vm14, %v6372_v4, 0.0 }
 0x60c   : > { %v2639_v7 = vsel %vm2380_vm13, %v6374_v6, 0.0  ;;  %v6376_v8 = vpop.eup %6375 }
 0x60d   : > { %2640 = vadd.xlane.f32.xlu0 %v2639_v7  ;;  %v2403_v12 = vsel %vm2380_vm13, %v6376_v8, 0.0 }
 0x60f   : > { %2407 = vadd.xlane.f32.xlu1 %v2406_v10  ;;  %v6378_v16 = vpop.eup %6377 }
 0x610   : > { %v2645_v17 = vsel %vm2387_vm14, %v6378_v16, 0.0 }
 0x611   : > { %2404 = vadd.xlane.f32.xlu0 %v2403_v12 }
 0x620   : > { %2419 = vrot.lane.b32.xlu1 %v7711_v58, %s8345_s24  ;;  %s6449_s24 = sshll.u32 %s6518_s1, 4  ;;  %s6450_s24 = int_to_ptr.vmem [resolvable:$false] %s6449_s24 }
 0x621   : > { %s6451_s4 = scalar_lea.vmem %s6450_s24, 32 }
 0x627   : > { %6337 = vrot.lane.b32.xlu0 %v7709_v56, %s8343_s20 }
 0x62b   : > { %2658 = vrot.lane.b32.xlu0 %v7711_v58, %s8343_s20 }
 0x644   : > { %2646 = vadd.xlane.f32.xlu1 %v2645_v17 }
 0x68e   : > { %v2402_v18 = vpop.xlane.xlu1 %2401 }
 0x68f   : > { %6379 = vrcp.f32 %v2402_v18 }
 0x698   : > { %v2644_v19 = vpop.xlane.xlu1 %2643 }
 0x699   : > { %v6380_v22 = vpop.eup %6379 }
 0x69a   : > { %v2641_v20 = vpop.xlane.xlu0 %2640  ;;  %v2412_v24 = vmul.f32 %v6380_v22, %v6368_v52 }
 0x69c   : > { %v2408_v21 = vpop.xlane.xlu1 %2407 }
 0x69e   : > { %v2405_v23 = vpop.xlane.xlu0 %2404 }
 0x69f   : > { %6381 = vrcp.f32 %v2405_v23 }
 0x6a0   : > { %v2420_v56 = vpop.permute.xlu1 %2419  ;;  %6383 = vrcp.f32 %v2408_v21 }
 0x6a1   : > { %5493 = vmatpush3.msk.msra.mxu0 %vm2111_vm7, %v2420_v56  ;;  %6385 = vrcp.f32 %v2641_v20 }
 0x6a2   : > { %v6338_v58 = vpop.permute.xlu0 %6337  ;;  %5495 = vmatmul.mubr.msk.f32.vlgmr.msra.gmra.mrb[28].mxu0 %vm2380_vm13, %v2412_v24  ;;  %6172 = vmatprep.subr.bf16.mxu0 %v6509_v3  ;;  %6387 = vrcp.f32 %v2644_v19 }
 0x6a3   : > { %v6340_v25 = vunpack.i.h.bf16 %v6338_v58  ;;  %v6339_v26 = vunpack.i.l.bf16 %v6338_v58  ;;  %5497 = vmatprep.mubr.msk.f32.mxu0 %vm6510_vm0, %v6511_v11 }
 0x6a5   : > { %v6173_v27 = vpack.c.bf16 %v6340_v25, %v6339_v26 }
 0x6a6   : > { %v2659_v29 = vpop.permute.xlu0 %2658 }
 0x6a7   : > { %6174 = vmatpush3.bf16.msra.mxu0 %v6173_v27 }
 0x6a8   : > { %5522 = vmatprep.subr.mxu0 %v6511_v11 }
 0x6a9   : > { %v6382_v28 = vpop.eup %6381 }
 0x6aa   : > { %v2413_v30 = vmul.f32 %v6382_v28, %v6376_v8  ;;  %v6384_v31 = vpop.eup %6383 }
 0x6ab   : > { %5523 = vmatpush3.msk.msra.mxu0 %vm2111_vm7, %v2659_v29  ;;  %v2414_v32 = vmul.f32 %v6384_v31, %v6372_v4  ;;  %v6386_v33 = vpop.eup %6385  ;;  %v2933_v29 = vld [vmem:[%s8327_s13] sm:$0xff] }
 0x6ac   : > { %5498 = vmatmul.mubr.msk.f32.gmra.mrb[30].mxu0 %vm2380_vm13, %v2413_v30  ;;  %6181 = vmatprep.subr.bf16.mxu0 %v6509_v3  ;;  %v2651_v34 = vmul.f32 %v6386_v33, %v6374_v6  ;;  %v6388_v35 = vpop.eup %6387  ;;  %v4406_v6 = vld [vmem:[%s8322_s8] ss:$0 sm:$0xff]  ;;  %v2934_v30 = vld [vmem:[%s8327_s13 + $0x8] sm:$0xff]  ;;  %v2936_v33 = vld [vmem:[%s8327_s13 + $0x18] sm:$0xff] }
 0x6ad   : > { %5500 = vmatprep.mubr.msk.f32.mxu0 %vm6510_vm0, %v6511_v11  ;;  %v2652_v36 = vmul.f32 %v6388_v35, %v7769_v1  ;;  %v6182_v31 = vpack.c.bf16 %v2934_v30, %v2933_v29  ;;  %v4409_v29 = vld [vmem:[%s8328_s14] ss:$0 sm:$0xff] }
 0x6b0   : > { %5501 = vmatmul.mubr.msk.f32.gmra.mrb[32].mxu0 %vm2380_vm13, %v2414_v32  ;;  %v2935_v32 = vld [vmem:[%s8327_s13 + $0x10] sm:$0xff] }
 0x6b1   : > { %5524 = vmatprep.mubr.msk.f32.mxu0 %vm6510_vm0, %v6511_v11 }
 0x6b4   : > { %5525 = vmatmul.mubr.msk.f32.vlgmr.msra.gmra.mrb[34].mxu0 %vm2380_vm13, %v2651_v34  ;;  %v6185_v34 = vpack.c.bf16 %v2936_v33, %v2935_v32 }
 0x6b5   : > { %5527 = vmatprep.mubr.msk.f32.mxu0 %vm6510_vm0, %v6511_v11  ;;  %6183 = vmatpush3.bf16.msra.mxu0 %v6182_v31 }
 0x6b6   : > { %6184 = vmatprep.subr.bf16.mxu0 %v6509_v3 }
 0x6b8   : > { %5528 = vmatmul.mubr.msk.f32.gmra.mrb[36].mxu0 %vm2380_vm13, %v2652_v36 }
 0x6b9   : > { %5530 = vmatprep.mubr.msk.f32.mxu0 %vm6510_vm0, %v6511_v11  ;;  %6186 = vmatpush3.bf16.msra.mxu0 %v6185_v34 }
 0x6ba   : > { %6211 = vmatprep.subr.bf16.mxu0 %v6509_v3 }
 0x6d1   : > { %v2647_v9 = vpop.xlane.xlu1 %2646 }
 0x6d2   : > { %6389 = vrcp.f32 %v2647_v9 }
 0x6dc   : > { %v6390_v37 = vpop.eup %6389 }
 0x6dd   : > { %v2653_v38 = vmul.f32 %v6390_v37, %v6378_v16 }
 0x6df   : > { %5531 = vmatmul.mubr.msk.f32.gmra.mrb[38].mxu0 %vm2380_vm13, %v2653_v38 }
 0x6e0   : > { %5558 = vmatprep.mubr.msk.f32.mxu0 %vm6510_vm0, %v6511_v11 }
 0x775   : > { %v2500_v45 = vpop.f32.mrb[28].mxu0 }
 0x776   : > { %v5496_v46 = vpop.f32.mrb[29].mxu0 }
 0x77f   : > { %v2505_v47 = vpop.f32.mrb[30].mxu0 }
 0x780   : > { %v5499_v48 = vpop.f32.mrb[31].mxu0 }
 0x783   : > { %v2510_v49 = vpop.f32.mrb[32].mxu0 }
 0x784   : > { %v5502_v50 = vpop.f32.mrb[33].mxu0 }
 0x787   : > { %v2739_v51 = vpop.f32.mrb[34].mxu0 }
 0x788   : > { %2756 = vrot.lane.b32.xlu0 %v2739_v51, %s8347_s22  ;;  %v5526_v52 = vpop.f32.mrb[35].mxu0  ;;  %v4408_v51 = vld [vmem:[%s8326_s12] ss:$0 sm:$0xff] }
 0x78b   : > { %v2744_v53 = vpop.f32.mrb[36].mxu0 }
 0x78c   : > { %2758 = vrot.lane.b32.xlu0 %v2744_v53, %s8347_s22  ;;  %v5529_v54 = vpop.f32.mrb[37].mxu0 }
 0x7b2   : > { %v2749_v55 = vpop.f32.mrb[38].mxu0 }
 0x7b3   : > { %2760 = vrot.lane.b32.xlu0 %v2749_v55, %s8347_s22  ;;  %v5532_v57 = vpop.f32.mrb[39].mxu0  ;;  %s591_s22 = sand.u32 1, %s6499_s30  }
 0x7b4   : > { %s592_s20 = scalar_lea.vmem [#allocation2], %s591_s22  ;;  %s4305_s23 = scalar_lea.sflag [#allocation3], %s591_s22 }
 0x7b5   : > { %s4317_s25 = sshll.u32 %s592_s20, 4  ;;  %s8274_s25 = int_to_ptr.vmem [resolvable:$true] %s4317_s25 }
 0x7b6   : > { %s6445_s0 = scalar_lea.vmem %s8274_s25, 16  ;;  %p6452_p0 = scmp.lt.s32.totalorder %s8274_s25, %s6450_s24 }
 0x7b7   : > { %p6446_p11 = scmp.ne.s32.totalorder %s8274_s25, %s6445_s0  ;;  %p6453_p1 = scmp.lt.s32.totalorder %s6451_s4, %s6445_s0 }
 0x7b9   : > { %p6447_p12 = pnand %p6446_p11, %p6657_p5  ;;  %p6454_p2 = por %p6453_p1, %p6452_p0 }
 0x7bb   : > { %p6448_p13 = pneg %p6447_p12 }
 0x7bd   : > { %p6455_p3 = pnand %p6454_p2, %p6448_p13 }
 0x7fa   : > { %v2757_v59 = vpop.permute.xlu0 %2756 }
 0x7fb   : > { %v2765_v61 = vsel %vm2284_vm11, %v2500_v45, %v2757_v59 }
 0x7fc   : > { %5542 = vmatmul.mubr.msk.f32.vlgmr.msra.gmra.mrb[22].mxu1 %vm2115_vm8, %v2765_v61 }
 0x7fd   : > { %5544 = vmatprep.mubr.msk.f32.mxu1 %vm6510_vm0, %v6511_v11  ;;  %6189 = vmatpush3.bf16.msra.mxu1 %v6188_v41 }
 0x7fe   : > { %v2759_v62 = vpop.permute.xlu0 %2758  ;;  %6190 = vmatprep.subr.bf16.mxu1 %v6509_v3 }
 0x7ff   : > { %v2766_v63 = vsel %vm2284_vm11, %v2505_v47, %v2759_v62 }
 0x800   : > { %5545 = vmatmul.mubr.msk.f32.gmra.mrb[24].mxu1 %vm2115_vm8, %v2766_v63 }
 0x801   : > { %5547 = vmatprep.mubr.msk.f32.mxu1 %vm6510_vm0, %v6511_v11 }
 0x825   : > { %v2761_v1 = vpop.permute.xlu0 %2760 }
 0x826   : > { %v2767_v4 = vsel %vm2284_vm11, %v2510_v49, %v2761_v1  ;;  %v4407_v49 = vld [vmem:[%s8325_s11] ss:$0 sm:$0xff] }
 0x827   : > { %5548 = vmatmul.mubr.msk.f32.gmra.mrb[26].mxu1 %vm2115_vm8, %v2767_v4 }
 0x828   : > { %5599 = vmatprep.mubr.msk.f32.mxu1 %vm6510_vm0, %v6511_v11 }
 0x8cf   : > { %v2847_v5 = vpop.f32.mrb[22].mxu1 }
 0x8d0   : > { %v2861_v7 = vadd.f32 %v2847_v5, %v7649_v15  ;;  %v5543_v8 = vpop.f32.mrb[23].mxu1 }
 0x8d1   : > { %v3063_v8 = vld [vmem:[%s8329_s15 + $0x18] sm:$0xff] }
 0x8d2   : > { %v7841_v10 = vadd.f32 %v4406_v6, %v2861_v7  ;;  %v3062_v7 = vld [vmem:[%s8329_s15 + $0x10] sm:$0xff] }
 0x8d3   : > { %v2852_v12 = vpop.f32.mrb[24].mxu1 }
 0x8d4   : > { %v2862_v13 = vadd.f32 %v2852_v12, %v7667_v0  ;;  %v5546_v14 = vpop.f32.mrb[25].mxu1  ;;  %v2876_v16 = vsel %vm2115_vm8, %v7841_v10, 0.0  ;;  %v6191_v12 = vpack.c.bf16 %v3063_v8, %v3062_v7  ;;  %v4413_v8 = vld [vmem:[%s8330_s16] ss:$0 sm:$0xff] }
 0x8d5   : > { %2877 = vadd.xlane.f32.xlu0 %v2876_v16  ;;  %v3065_v14 = vld [vmem:[%s8329_s15 + $0x28] sm:$0xff] }
 0x8d6   : > { %v7846_v17 = vadd.f32 %v4406_v6, %v2862_v13  ;;  %6192 = vmatpush3.bf16.msra.mxu1 %v6191_v12  ;;  %v3064_v13 = vld [vmem:[%s8329_s15 + $0x20] sm:$0xff] }
 0x8d7   : > { %6193 = vmatprep.subr.bf16.mxu1 %v6509_v3  ;;  %v6194_v16 = vpack.c.bf16 %v3065_v14, %v3064_v13 }
 0x8d8   : > { %v2879_v18 = vsel %vm2115_vm8, %v7846_v17, 0.0 }
 0x8d9   : > { %2880 = vadd.xlane.f32.xlu1 %v2879_v18  ;;  %v3066_v18 = vld [vmem:[%s8329_s15 + $0x30] sm:$0xff] }
 0x8da   : > { %6195 = vmatpush3.bf16.msra.mxu1 %v6194_v16 }
 0x8db   : > { %6196 = vmatprep.subr.bf16.mxu1 %v6509_v3 }
 0x8fa   : > { %v2857_v19 = vpop.f32.mrb[26].mxu1 }
 0x8fb   : > { %v2863_v15 = vadd.f32 %v2857_v19, %v7662_v60  ;;  %v5549_v20 = vpop.f32.mrb[27].mxu1  ;;  %v3067_v19 = vld [vmem:[%s8329_s15 + $0x38] sm:$0xff] }
 0x8fc   : > { %v3068_v20 = vld [vmem:[%s8329_s15 + $0x40] sm:$0xff] }
 0x8fd   : > { %v7851_v21 = vadd.f32 %v4406_v6, %v2863_v15  ;;  %v6197_v15 = vpack.c.bf16 %v3067_v19, %v3066_v18 }
 0x8ff   : > { %v2882_v0 = vsel %vm2122_vm10, %v7851_v21, 0.0  ;;  %6198 = vmatpush3.bf16.msra.mxu1 %v6197_v15 }
 0x900   : > { %2883 = vadd.xlane.f32.xlu1 %v2882_v0  ;;  %6199 = vmatprep.subr.bf16.mxu1 %v6509_v3  ;;  %v3069_v0 = vld [vmem:[%s8329_s15 + $0x48] sm:$0xff] }
 0x962   : > { %v2878_v22 = vpop.xlane.xlu0 %2877 }
 0x963   : > { %v2885_v23 = vmul.f32 0.03125, %v2878_v22  ;;  %v6200_v22 = vpack.c.bf16 %v3069_v0, %v3068_v20 }
 0x965   : > { %v2888_v24 = vsub.f32 %v7841_v10, %v2885_v23  ;;  %v3070_v23 = vld [vmem:[%s8329_s15 + $0x50] sm:$0xff]  ;;  %6201 = vmatpush3.bf16.msra.mxu1 %v6200_v22 }
 0x966   : > { %v2881_v56 = vpop.xlane.xlu1 %2880  ;;  %6202 = vmatprep.subr.bf16.mxu1 %v6509_v3 }
 0x967   : > { %v2886_v58 = vmul.f32 0.03125, %v2881_v56  ;;  %v2891_v25 = vmul.f32 %v2888_v24, %v2888_v24 }
 0x969   : > { %v2889_v26 = vsub.f32 %v7846_v17, %v2886_v58  ;;  %v2894_v27 = vsel %vm2115_vm8, %v2891_v25, 0.0  ;;  %v3072_v58 = vld [vmem:[%s8329_s15 + $0x60] sm:$0xff]  ;;  %v3073_v25 = vld [vmem:[%s8329_s15 + $0x68] sm:$0xff] }
 0x96a   : > { %2895 = vadd.xlane.f32.xlu1 %v2894_v27  ;;  %v3074_v27 = vld [vmem:[%s8329_s15 + $0x70] sm:$0xff] }
 0x96b   : > { %v2892_v60 = vmul.f32 %v2889_v26, %v2889_v26 }
 0x96d   : > { %v2897_v28 = vsel %vm2115_vm8, %v2892_v60, 0.0  ;;  %v3075_v60 = vld [vmem:[%s8329_s15 + $0x78] sm:$0xff] }
 0x96e   : > { %2898 = vadd.xlane.f32.xlu1 %v2897_v28  ;;  %v6209_v28 = vpack.c.bf16 %v3075_v60, %v3074_v27 }
 0x98d   : > { %v2884_v35 = vpop.xlane.xlu1 %2883 }
 0x98e   : > { %v2887_v36 = vmul.f32 0.03125, %v2884_v35 }
 0x990   : > { %v2890_v9 = vsub.f32 %v7851_v21, %v2887_v36 }
 0x992   : > { %v2893_v37 = vmul.f32 %v2890_v9, %v2890_v9 }
 0x994   : > { %v2900_v38 = vsel %vm2122_vm10, %v2893_v37, 0.0 }
 0x995   : > { %2901 = vadd.xlane.f32.xlu1 %v2900_v38 }
 0x9f7   : > { %v2896_v42 = vpop.xlane.xlu1 %2895 }
 0x9f8   : > { %v2903_v43 = vmul.f32 0.03125, %v2896_v42 }
 0x9fa   : > { %v2906_v44 = vadd.f32 1e-05, %v2903_v43 }
 0x9fb   : > { %v2899_v45 = vpop.xlane.xlu1 %2898 }
 0x9fc   : > { %6391 = vrsqrt.f32 %v2906_v44  ;;  %v2904_v46 = vmul.f32 0.03125, %v2899_v45 }
 0x9fe   : > { %v2907_v47 = vadd.f32 1e-05, %v2904_v46 }
 0xa00   : > { %6393 = vrsqrt.f32 %v2907_v47 }
 0xa06   : > { %v6392_v48 = vpop.eup %6391 }
 0xa07   : > { %v2912_v50 = vmul.f32 %v6392_v48, %v2888_v24  ;;  %v3071_v24 = vld [vmem:[%s8329_s15 + $0x58] sm:$0xff] }
 0xa08   : > { %v6203_v56 = vpack.c.bf16 %v3071_v24, %v3070_v23 }
 0xa09   : > { %v2921_v52 = vmul.f32 %v4407_v49, %v2912_v50 }
 0xa0a   : > { %v6394_v53 = vpop.eup %6393  ;;  %6204 = vmatpush3.bf16.msra.mxu1 %v6203_v56 }
 0xa0b   : > { %v2930_v54 = vadd.f32 %v4408_v51, %v2921_v52  ;;  %v2913_v55 = vmul.f32 %v6394_v53, %v2889_v26  ;;  %v6206_v26 = vpack.c.bf16 %v3073_v25, %v3072_v58  ;;  %6205 = vmatprep.subr.bf16.mxu1 %v6509_v3 }
 0xa0d   : > { %5559 = vmatmul.mubr.msk.f32.vlgmr.msra.gmra.mrb[40].mxu0 %vm2115_vm8, %v2930_v54  ;;  %v2922_v57 = vmul.f32 %v4407_v49, %v2913_v55 }
 0xa0e   : > { %5561 = vmatprep.mubr.msk.f32.mxu0 %vm6510_vm0, %v6511_v11  ;;  %6207 = vmatpush3.bf16.msra.mxu1 %v6206_v26 }
 0xa0f   : > { %v2931_v59 = vadd.f32 %v4408_v51, %v2922_v57  ;;  %6208 = vmatprep.subr.bf16.mxu1 %v6509_v3 }
 0xa11   : > { %5562 = vmatmul.mubr.msk.f32.gmra.mrb[42].mxu0 %vm2115_vm8, %v2931_v59 }
 0xa12   : > { %5564 = vmatprep.mubr.msk.f32.mxu0 %vm6510_vm0, %v6511_v11  ;;  %6210 = vmatpush3.bf16.msra.mxu1 %v6209_v28 }
 0xa13   : > { %6224 = vmatprep.subr.bf16.mxu1 %v6509_v3 }
 0xa22   : > { %v2902_v61 = vpop.xlane.xlu1 %2901 }
 0xa23   : > { %v2905_v62 = vmul.f32 0.03125, %v2902_v61 }
 0xa25   : > { %v2908_v63 = vadd.f32 1e-05, %v2905_v62 }
 0xa27   : > { %6395 = vrsqrt.f32 %v2908_v63 }
 0xa31   : > { %v6396_v1 = vpop.eup %6395 }
 0xa32   : > { %v2914_v4 = vmul.f32 %v6396_v1, %v2890_v9 }
 0xa34   : > { %v2923_v5 = vmul.f32 %v4407_v49, %v2914_v4 }
 0xa36   : > { %v2932_v6 = vadd.f32 %v4408_v51, %v2923_v5 }
 0xa38   : > { %5565 = vmatmul.mubr.msk.f32.gmra.mrb[44].mxu0 %vm2115_vm8, %v2932_v6 }
 0xa39   : > { %5616 = vmatprep.mubr.msk.f32.mxu0 %vm6510_vm0, %v6511_v11 }
 0xae0   : > { %v3019_v30 = vpop.f32.mrb[40].mxu0 }
 0xae1   : > { %v3020_v31 = vadd.f32 %v4409_v29, %v3019_v30  ;;  %v5560_v32 = vpop.f32.mrb[41].mxu0 }
 0xae2   : > { %v4419_v32 = vld [vmem:[%s8319_s5 + $0x28] sm:$0xff] }
 0xae3   : > { %v3036_v33 = vmul.f32 0.044715, %v3020_v31  ;;  %v3033_v46 = vmul.f32 0.5, %v3020_v31 }
 0xae4   : > { %v3024_v34 = vpop.f32.mrb[42].mxu0 }
 0xae5   : > { %v3039_v35 = vmul.f32 %v3036_v33, %v3020_v31  ;;  %v3025_v36 = vadd.f32 %v4409_v29, %v3024_v34  ;;  %v5563_v9 = vpop.f32.mrb[43].mxu0  ;;  %v4420_v34 = vld [vmem:[%s8319_s5 + $0x30] sm:$0xff] }
 0xae7   : > { %v3042_v37 = vmul.f32 %v3039_v35, %v3020_v31  ;;  %v3037_v38 = vmul.f32 0.044715, %v3025_v36  ;;  %v3034_v50 = vmul.f32 0.5, %v3025_v36  ;;  %v4421_v35 = vld [vmem:[%s8319_s5 + $0x38] sm:$0xff] }
 0xae9   : > { %v3045_v39 = vadd.f32 %v3042_v37, %v3020_v31  ;;  %v3040_v40 = vmul.f32 %v3037_v38, %v3025_v36  ;;  %v4418_v31 = vld [vmem:[%s8319_s5 + $0x20] sm:$0xff] }
 0xaea   : > { %v6212_v33 = vpack.c.bf16 %v4419_v32, %v4418_v31 }
 0xaeb   : > { %v3048_v41 = vmul.f32 0.7978846, %v3045_v39  ;;  %v3043_v42 = vmul.f32 %v3040_v40, %v3025_v36 }
 0xaec   : > { %6213 = vmatpush3.bf16.msra.mxu0 %v6212_v33 }
 0xaed   : > { %6397 = vtanh.f32 %v3048_v41  ;;  %v3046_v43 = vadd.f32 %v3043_v42, %v3025_v36  ;;  %6214 = vmatprep.subr.bf16.mxu0 %v6509_v3  ;;  %v6215_v36 = vpack.c.bf16 %v4421_v35, %v4420_v34 }
 0xaef   : > { %v3049_v44 = vmul.f32 0.7978846, %v3046_v43 }
 0xaf0   : > { %6216 = vmatpush3.bf16.msra.mxu0 %v6215_v36 }
 0xaf1   : > { %6399 = vtanh.f32 %v3049_v44  ;;  %6217 = vmatprep.subr.bf16.mxu0 %v6509_v3 }
 0xaf7   : > { %v6398_v45 = vpop.eup %6397 }
 0xaf8   : > { %v3054_v47 = vadd.f32 1.0, %v6398_v45 }
 0xafa   : > { %v3057_v48 = vmul.f32 %v3054_v47, %v3033_v46 }
 0xafb   : > { %v6400_v49 = vpop.eup %6399 }
 0xafc   : > { %5600 = vmatmul.mubr.f32.vlgmr.msra.gmra.mrb[28].mxu1 %v3057_v48  ;;  %v3055_v51 = vadd.f32 1.0, %v6400_v49  ;;  %v4416_v48 = vld [vmem:[%s8323_s9 + $0x1] ss:$0 sm:$0xff] }
 0xafd   : > { %5602 = vmatprep.mubr.msk.f32.mxu1 %vm6510_vm0, %v6511_v11 }
 0xafe   : > { %v3058_v52 = vmul.f32 %v3055_v51, %v3034_v50  ;;  %v4417_v50 = vld [vmem:[%s8324_s10 + $0x1] ss:$0 sm:$0xff] }
 0xb00   : > { %5603 = vmatmul.mubr.f32.gmra.mrb[30].mxu1 %v3058_v52 }
 0xb01   : > { %5605 = vmatprep.mubr.msk.f32.mxu1 %vm6510_vm0, %v6511_v11 }
 0xb0b   : > { %v3029_v53 = vpop.f32.mrb[44].mxu0 }
 0xb0c   : > { %v3030_v54 = vadd.f32 %v4409_v29, %v3029_v53  ;;  %v5566_v55 = vpop.f32.mrb[45].mxu0 }
 0xb0e   : > { %v3038_v57 = vmul.f32 0.044715, %v3030_v54  ;;  %v3035_v4 = vmul.f32 0.5, %v3030_v54 }
 0xb10   : > { %v3041_v59 = vmul.f32 %v3038_v57, %v3030_v54 }
 0xb12   : > { %v3044_v61 = vmul.f32 %v3041_v59, %v3030_v54 }
 0xb14   : > { %v3047_v62 = vadd.f32 %v3044_v61, %v3030_v54 }
 0xb16   : > { %v3050_v63 = vmul.f32 0.7978846, %v3047_v62 }
 0xb18   : > { %6401 = vtanh.f32 %v3050_v63 }
 0xb22   : > { %v6402_v1 = vpop.eup %6401 }
 0xb23   : > { %v3056_v5 = vadd.f32 1.0, %v6402_v1 }
 0xb25   : > { %v3059_v6 = vmul.f32 %v3056_v5, %v3035_v4 }
 0xb27   : > { %5606 = vmatmul.mubr.f32.gmra.mrb[32].mxu1 %v3059_v6 }
 0xb28   : > { %5661 = vmatprep.mubr.msk.f32.mxu1 %vm6510_vm0, %v6511_v11 }
 0xbcf   : > { %v3142_v7 = vpop.f32.mrb[28].mxu1 }
 0xbd0   : > { %v3156_v12 = vadd.f32 %v3142_v7, %v7841_v10  ;;  %v5601_v13 = vpop.f32.mrb[29].mxu1 }
 0xbd2   : > { %v7959_v14 = vadd.f32 %v4413_v8, %v3156_v12 }
 0xbd3   : > { %v3147_v16 = vpop.f32.mrb[30].mxu1 }
 0xbd4   : > { %v3157_v18 = vadd.f32 %v3147_v16, %v7846_v17  ;;  %v5604_v19 = vpop.f32.mrb[31].mxu1  ;;  %v3173_v15 = vsel %vm2115_vm8, %v7959_v14, 0.0 }
 0xbd5   : > { %3174 = vadd.xlane.f32.xlu0 %v3173_v15 }
 0xbd6   : > { %v7964_v20 = vadd.f32 %v4413_v8, %v3157_v18 }
 0xbd8   : > { %v3176_v0 = vsel %vm2115_vm8, %v7964_v20, 0.0 }
 0xbd9   : > { %3177 = vadd.xlane.f32.xlu1 %v3176_v0 }
 0xbfa   : > { %v3152_v22 = vpop.f32.mrb[32].mxu1 }
 0xbfb   : > { %v3158_v10 = vadd.f32 %v3152_v22, %v7851_v21  ;;  %v5607_v23 = vpop.f32.mrb[33].mxu1 }
 0xbfd   : > { %v7969_v24 = vadd.f32 %v4413_v8, %v3158_v10  ;;  %v4423_v8 = vld [vmem:[%s8320_s6 + $0x1] ss:$0 sm:$0xff] }
 0xbff   : > { %v3179_v17 = vsel %vm2122_vm10, %v7969_v24, 0.0 }
 0xc00   : > { %3180 = vadd.xlane.f32.xlu0 %v3179_v17 }
 0xc62   : > { %v3175_v56 = vpop.xlane.xlu0 %3174 }
 0xc63   : > { %v3182_v58 = vmul.f32 0.03125, %v3175_v56 }
 0xc65   : > { %v3185_v25 = vsub.f32 %v7959_v14, %v3182_v58 }
 0xc66   : > { %v3178_v26 = vpop.xlane.xlu1 %3177 }
 0xc67   : > { %v3183_v27 = vmul.f32 0.03125, %v3178_v26  ;;  %v3188_v60 = vmul.f32 %v3185_v25, %v3185_v25 }
 0xc69   : > { %v3186_v28 = vsub.f32 %v7964_v20, %v3183_v27  ;;  %v3191_v29 = vsel %vm2115_vm8, %v3188_v60, 0.0 }
 0xc6a   : > { %3192 = vadd.xlane.f32.xlu1 %v3191_v29 }
 0xc6b   : > { %v3189_v21 = vmul.f32 %v3186_v28, %v3186_v28 }
 0xc6d   : > { %v3194_v30 = vsel %vm2115_vm8, %v3189_v21, 0.0 }
 0xc6e   : > { %3195 = vadd.xlane.f32.xlu0 %v3194_v30 }
 0xc8d   : > { %v3181_v9 = vpop.xlane.xlu0 %3180 }
 0xc8e   : > { %v3184_v37 = vmul.f32 0.03125, %v3181_v9 }
 0xc90   : > { %v3187_v38 = vsub.f32 %v7969_v24, %v3184_v37 }
 0xc92   : > { %v3190_v39 = vmul.f32 %v3187_v38, %v3187_v38 }
 0xc94   : > { %v3197_v40 = vsel %vm2122_vm10, %v3190_v39, 0.0 }
 0xc95   : > { %3198 = vadd.xlane.f32.xlu1 %v3197_v40 }
 0xcf7   : > { %v3193_v41 = vpop.xlane.xlu1 %3192 }
 0xcf8   : > { %v3200_v42 = vmul.f32 0.03125, %v3193_v41 }
 0xcfa   : > { %v3203_v43 = vadd.f32 1e-05, %v3200_v42 }
 0xcfb   : > { %v3196_v44 = vpop.xlane.xlu0 %3195 }
 0xcfc   : > { %6403 = vrsqrt.f32 %v3203_v43  ;;  %v3201_v45 = vmul.f32 0.03125, %v3196_v44 }
 0xcfe   : > { %v3204_v46 = vadd.f32 1e-05, %v3201_v45 }
 0xd00   : > { %6405 = vrsqrt.f32 %v3204_v46 }
 0xd06   : > { %v6404_v47 = vpop.eup %6403 }
 0xd07   : > { %v3209_v49 = vmul.f32 %v6404_v47, %v3185_v25 }
 0xd09   : > { %v3218_v51 = vmul.f32 %v4416_v48, %v3209_v49 }
 0xd0a   : > { %v6406_v52 = vpop.eup %6405 }
 0xd0b   : > { %v3227_v53 = vadd.f32 %v4417_v50, %v3218_v51  ;;  %v3210_v54 = vmul.f32 %v6406_v52, %v3186_v28 }
 0xd0d   : > { %5617 = vmatmul.mubr.msk.f32.vlgmr.msra.gmra.mrb[46].mxu0 %vm2115_vm8, %v3227_v53  ;;  %v3219_v55 = vmul.f32 %v4416_v48, %v3210_v54 }
 0xd0e   : > { %5619 = vmatprep.mubr.msk.f32.mxu0 %vm6510_vm0, %v6511_v11 }
 0xd0f   : > { %v3228_v57 = vadd.f32 %v4417_v50, %v3219_v55 }
 0xd11   : > { %5620 = vmatmul.mubr.msk.f32.gmra.mrb[48].mxu0 %vm2115_vm8, %v3228_v57 }
 0xd12   : > { %5622 = vmatprep.mubr.msk.f32.mxu0 %vm6510_vm0, %v6511_v11 }
 0xd22   : > { %v3199_v59 = vpop.xlane.xlu1 %3198 }
 0xd23   : > { %v3202_v61 = vmul.f32 0.03125, %v3199_v59 }
 0xd25   : > { %v3205_v62 = vadd.f32 1e-05, %v3202_v61 }
 0xd27   : > { %6407 = vrsqrt.f32 %v3205_v62 }
 0xd31   : > { %v6408_v63 = vpop.eup %6407 }
 0xd32   : > { %v3211_v1 = vmul.f32 %v6408_v63, %v3187_v38 }
 0xd34   : > { %v3220_v4 = vmul.f32 %v4416_v48, %v3211_v1 }
 0xd36   : > { %v3229_v5 = vadd.f32 %v4417_v50, %v3220_v4 }
 0xd38   : > { %5623 = vmatmul.mubr.msk.f32.gmra.mrb[50].mxu0 %vm2115_vm8, %v3229_v5 }
 0xd39   : > { %5631 = vmatprep.mubr.msk.f32.mxu0 %vm6510_vm0, %v6511_v11 }
 0xde0   : > { %v3318_v6 = vpop.f32.mrb[46].mxu0 }
 0xde1   : > { %v5618_v7 = vpop.f32.mrb[47].mxu0  ;;  %v3319_v13 = vadd.f32 %v4423_v8, %v3318_v6 }
 0xde4   : > { %v3323_v12 = vpop.f32.mrb[48].mxu0 }
 0xde5   : > { %v3324_v16 = vadd.f32 %v4423_v8, %v3323_v12  ;;  %v5621_v18 = vpop.f32.mrb[49].mxu0 }
 0xde7   : > { %v8011_v19 = vpack.i.bf16 %v3324_v16, %v3319_v13 }
 0xde9   : > { %6342 = vrot.lane.b32.xlu0 %v8011_v19, %s6512_s26 }
 0xded   : > { %3568 = vrot.lane.b32.xlu0 %v3319_v13, %s6513_s27 }
 0xe0b   : > { %v3328_v15 = vpop.f32.mrb[50].mxu0 }
 0xe0c   : > { %v8016_v0 = vadd.f32 %v4423_v8, %v3328_v15  ;;  %v5624_v22 = vpop.f32.mrb[51].mxu0 }
 0xe0e   : > { %3572 = vrot.lane.b32.xlu0 %v8016_v0, %s6513_s27  ;;  %3339 = vrot.lane.b32.xlu1 %v8016_v0, %s6512_s26  ;;  %s8373_s26 = smov 64  }
 0xe12   : > { %6347 = vrot.lane.b32.xlu1 %v8011_v19, %s8372_s21 }
 0xe16   : > { %3578 = vrot.lane.b32.xlu1 %v8016_v0, %s8372_s21  ;;  %s8375_s21 = smov 16  }
 0xe1a   : > { %3570 = vrot.lane.b32.xlu1 %v3324_v16, %s6513_s27  ;;  %s8374_s27 = smov 48  }
 0xe5b   : > { %v6343_v10 = vpop.permute.xlu0 %6342 }
 0xe5c   : > { %v6345_v23 = vunpack.i.h.bf16 %v6343_v10  ;;  %v6344_v17 = vunpack.i.l.bf16 %v6343_v10 }
 0xe5e   : > { %v6218_v56 = vpack.c.bf16 %v6345_v23, %v6344_v17 }
 0xe5f   : > { %v3569_v29 = vpop.permute.xlu0 %3568 }
 0xe60   : > { %6220 = vmatpush3.bf16.xpose.msk.msra.mxu0 %vm7727_vm12, %v6218_v56 }
 0xe61   : > { %5629 = vmatprep.subr.mxu0 %v6511_v11 }
 0xe80   : > { %v3340_v58 = vpop.permute.xlu1 %3339  ;;  %v3573_v21 = vpop.permute.xlu0 %3572 }
 0xe81   : > { %5630 = vmatpush3.xpose.msk.msra.mxu0 %vm2284_vm11, %v3340_v58 }
 0xe82   : > { %6221 = vmatprep.subr.bf16.mxu0 %v6509_v3 }
 0xe84   : > { %5632 = vmatmul.mubr.msk.f32.vlgmr.msra.gmra.mrb[52].mxu0 %vm2284_vm11, %v3319_v13  ;;  %v6348_v25 = vpop.permute.xlu1 %6347 }
 0xe85   : > { %v6350_v26 = vunpack.i.h.bf16 %v6348_v25  ;;  %v6349_v27 = vunpack.i.l.bf16 %v6348_v25  ;;  %5634 = vmatprep.mubr.msk.f32.mxu0 %vm6510_vm0, %v6511_v11 }
 0xe87   : > { %v6225_v60 = vpack.c.bf16 %v6350_v26, %v6349_v27 }
 0xe88   : > { %5635 = vmatmul.mubr.msk.f32.gmra.mrb[54].mxu0 %vm2284_vm11, %v3324_v16  ;;  %v3579_v28 = vpop.permute.xlu1 %3578 }
 0xe89   : > { %6227 = vmatpush3.bf16.xpose.msk.msra.mxu1 %vm7727_vm12, %v6225_v60  ;;  %5637 = vmatprep.mubr.msk.f32.mxu0 %vm6510_vm0, %v6511_v11 }
 0xe8a   : > { %5659 = vmatprep.subr.mxu1 %v6511_v11 }
 0xe8c   : > { %5638 = vmatmul.mubr.msk.f32.gmra.mrb[56].mxu0 %vm2284_vm11, %v8016_v0  ;;  %v3571_v2 = vpop.permute.xlu1 %3570 }
 0xe8d   : > { %5646 = vmatprep.mubr.msk.f32.mxu0 %vm6510_vm0, %v6511_v11 }
 0xe91   : > { %5660 = vmatpush3.xpose.msk.msra.mxu1 %vm2284_vm11, %v3579_v28 }
 0xe92   : > { %6231 = vmatprep.subr.bf16.mxu1 %v6509_v3 }
 0xe94   : > { %5662 = vmatmul.mubr.msk.f32.vlgmr.msra.gmra.mrb[34].mxu1 %vm2284_vm11, %v3569_v29 }
 0xe95   : > { %5664 = vmatprep.mubr.msk.f32.mxu1 %vm6510_vm0, %v6511_v11 }
 0xe98   : > { %5665 = vmatmul.mubr.msk.f32.gmra.mrb[36].mxu1 %vm2284_vm11, %v3571_v2 }
 0xe99   : > { %5667 = vmatprep.mubr.msk.f32.mxu1 %vm6510_vm0, %v6511_v11 }
 0xe9c   : > { %5668 = vmatmul.mubr.msk.f32.gmra.mrb[38].mxu1 %vm2284_vm11, %v3573_v21 }
 0xe9d   : > { %5693 = vmatprep.mubr.msk.f32.mxu1 %vm6510_vm0, %v6511_v11 }
 0xf57   : > { %v3419_v30 = vpop.f32.mrb[52].mxu0 }
 0xf58   : > { %v3433_v31 = vmul.f32 0.25, %v3419_v30  ;;  %v5633_v32 = vpop.f32.mrb[53].mxu0 }
 0xf5a   : > { %v3436_v33 = vsel %vm2380_vm13, %v3433_v31, -inf }
 0xf5b   : > { %3437 = vmax.xlane.f32.xlu1 %v3436_v33  ;;  %v3424_v34 = vpop.f32.mrb[54].mxu0 }
 0xf5c   : > { %v3434_v35 = vmul.f32 0.25, %v3424_v34  ;;  %v5636_v36 = vpop.f32.mrb[55].mxu0 }
 0xf5e   : > { %v3439_v9 = vsel %vm2380_vm13, %v3434_v35, -inf }
 0xf5f   : > { %3440 = vmax.xlane.f32.xlu0 %v3439_v9  ;;  %v3429_v37 = vpop.f32.mrb[56].mxu0 }
 0xf60   : > { %v3435_v38 = vmul.f32 0.25, %v3429_v37  ;;  %v5639_v39 = vpop.f32.mrb[57].mxu0 }
 0xf62   : > { %v3442_v40 = vsel %vm2387_vm14, %v3435_v38, -inf }
 0xf63   : > { %3443 = vmax.xlane.f32.xlu0 %v3442_v40 }
 0xf67   : > { %v3658_v41 = vpop.f32.mrb[34].mxu1 }
 0xf68   : > { %v3672_v42 = vmul.f32 0.25, %v3658_v41  ;;  %v5663_v43 = vpop.f32.mrb[35].mxu1 }
 0xf6a   : > { %v3675_v44 = vsel %vm2380_vm13, %v3672_v42, -inf }
 0xf6b   : > { %v3663_v45 = vpop.f32.mrb[36].mxu1  ;;  %3676 = vmax.xlane.f32.xlu0 %v3675_v44 }
 0xf6c   : > { %v5666_v46 = vpop.f32.mrb[37].mxu1  ;;  %6352 = vrot.lane.b32.xlu1 %v8011_v19, %s8373_s26 }
 0xf6d   : > { %v4447_v46 = vld [vmem:[%s8321_s7 + $0x20] sm:$0xff] }
 0xf6f   : > { %v3668_v47 = vpop.f32.mrb[38].mxu1 }
 0xf70   : > { %v5669_v48 = vpop.f32.mrb[39].mxu1  ;;  %v3674_v10 = vmul.f32 0.25, %v3668_v47  ;;  %v4448_v47 = vld [vmem:[%s8321_s7 + $0x28] sm:$0xff] }
 0xf71   : > { %v4449_v48 = vld [vmem:[%s8321_s7 + $0x30] sm:$0xff] }
 0xf72   : > { %v3681_v23 = vsel %vm2387_vm14, %v3674_v10, -inf }
 0xfe8   : > { %v3438_v49 = vpop.xlane.xlu1 %3437 }
 0xfe9   : > { %v3445_v50 = vsub.f32 %v3433_v31, %v3438_v49  ;;  %v6232_v49 = vpack.c.bf16 %v4448_v47, %v4447_v46 }
 0xfeb   : > { %v3448_v51 = vmul.f32 1.442695, %v3445_v50  ;;  %v4450_v50 = vld [vmem:[%s8321_s7 + $0x38] sm:$0xff]  ;;  %6233 = vmatpush3.bf16.msra.mxu1 %v6232_v49 }
 0xfec   : > { %v6353_v52 = vpop.permute.xlu1 %6352  ;;  %v3441_v55 = vpop.xlane.xlu0 %3440  ;;  %6234 = vmatprep.subr.bf16.mxu1 %v6509_v3 }
 0xfed   : > { %6409 = vpow2.f32 %v3448_v51  ;;  %v6355_v53 = vunpack.i.h.bf16 %v6353_v52  ;;  %v6354_v54 = vunpack.i.l.bf16 %v6353_v52  ;;  %v3446_v62 = vsub.f32 %v3434_v35, %v3441_v55 }
 0xfee   : > { %v6235_v51 = vpack.c.bf16 %v4450_v50, %v4449_v48 }
 0xfef   : > { %v6222_v57 = vpack.c.bf16 %v6355_v53, %v6354_v54  ;;  %v3450_v5 = vmul.f32 1.442695, %v3446_v62 }
 0xff0   : > { %v3444_v59 = vpop.xlane.xlu0 %3443  ;;  %6236 = vmatpush3.bf16.msra.mxu1 %v6235_v51 }
 0xff1   : > { %6223 = vmatpush3.bf16.msra.mxu0 %v6222_v57  ;;  %v3447_v16 = vsub.f32 %v3435_v38, %v3444_v59  ;;  %6243 = vmatprep.subr.bf16.mxu1 %v6509_v3 }
 0xff2   : > { %5644 = vmatprep.subr.mxu0 %v6511_v11 }
 0xff3   : > { %v3452_v18 = vmul.f32 1.442695, %v3447_v16 }
 0xff7   : > { %v6410_v61 = vpop.eup %6409 }
 0xff8   : > { %v3677_v63 = vpop.xlane.xlu0 %3676  ;;  %v3454_v1 = vsel %vm2380_vm13, %v6410_v61, 0.0 }
 0xff9   : > { %v3684_v4 = vsub.f32 %v3672_v42, %v3677_v63  ;;  %3455 = vadd.xlane.f32.xlu1 %v3454_v1 }
 0xffb   : > { %v3687_v6 = vmul.f32 1.442695, %v3684_v4 }
 0xffd   : > { %6411 = vpow2.f32 %v3687_v6 }
 0xffe   : > { %6413 = vpow2.f32 %v3450_v5 }
 0xfff   : > { %6415 = vpow2.f32 %v3452_v18 }
0x1007   : > { %v6412_v7 = vpop.eup %6411 }
0x1008   : > { %v3693_v8 = vsel %vm2380_vm13, %v6412_v7, 0.0  ;;  %v6414_v12 = vpop.eup %6413 }
0x1009   : > { %3694 = vadd.xlane.f32.xlu0 %v3693_v8  ;;  %v3457_v13 = vsel %vm2380_vm13, %v6414_v12, 0.0  ;;  %v6416_v15 = vpop.eup %6415 }
0x100a   : > { %6357 = vrot.lane.b32.xlu1 %v8011_v19, %s8374_s27  ;;  %v3460_v22 = vsel %vm2387_vm14, %v6416_v15, 0.0  ;;  %v3673_v19 = vmul.f32 0.25, %v3663_v45 }
0x100c   : > { %v3678_v17 = vsel %vm2380_vm13, %v3673_v19, -inf }
0x100d   : > { %3458 = vadd.xlane.f32.xlu0 %v3457_v13 }
0x1023   : > { %3473 = vrot.lane.b32.xlu0 %v8016_v0, %s8373_s26  ;;  %s8376_s26 = sld [smem:[#allocation16_spill]] }
0x102e   : > { %3461 = vadd.xlane.f32.xlu1 %v3460_v22 }
0x103f   : > { %3712 = vrot.lane.b32.xlu1 %v8016_v0, %s8374_s27  ;;  %s8272_s27 = scalar_lea.hbm %s8376_s26, %s4488_s28 }
0x1042   : > { %3682 = vmax.xlane.f32.xlu0 %v3681_v23 }
0x1063   : > { %3679 = vmax.xlane.f32.xlu1 %v3678_v17 }
0x1086   : > { %v3456_v56 = vpop.xlane.xlu1 %3455 }
0x1087   : > { %6417 = vrcp.f32 %v3456_v56  ;;  %v4455_v56 = vld [vmem:[%s8322_s8 + $0x1] ss:$0 sm:$0xff] }
0x108a   : > { %v6358_v25 = vpop.permute.xlu1 %6357 }
0x108b   : > { %v6360_v60 = vunpack.i.h.bf16 %v6358_v25  ;;  %v6359_v28 = vunpack.i.l.bf16 %v6358_v25 }
0x108d   : > { %v6229_v21 = vpack.c.bf16 %v6360_v60, %v6359_v28 }
0x1091   : > { %v6418_v27 = vpop.eup %6417 }
0x1092   : > { %v3466_v29 = vmul.f32 %v6418_v27, %v6410_v61 }
0x1096   : > { %v3695_v58 = vpop.xlane.xlu0 %3694 }
0x109a   : > { %v3459_v26 = vpop.xlane.xlu0 %3458 }
0x109b   : > { %6419 = vrcp.f32 %v3459_v26 }
0x109e   : > { %v3474_v2 = vpop.permute.xlu0 %3473 }
0x109f   : > { %5645 = vmatpush3.msk.msra.mxu0 %vm2111_vm7, %v3474_v2 }
0x10a0   : > { %5647 = vmatmul.mubr.msk.f32.vlgmr.msra.gmra.mrb[58].mxu0 %vm2380_vm13, %v3466_v29  ;;  %6228 = vmatprep.subr.bf16.mxu0 %v6509_v3 }
0x10a1   : > { %6230 = vmatpush3.bf16.msra.mxu0 %v6229_v21  ;;  %5649 = vmatprep.mubr.msk.f32.mxu0 %vm6510_vm0, %v6511_v11 }
0x10a2   : > { %5674 = vmatprep.subr.mxu0 %v6511_v11 }
0x10a5   : > { %v6420_v0 = vpop.eup %6419 }
0x10a6   : > { %v3467_v30 = vmul.f32 %v6420_v0, %v6414_v12  ;;  %v4461_v0 = vld [vmem:[%s8327_s13 + $0x28] sm:$0xff] }
0x10a8   : > { %5650 = vmatmul.mubr.msk.f32.gmra.mrb[60].mxu0 %vm2380_vm13, %v3467_v30 }
0x10a9   : > { %5652 = vmatprep.mubr.msk.f32.mxu0 %vm6510_vm0, %v6511_v11 }
0x10bb   : > { %v3462_v31 = vpop.xlane.xlu1 %3461 }
0x10bc   : > { %6421 = vrcp.f32 %v3462_v31  ;;  %v4462_v31 = vld [vmem:[%s8327_s13 + $0x30] sm:$0xff] }
0x10bd   : > { %6423 = vrcp.f32 %v3695_v58 }
0x10bf   : > { %v3713_v32 = vpop.permute.xlu1 %3712 }
0x10c0   : > { %5675 = vmatpush3.msk.msra.mxu0 %vm2111_vm7, %v3713_v32  ;;  %v4463_v32 = vld [vmem:[%s8327_s13 + $0x38] sm:$0xff] }
0x10c1   : > { %6237 = vmatprep.subr.bf16.mxu0 %v6509_v3 }
0x10c6   : > { %v6422_v33 = vpop.eup %6421 }
0x10c7   : > { %v3468_v34 = vmul.f32 %v6422_v33, %v6416_v15  ;;  %v6424_v35 = vpop.eup %6423  ;;  %v6241_v33 = vpack.c.bf16 %v4463_v32, %v4462_v31 }
0x10c8   : > { %v3705_v36 = vmul.f32 %v6424_v35, %v6412_v7 }
0x10c9   : > { %5653 = vmatmul.mubr.msk.f32.gmra.mrb[62].mxu0 %vm2380_vm13, %v3468_v34 }
0x10ca   : > { %5676 = vmatprep.mubr.msk.f32.mxu0 %vm6510_vm0, %v6511_v11 }
0x10cd   : > { %5677 = vmatmul.mubr.msk.f32.vlgmr.msra.gmra.mrb[64].mxu0 %vm2380_vm13, %v3705_v36 }
0x10ce   : > { %5679 = vmatprep.mubr.msk.f32.mxu0 %vm6510_vm0, %v6511_v11 }
0x10cf   : > { %v3683_v9 = vpop.xlane.xlu0 %3682 }
0x10d0   : > { %v3686_v37 = vsub.f32 %v3674_v10, %v3683_v9 }
0x10d2   : > { %v3691_v40 = vmul.f32 1.442695, %v3686_v37 }
0x10f0   : > { %v3680_v38 = vpop.xlane.xlu1 %3679 }
0x10f1   : > { %v3685_v39 = vsub.f32 %v3673_v19, %v3680_v38 }
0x10f3   : > { %v3689_v41 = vmul.f32 1.442695, %v3685_v39 }
0x10f5   : > { %6425 = vpow2.f32 %v3689_v41 }
0x10f6   : > { %6427 = vpow2.f32 %v3691_v40 }
0x10ff   : > { %v6426_v42 = vpop.eup %6425 }
0x1100   : > { %v3696_v43 = vsel %vm2380_vm13, %v6426_v42, 0.0  ;;  %v6428_v44 = vpop.eup %6427 }
0x1101   : > { %3697 = vadd.xlane.f32.xlu0 %v3696_v43  ;;  %v3699_v45 = vsel %vm2387_vm14, %v6428_v44, 0.0 }
0x1105   : > { %3700 = vadd.xlane.f32.xlu0 %v3699_v45 }
0x1173   : > { %v3554_v52 = vpop.f32.mrb[58].mxu0 }
0x1174   : > { %v5648_v53 = vpop.f32.mrb[59].mxu0 }
0x117b   : > { %v3559_v54 = vpop.f32.mrb[60].mxu0 }
0x117c   : > { %v5651_v55 = vpop.f32.mrb[61].mxu0 }
0x118e   : > { %v3698_v57 = vpop.xlane.xlu0 %3697 }
0x118f   : > { %6429 = vrcp.f32 %v3698_v57 }
0x1192   : > { %v3701_v59 = vpop.xlane.xlu0 %3700 }
0x1193   : > { %6431 = vrcp.f32 %v3701_v59 }
0x1199   : > { %v6430_v61 = vpop.eup %6429 }
0x119a   : > { %v3706_v62 = vmul.f32 %v6430_v61, %v6426_v42 }
0x119c   : > { %v3564_v63 = vpop.f32.mrb[62].mxu0  ;;  %5680 = vmatmul.mubr.msk.f32.gmra.mrb[66].mxu0 %vm2380_vm13, %v3706_v62 }
0x119d   : > { %v6432_v1 = vpop.eup %6431  ;;  %v5654_v4 = vpop.f32.mrb[63].mxu0  ;;  %5682 = vmatprep.mubr.msk.f32.mxu0 %vm6510_vm0, %v6511_v11 }
0x119e   : > { %v3707_v5 = vmul.f32 %v6432_v1, %v6428_v44  ;;  %v4470_v1 = vld [vmem:[%s8329_s15 + $0x88] sm:$0xff] }
0x11a0   : > { %v3793_v6 = vpop.f32.mrb[64].mxu0  ;;  %5683 = vmatmul.mubr.msk.f32.gmra.mrb[68].mxu0 %vm2380_vm13, %v3707_v5  ;;  %v4471_v5 = vld [vmem:[%s8329_s15 + $0x90] sm:$0xff] }
0x11a1   : > { %3810 = vrot.lane.b32.xlu1 %v3793_v6, %s8375_s21  ;;  %v5678_v7 = vpop.f32.mrb[65].mxu0  ;;  %5710 = vmatprep.mubr.msk.f32.mxu0 %vm6510_vm0, %v6511_v11  ;;  %v4472_v6 = vld [vmem:[%s8329_s15 + $0x98] sm:$0xff] }
0x11a2   : > { %v6247_v7 = vpack.c.bf16 %v4472_v6, %v4471_v5 }
0x1213   : > { %v3811_v8 = vpop.permute.xlu1 %3810 }
0x1214   : > { %v3819_v12 = vsel %vm2284_vm11, %v3554_v52, %v3811_v8  ;;  %v4473_v8 = vld [vmem:[%s8329_s15 + $0xa0] sm:$0xff] }
0x1215   : > { %5694 = vmatmul.mubr.msk.f32.vlgmr.msra.gmra.mrb[40].mxu1 %vm2115_vm8, %v3819_v12  ;;  %v4474_v12 = vld [vmem:[%s8329_s15 + $0xa8] sm:$0xff] }
0x1216   : > { %5696 = vmatprep.mubr.msk.f32.mxu1 %vm6510_vm0, %v6511_v11 }
0x126f   : > { %v3798_v13 = vpop.f32.mrb[66].mxu0 }
0x1270   : > { %3812 = vrot.lane.b32.xlu0 %v3798_v13, %s8375_s21  ;;  %v5681_v16 = vpop.f32.mrb[67].mxu0  ;;  %v6250_v13 = vpack.c.bf16 %v4474_v12, %v4473_v8 }
0x1271   : > { %v4475_v16 = vld [vmem:[%s8329_s15 + $0xb0] sm:$0xff] }
0x1273   : > { %v3803_v18 = vpop.f32.mrb[68].mxu0 }
0x1274   : > { %3814 = vrot.lane.b32.xlu1 %v3803_v18, %s8375_s21  ;;  %v5684_v15 = vpop.f32.mrb[69].mxu0  ;;  %v4476_v18 = vld [vmem:[%s8329_s15 + $0xb8] sm:$0xff] }
0x1275   : > { %v6253_v15 = vpack.c.bf16 %v4476_v18, %v4475_v16 }
0x12e2   : > { %v3813_v22 = vpop.permute.xlu0 %3812 }
0x12e3   : > { %v3820_v10 = vsel %vm2284_vm11, %v3559_v54, %v3813_v22  ;;  %v4477_v22 = vld [vmem:[%s8329_s15 + $0xc0] sm:$0xff] }
0x12e4   : > { %5697 = vmatmul.mubr.msk.f32.gmra.mrb[42].mxu1 %vm2115_vm8, %v3820_v10  ;;  %v4478_v10 = vld [vmem:[%s8329_s15 + $0xc8] sm:$0xff] }
0x12e5   : > { %5699 = vmatprep.mubr.msk.f32.mxu1 %vm6510_vm0, %v6511_v11 }
0x12e6   : > { %v3815_v23 = vpop.permute.xlu1 %3814 }
0x12e7   : > { %v3821_v19 = vsel %vm2284_vm11, %v3564_v63, %v3815_v23  ;;  %v4469_v63 = vld [vmem:[%s8329_s15 + $0x80] sm:$0xff]  ;;  %v6256_v23 = vpack.c.bf16 %v4478_v10, %v4477_v22 }
0x12e8   : > { %v3902_v17 = vpop.f32.mrb[40].mxu1  ;;  %5700 = vmatmul.mubr.msk.f32.gmra.mrb[44].mxu1 %vm2115_vm8, %v3821_v19  ;;  %v6244_v4 = vpack.c.bf16 %v4470_v1, %v4469_v63  ;;  %v4479_v19 = vld [vmem:[%s8329_s15 + $0xd0] sm:$0xff] }
0x12e9   : > { %v3916_v58 = vadd.f32 %v3902_v17, %v7959_v14  ;;  %v5695_v25 = vpop.f32.mrb[41].mxu1  ;;  %5751 = vmatprep.mubr.msk.f32.mxu1 %vm6510_vm0, %v6511_v11  ;;  %v4460_v14 = vld [vmem:[%s8327_s13 + $0x20] sm:$0xff]  ;;  %v4480_v17 = vld [vmem:[%s8329_s15 + $0xd8] sm:$0xff] }
0x12ea   : > { %v6238_v30 = vpack.c.bf16 %v4461_v0, %v4460_v14  ;;  %6245 = vmatpush3.bf16.msra.mxu1 %v6244_v4  ;;  %v4482_v25 = vld [vmem:[%s8329_s15 + $0xe8] sm:$0xff] }
0x12eb   : > { %v8133_v26 = vadd.f32 %v4455_v56, %v3916_v58  ;;  %6246 = vmatprep.subr.bf16.mxu1 %v6509_v3  ;;  %v4481_v58 = vld [vmem:[%s8329_s15 + $0xe0] sm:$0xff] }
0x12ec   : > { %6239 = vmatpush3.bf16.msra.mxu0 %v6238_v30 }
0x12ed   : > { %v3934_v27 = vsel %vm2115_vm8, %v8133_v26, 0.0  ;;  %6240 = vmatprep.subr.bf16.mxu0 %v6509_v3 }
0x12ee   : > { %3935 = vadd.xlane.f32.xlu1 %v3934_v27  ;;  %6248 = vmatpush3.bf16.msra.mxu1 %v6247_v7  ;;  %v6262_v27 = vpack.c.bf16 %v4482_v25, %v4481_v58 }
0x12ef   : > { %6249 = vmatprep.subr.bf16.mxu1 %v6509_v3 }
0x12f0   : > { %6242 = vmatpush3.bf16.msra.mxu0 %v6241_v33 }
0x12f2   : > { %6251 = vmatpush3.bf16.msra.mxu1 %v6250_v13 }
0x12f3   : > { %6252 = vmatprep.subr.bf16.mxu1 %v6509_v3 }
0x12f6   : > { %6254 = vmatpush3.bf16.msra.mxu1 %v6253_v15 }
0x12f7   : > { %6255 = vmatprep.subr.bf16.mxu1 %v6509_v3 }
0x12fa   : > { %6257 = vmatpush3.bf16.msra.mxu1 %v6256_v23 }
0x12fb   : > { %6258 = vmatprep.subr.bf16.mxu1 %v6509_v3 }
0x137b   : > { %v3936_v60 = vpop.xlane.xlu1 %3935 }
0x137c   : > { %v3943_v28 = vmul.f32 0.03125, %v3936_v60  ;;  %v4483_v60 = vld [vmem:[%s8329_s15 + $0xf0] sm:$0xff] }
0x137e   : > { %v3946_v29 = vsub.f32 %v8133_v26, %v3943_v28  ;;  %v4484_v28 = vld [vmem:[%s8329_s15 + $0xf8] sm:$0xff] }
0x1380   : > { %v3949_v2 = vmul.f32 %v3946_v29, %v3946_v29 }
0x1382   : > { %v3952_v21 = vsel %vm2115_vm8, %v3949_v2, 0.0 }
0x1383   : > { %3953 = vadd.xlane.f32.xlu0 %v3952_v21 }
0x13b7   : > { %v3907_v34 = vpop.f32.mrb[42].mxu1 }
0x13b8   : > { %v3917_v35 = vadd.f32 %v3907_v34, %v7964_v20  ;;  %v5698_v36 = vpop.f32.mrb[43].mxu1  ;;  %v8159_v20 = vld [vmem:[%s8325_s11 + $0x1] ss:$0 sm:$0xff] }
0x13ba   : > { %v3928_v9 = vadd.f32 %v4455_v56, %v3917_v35 }
0x13bb   : > { %v3912_v37 = vpop.f32.mrb[44].mxu1 }
0x13bc   : > { %v3918_v38 = vadd.f32 %v3912_v37, %v7969_v24  ;;  %v5701_v39 = vpop.f32.mrb[45].mxu1  ;;  %v3937_v40 = vsel %vm2115_vm8, %v3928_v9, 0.0  ;;  %v8164_v24 = vld [vmem:[%s8326_s12 + $0x1] ss:$0 sm:$0xff] }
0x13bd   : > { %3938 = vadd.xlane.f32.xlu0 %v3937_v40 }
0x13be   : > { %v3929_v41 = vadd.f32 %v4455_v56, %v3918_v38  ;;  %v6259_v56 = vpack.c.bf16 %v4480_v17, %v4479_v19  ;;  %v4465_v38 = vld [vmem:[%s8328_s14 + $0x1] ss:$0 sm:$0xff] }
0x13c0   : > { %v3940_v42 = vsel %vm2122_vm10, %v3929_v41, 0.0  ;;  %6260 = vmatpush3.bf16.msra.mxu1 %v6259_v56 }
0x13c1   : > { %3941 = vadd.xlane.f32.xlu1 %v3940_v42  ;;  %6261 = vmatprep.subr.bf16.mxu1 %v6509_v3 }
0x13c4   : > { %6263 = vmatpush3.bf16.msra.mxu1 %v6262_v27  ;;  %v4486_v27 = vld [vmem:[%s8330_s16 + $0x1] ss:$0 sm:$0xff] }
0x13c5   : > { %6264 = vmatprep.subr.bf16.mxu1 %v6509_v3 }
0x1410   : > { %v3954_v43 = vpop.xlane.xlu0 %3953 }
0x1411   : > { %v3961_v44 = vmul.f32 0.03125, %v3954_v43 }
0x1413   : > { %v3964_v45 = vadd.f32 1e-05, %v3961_v44 }
0x1415   : > { %6433 = vrsqrt.f32 %v3964_v45 }
0x141f   : > { %v6434_v46 = vpop.eup %6433 }
0x1420   : > { %v3970_v47 = vmul.f32 %v6434_v46, %v3946_v29  ;;  %v6265_v29 = vpack.c.bf16 %v4484_v28, %v4483_v60 }
0x1422   : > { %v3979_v48 = vmul.f32 %v8159_v20, %v3970_v47  ;;  %6266 = vmatpush3.bf16.msra.mxu1 %v6265_v29 }
0x1423   : > { %6267 = vmatprep.subr.bf16.mxu1 %v6509_v3 }
0x1424   : > { %v3988_v49 = vadd.f32 %v8164_v24, %v3979_v48 }
0x1426   : > { %5711 = vmatmul.mubr.msk.f32.vlgmr.msra.gmra.mrb[70].mxu0 %vm2115_vm8, %v3988_v49 }
0x1427   : > { %5713 = vmatprep.mubr.msk.f32.mxu0 %vm6510_vm0, %v6511_v11 }
0x144a   : > { %v3939_v50 = vpop.xlane.xlu0 %3938 }
0x144b   : > { %v3944_v51 = vmul.f32 0.03125, %v3939_v50 }
0x144d   : > { %v3947_v52 = vsub.f32 %v3928_v9, %v3944_v51  ;;  %v4226_v51 = vld [vmem:[%s8331_s17 + $0x8] sm:$0xff] }
0x144e   : > { %v3942_v53 = vpop.xlane.xlu1 %3941 }
0x144f   : > { %v3945_v54 = vmul.f32 0.03125, %v3942_v53  ;;  %v3950_v55 = vmul.f32 %v3947_v52, %v3947_v52  ;;  %v4227_v53 = vld [vmem:[%s8331_s17 + $0x10] sm:$0xff] }
0x1451   : > { %v3948_v57 = vsub.f32 %v3929_v41, %v3945_v54  ;;  %v3955_v59 = vsel %vm2115_vm8, %v3950_v55, 0.0  ;;  %v4228_v54 = vld [vmem:[%s8331_s17 + $0x18] sm:$0xff] }
0x1452   : > { %3956 = vadd.xlane.f32.xlu0 %v3955_v59  ;;  %v6271_v55 = vpack.c.bf16 %v4228_v54, %v4227_v53 }
0x1453   : > { %v3951_v61 = vmul.f32 %v3948_v57, %v3948_v57 }
0x1455   : > { %v3958_v62 = vsel %vm2122_vm10, %v3951_v61, 0.0 }
0x1456   : > { %3959 = vadd.xlane.f32.xlu1 %v3958_v62 }
0x14df   : > { %v3957_v2 = vpop.xlane.xlu0 %3956 }
0x14e0   : > { %v3962_v21 = vmul.f32 0.03125, %v3957_v2 }
0x14e2   : > { %v3965_v14 = vadd.f32 1e-05, %v3962_v21 }
0x14e3   : > { %v3960_v0 = vpop.xlane.xlu1 %3959 }
0x14e4   : > { %6435 = vrsqrt.f32 %v3965_v14  ;;  %v3963_v30 = vmul.f32 0.03125, %v3960_v0 }
0x14e6   : > { %v3966_v31 = vadd.f32 1e-05, %v3963_v30  ;;  %v4229_v30 = vld [vmem:[%s8332_s18] sm:$0x1] }
0x14e8   : > { %6437 = vrsqrt.f32 %v3966_v31 }
0x14ee   : > { %v6436_v32 = vpop.eup %6435 }
0x14ef   : > { %v3971_v33 = vmul.f32 %v6436_v32, %v3947_v52 }
0x14f1   : > { %v3980_v34 = vmul.f32 %v8159_v20, %v3971_v33 }
0x14f2   : > { %v6438_v35 = vpop.eup %6437 }
0x14f3   : > { %v3989_v36 = vadd.f32 %v8164_v24, %v3980_v34  ;;  %v3972_v9 = vmul.f32 %v6438_v35, %v3948_v57 }
0x14f5   : > { %5714 = vmatmul.mubr.msk.f32.gmra.mrb[72].mxu0 %vm2115_vm8, %v3989_v36  ;;  %v3981_v37 = vmul.f32 %v8159_v20, %v3972_v9 }
0x14f6   : > { %5716 = vmatprep.mubr.msk.f32.mxu0 %vm6510_vm0, %v6511_v11 }
0x14f7   : > { %v3990_v39 = vadd.f32 %v8164_v24, %v3981_v37  ;;  %v4225_v24 = vld [vmem:[%s8331_s17] sm:$0xff] }
0x14f8   : > { %v6268_v52 = vpack.c.bf16 %v4226_v51, %v4225_v24 }
0x14f9   : > { %v4079_v40 = vpop.f32.mrb[70].mxu0  ;;  %5717 = vmatmul.mubr.msk.f32.gmra.mrb[74].mxu0 %vm2115_vm8, %v3990_v39 }
0x14fa   : > { %v4080_v41 = vadd.f32 %v4465_v38, %v4079_v40  ;;  %v5712_v42 = vpop.f32.mrb[71].mxu0 }
0x14fc   : > { %v4096_v43 = vmul.f32 0.044715, %v4080_v41  ;;  %v4093_v48 = vmul.f32 0.5, %v4080_v41 }
0x14fe   : > { %v4099_v44 = vmul.f32 %v4096_v43, %v4080_v41 }
0x1500   : > { %v4102_v45 = vmul.f32 %v4099_v44, %v4080_v41 }
0x1502   : > { %v4105_v46 = vadd.f32 %v4102_v45, %v4080_v41 }
0x1504   : > { %v4108_v47 = vmul.f32 0.7978846, %v4105_v46 }
0x1506   : > { %6439 = vtanh.f32 %v4108_v47 }
0x1510   : > { %v6440_v20 = vpop.eup %6439 }
0x1511   : > { %v4114_v49 = vadd.f32 1.0, %v6440_v20 }
0x1513   : > { %v4117_v50 = vmul.f32 %v4114_v49, %v4093_v48 }
0x1515   : > { %5752 = vmatmul.mubr.f32.vlgmr.msra.gmra.mrb[46].mxu1 %v4117_v50 }
0x1516   : > { %5754 = vmatprep.mubr.msk.f32.mxu1 %vm6510_vm0, %v6511_v11  ;;  %6269 = vmatpush3.bf16.msra.mxu1 %v6268_v52 }
0x1517   : > { %6270 = vmatprep.subr.bf16.mxu1 %v6509_v3 }
0x151a   : > { %6272 = vmatpush3.bf16.msra.mxu1 %v6271_v55 }
0x15c8   : > { %v4084_v57 = vpop.f32.mrb[72].mxu0 }
0x15c9   : > { %v4085_v59 = vadd.f32 %v4465_v38, %v4084_v57  ;;  %v5715_v61 = vpop.f32.mrb[73].mxu0 }
0x15cb   : > { %v4097_v62 = vmul.f32 0.044715, %v4085_v59  ;;  %v4094_v22 = vmul.f32 0.5, %v4085_v59 }
0x15cc   : > { %v4089_v63 = vpop.f32.mrb[74].mxu0 }
0x15cd   : > { %v4100_v1 = vmul.f32 %v4097_v62, %v4085_v59  ;;  %v4090_v4 = vadd.f32 %v4465_v38, %v4089_v63  ;;  %v5718_v5 = vpop.f32.mrb[75].mxu0 }
0x15cf   : > { %v4098_v6 = vmul.f32 0.044715, %v4090_v4  ;;  %v4103_v3 = vmul.f32 %v4100_v1, %v4085_v59  ;;  %v4095_v17 = vmul.f32 0.5, %v4090_v4 }
0x15d1   : > { %v4101_v7 = vmul.f32 %v4098_v6, %v4090_v4  ;;  %v4106_v8 = vadd.f32 %v4103_v3, %v4085_v59 }
0x15d3   : > { %v4109_v12 = vmul.f32 0.7978846, %v4106_v8  ;;  %v4104_v13 = vmul.f32 %v4101_v7, %v4090_v4 }
0x15d5   : > { %6441 = vtanh.f32 %v4109_v12  ;;  %v4107_v16 = vadd.f32 %v4104_v13, %v4090_v4 }
0x15d7   : > { %v4110_v18 = vmul.f32 0.7978846, %v4107_v16 }
0x15d9   : > { %6443 = vtanh.f32 %v4110_v18 }
0x15df   : > { %v6442_v15 = vpop.eup %6441 }
0x15e0   : > { %v4115_v10 = vadd.f32 1.0, %v6442_v15 }
0x15e2   : > { %v4118_v23 = vmul.f32 %v4115_v10, %v4094_v22 }
0x15e3   : > { %v6444_v19 = vpop.eup %6443 }
0x15e4   : > { %5755 = vmatmul.mubr.f32.gmra.mrb[48].mxu1 %v4118_v23  ;;  %v4116_v56 = vadd.f32 1.0, %v6444_v19 }
0x15e5   : > { %5757 = vmatprep.mubr.msk.f32.mxu1 %vm6510_vm0, %v6511_v11 }
0x15e6   : > { %v4119_v58 = vmul.f32 %v4116_v56, %v4095_v17 }
0x15e8   : > { %v4203_v25 = vpop.f32.mrb[46].mxu1  ;;  %5758 = vmatmul.mubr.f32.gmra.mrb[50].mxu1 %v4119_v58 }
0x15e9   : > { %v4215_v60 = vadd.f32 %v4203_v25, %v8133_v26  ;;  %v5753_v28 = vpop.f32.mrb[47].mxu1  ;;  %5768 = vmatprep.mubr.msk.f32.mxu1 %vm6510_vm0, %v6511_v11 }
0x15eb   : > { %v4224_v29 = vadd.f32 %v4486_v27, %v4215_v60 }
0x15ed   : > { %5769 = vmatmul.mubr.msk.f32.vlgmr.msra.gmra.mrb[52].mxu1 %vm2115_vm8, %v4224_v29 }
0x16b7   : > { %v4208_v2 = vpop.f32.mrb[48].mxu1 }
0x16b8   : > { %v5756_v21 = vpop.f32.mrb[49].mxu1 }
0x16bb   : > { %v4212_v14 = vpop.f32.mrb[50].mxu1 }
0x16bc   : > { %v5759_v0 = vpop.f32.mrb[51].mxu1 }
0x16c0   : > { %v4299_v26 = vpop.f32.mrb[52].mxu1 }
0x16c1   : > { %v4300_v31 = vadd.f32 %v4299_v26, %v4229_v30  ;;  %v5770_v32 = vpop.f32.mrb[53].mxu1 }
0x16c3   : > { %4303 = vst [vmem:[%s592_s20] sm:$0x1] %v4300_v31 }
0x16c4   : > { %6458 = shalt.err (!%p6455_p3)
}
0x16c5   : > { %s6459_s22 = scalar_lea.hbm %s8272_s27, 16  ;;  %s6463_s2 = scalar_lea.hbm %s8376_s26, 32 }
0x16c6   : > { %p6460_p4 = scmp.ne.s32.totalorder %s8272_s27, %s6459_s22  ;;  %p6464_p9 = scmp.lt.u32.totalorder %s8272_s27, %s8376_s26 }
0x16c7   : > { %p6465_p10 = scmp.lt.u32.totalorder %s6463_s2, %s6459_s22  ;;  %p6467_p12 = scmp.lt.u32.totalorder %s6459_s22, %s8272_s27 }
0x16c8   : > { %p6461_p7 = pnand %p6460_p4, %p6657_p5 }
0x16c9   : > { %p6466_p11 = por %p6465_p10, %p6464_p9 }
0x16ca   : > { %p6462_p8 = pneg %p6461_p7 }
0x16cb   : > { %p6468_p13 = por %p6467_p12, %p6466_p11 }
0x16cd   : > { %p6469_p0 = pnand %p6468_p13, %p6462_p8 }
0x16cf   : > { %6472 = shalt.err (!%p6469_p0)
}
0x16d0   : > { %6273 = dma.vmem_to_hbm [thread:$0]  (%p6657_p5), %s8274_s25, 16, %s8272_s27, %s4305_s23  }
0x16d1 PF: > { %s8377_s4 = sld [smem:[#allocation7_spill]]  ;;  %s8378_s0 = sld [smem:[#allocation5_spill]] }
0x16d7   : > { %p6279_p1 = scmp.ge.s32.totalorder %s8377_s4, 2  ;;  %s4329_s28 = sand.u32 1, %s8378_s0  }
0x16d8   : > { %s4330_s20 = scalar_lea.sflag [#allocation3], %s4329_s28 }
0x16d9   : > { %p6276_p2 = pnand %p6279_p1, %p6661_p6 }
0x16db   : > { %6490 = dma.done.wait (!%p6276_p2), %s4330_s20, 16  }
0x16dc   : > { %6492 = vsyncadd (!%p6276_p2), %s4330_s20, 4294967280  ;;  %s8380_s21 = sld [smem:[#allocation8_spill]]  ;;  %s8381_s22 = sld [smem:[#allocation6_spill]] }
0x16dd   : > { %s8382_s20 = sld [smem:[#allocation9_spill]]  ;;  %s8383_s0 = smov %s6499_s30 }
0x16e2   : > { %p29_p3 = scmp.ge.s32.totalorder %s8380_s21, 4   ;;  %s8384_s30 = smov %s8381_s22 }
0x16e4   :  { %31 = sbr.rel (!%p29_p3) target bundleno = 10 (0xa), region = 143 }
0x16eb   :  { %4334 = vsyncpa [#allocation3], 1 }
0x16ec   :  { %4336 = vsyncpa [#allocation3 + $0x1], 1 }

</bundles_post_ra>
